<compile_context>
chip_gen: v6e
topology: v6e:2x2x1
jax: 0.10.0
libtpu: 0.0.40
codegen_flags: <defaults>
</compile_context>

<pallas_src>
import functools

import jax
import jax.numpy as jnp
from jax.experimental import pallas as pl
from jax.experimental.pallas import tpu as pltpu

EMBED = 312
E_PAD = 384                      # 3 * 128 : lane-clean contraction dim
CONV_OUT = 256
KSIZES = (2, 3, 4)
NTAPS = sum(KSIZES)              # 9
FEAT = CONV_OUT * len(KSIZES)    # 768
HIDDEN = 128
NCLASS = 13
NCLASS_PAD = 128                 # lane-dense output store; sliced to 13 outside


def _round_up(v, m):
    return (v + m - 1) // m * m


def _textcnn_kernel(TB, L,
                    x_ref, wall_ref, cb_ref,
                    fc1w_ref, fc1b_ref, fc2w_ref, fc2b_ref,
                    out_ref):
    # --- one fused MXU matmul over all 9 conv taps ---------------------------
    x = x_ref[...]                                            # (TB, L, E_PAD) bf16
    y = jnp.dot(x.reshape(TB * L, E_PAD), wall_ref[...],
                preferred_element_type=jnp.float32)           # (TB*L, 2304) f32
    y = y.reshape(TB, L, NTAPS * CONV_OUT)

    # --- per-conv: shifted-add accumulation + bias + relu + max-pool ----------
    feats = []
    tap = 0
    for ci, k in enumerate(KSIZES):
        l_out = L - k + 1
        acc = y[:, 0:l_out, tap * CONV_OUT:(tap + 1) * CONV_OUT]
        for tau in range(1, k):
            c0 = (tap + tau) * CONV_OUT
            acc = acc + y[:, tau:tau + l_out, c0:c0 + CONV_OUT]
        bias = cb_ref[:, ci * CONV_OUT:(ci + 1) * CONV_OUT]   # (1, 256) f32
        acc = jnp.maximum(acc + bias[:, None, :], 0.0)        # bias + relu (f32)
        feats.append(jnp.max(acc, axis=1))                    # time max -> (TB, 256)
        tap += k

    h = jnp.concatenate(feats, axis=1)                        # (TB, 768) f32
    # TODO(synk): nn.Dropout(0.3) is identity at inference; no stochastic mask applied.
    h1 = jnp.dot(h.astype(jnp.bfloat16), fc1w_ref[...],
                 preferred_element_type=jnp.float32) + fc1b_ref[...]
    out = jnp.dot(h1.astype(jnp.bfloat16), fc2w_ref[...],
                  preferred_element_type=jnp.float32) + fc2b_ref[...]
    out_ref[...] = out.astype(out_ref.dtype)                  # (TB, 128) lane-dense store


def textcnn_forward(x, params):
    """x: (B, L, EMBED) float32 -> (B, NCLASS) float32."""
    B, L, E = x.shape
    assert E == EMBED
    assert L >= max(KSIZES), "sequence must be at least as long as the widest conv"

    # Batch tile: keep the fused matmul output (TB*L, 2304) f32 (~9 MiB at 1024
    # rows) plus double-buffered bf16 activations inside the default scoped VMEM.
    ROW_BUDGET = 1024
    tb_cap = max(8, (ROW_BUDGET // max(L, 1)) // 8 * 8)
    TB = max(8, min(tb_cap, _round_up(B, 8), 512))
    B_pad = _round_up(B, TB)

    # --- parameter prep: bf16 matmul operands, f32 biases, padded dims -------
    (w2, b2), (w3, b3), (w4, b4) = params["convs"]
    w_all = jnp.concatenate([w2[0], w2[1],
                             w3[0], w3[1], w3[2],
                             w4[0], w4[1], w4[2], w4[3]], axis=1)   # (312, 2304)
    w_all = jnp.pad(w_all, ((0, E_PAD - EMBED), (0, 0))).astype(jnp.bfloat16)
    cb = jnp.concatenate([b2, b3, b4], axis=1).astype(jnp.float32)  # (1, 768)

    fc1w, fc1b = params["fc1"]
    fc2w, fc2b = params["fc2"]
    fc1w = fc1w.astype(jnp.bfloat16)                                # (768, 128)
    fc1b = fc1b.astype(jnp.float32)                                 # (1, 128)
    fc2w = jnp.pad(fc2w, ((0, 0), (0, NCLASS_PAD - NCLASS))).astype(jnp.bfloat16)
    fc2b = jnp.pad(fc2b, ((0, 0), (0, NCLASS_PAD - NCLASS))).astype(jnp.float32)

    x_p = jnp.pad(x, ((0, B_pad - B), (0, 0), (0, E_PAD - EMBED))).astype(jnp.bfloat16)

    kernel = functools.partial(_textcnn_kernel, TB, L)
    const = lambda i: (0, 0)

    out_p = pl.pallas_call(
        kernel,
        out_shape=jax.ShapeDtypeStruct((B_pad, NCLASS_PAD), jnp.float32),
        grid=(B_pad // TB,),
        in_specs=[
            pl.BlockSpec((TB, L, E_PAD), lambda i: (i, 0, 0)),     # activations (tiled on batch)
            pl.BlockSpec((E_PAD, NTAPS * CONV_OUT), const),        # fused conv weights (resident)
            pl.BlockSpec((1, FEAT), const),                        # conv biases
            pl.BlockSpec((FEAT, HIDDEN), const),                   # fc1 weight
            pl.BlockSpec((1, HIDDEN), const),                      # fc1 bias
            pl.BlockSpec((HIDDEN, NCLASS_PAD), const),             # fc2 weight (padded)
            pl.BlockSpec((1, NCLASS_PAD), const),                  # fc2 bias (padded)
        ],
        out_specs=pl.BlockSpec((TB, NCLASS_PAD), lambda i: (i, 0)),
        compiler_params=pltpu.CompilerParams(
            dimension_semantics=("parallel",)),
    )(x_p, w_all, cb, fc1w, fc1b, fc2w, fc2b)

    return out_p[:B, :NCLASS]


def init_params(key):
    keys = jax.random.split(key, 8)
    params = {"convs": []}
    for i, k in enumerate(KSIZES):
        w = jax.random.normal(keys[i], (k, EMBED, CONV_OUT), jnp.float32) * 0.02
        b = jax.random.normal(keys[i + 3], (1, CONV_OUT), jnp.float32) * 0.02
        params["convs"].append((w, b))
    params["fc1"] = (
        jax.random.normal(keys[6], (CONV_OUT * 3, HIDDEN), jnp.float32) * 0.02,
        jnp.zeros((1, HIDDEN), jnp.float32),
    )
    params["fc2"] = (
        jax.random.normal(keys[7], (HIDDEN, NCLASS), jnp.float32) * 0.02,
        jnp.zeros((1, NCLASS), jnp.float32),
    )
    return params


def reference_forward(x, params):
    """Pure-JAX f32 reference mirroring the PyTorch forward (dropout = identity)."""
    feats = []
    for (w, b), k in zip(params["convs"], KSIZES):
        l_out = x.shape[1] - k + 1
        acc = jnp.zeros((x.shape[0], l_out, CONV_OUT), jnp.float32)
        for tau in range(k):
            acc = acc + jnp.einsum("ble,ec->blc", x[:, tau:tau + l_out, :], w[tau])
        acc = jnp.maximum(acc + b[None, :, :], 0.0)
        feats.append(jnp.max(acc, axis=1))
    h = jnp.concatenate(feats, axis=1)
    fc1w, fc1b = params["fc1"]
    fc2w, fc2b = params["fc2"]
    h = h @ fc1w + fc1b
    return h @ fc2w + fc2b


if __name__ == "__main__":
    key = jax.random.PRNGKey(0)
    kx, kp = jax.random.split(key)

    B, L = 2, 8
    x = jax.random.normal(kx, (B, L, EMBED), jnp.float32)
    params = init_params(kp)

    out = textcnn_forward(x, params)
    out = jax.block_until_ready(out)

    ref = reference_forward(x, params)
    assert out.shape == (B, NCLASS)
    # bf16 matmul operands with f32 accumulation -> slightly loosened tolerance.
    assert jnp.allclose(out, ref, atol=1e-2, rtol=1e-2), "mismatch vs reference"

    print("KERNEL_OK")
</pallas_src>

<mosaic_0001>
module attributes {stable_mosaic.version = 11 : i64} {
  func.func @_textcnn_kernel(%arg0: i32, %arg1: memref<8x8x384xbf16, #tpu.memory_space<vmem>>, %arg2: memref<384x2304xbf16, #tpu.memory_space<vmem>>, %arg3: memref<1x768xf32, #tpu.memory_space<vmem>>, %arg4: memref<768x128xbf16, #tpu.memory_space<vmem>>, %arg5: memref<1x128xf32, #tpu.memory_space<vmem>>, %arg6: memref<128x128xbf16, #tpu.memory_space<vmem>>, %arg7: memref<1x128xf32, #tpu.memory_space<vmem>>, %arg8: memref<8x128xf32, #tpu.memory_space<vmem>>) attributes {dimension_semantics = [#tpu.dimension_semantics<parallel>], iteration_bounds = array<i64: 1>, scalar_prefetch = 0 : i64, scratch_operands = 0 : i64, tpu.core_type = #tpu.core_type<tc>, window_params = [{transform_indices = @transform_0, window_bounds = array<i64: 8, 8, 384>}, {pipeline_mode = #tpu.pipeline_mode<synchronous>, transform_indices = @transform_1, window_bounds = array<i64: 384, 2304>}, {pipeline_mode = #tpu.pipeline_mode<synchronous>, transform_indices = @transform_2, window_bounds = array<i64: 1, 768>}, {pipeline_mode = #tpu.pipeline_mode<synchronous>, transform_indices = @transform_3, window_bounds = array<i64: 768, 128>}, {pipeline_mode = #tpu.pipeline_mode<synchronous>, transform_indices = @transform_4, window_bounds = array<i64: 1, 128>}, {pipeline_mode = #tpu.pipeline_mode<synchronous>, transform_indices = @transform_5, window_bounds = array<i64: 128, 128>}, {pipeline_mode = #tpu.pipeline_mode<synchronous>, transform_indices = @transform_6, window_bounds = array<i64: 1, 128>}, {transform_indices = @transform_7, window_bounds = array<i64: 8, 128>}]} {
    %c0 = arith.constant 0 : index
    %c0_0 = arith.constant 0 : index
    %c0_1 = arith.constant 0 : index
    %0 = vector.load %arg1[%c0, %c0_0, %c0_1] : memref<8x8x384xbf16, #tpu.memory_space<vmem>>, vector<8x8x384xbf16>
    %1 = vector.shape_cast %0 : vector<8x8x384xbf16> to vector<64x384xbf16>
    %c0_2 = arith.constant 0 : index
    %c0_3 = arith.constant 0 : index
    %2 = vector.load %arg2[%c0_2, %c0_3] : memref<384x2304xbf16, #tpu.memory_space<vmem>>, vector<384x2304xbf16>
    %cst = arith.constant dense<0.000000e+00> : vector<64x2304xf32>
    %3 = tpu.matmul %1, %2, %cst {dimension_numbers = #tpu.dot_dimension_numbers<[1], [0], [0], [1], [0, 0, 1, 1], [], []>} : vector<64x384xbf16>, vector<384x2304xbf16>, vector<64x2304xf32> -> vector<64x2304xf32>
    %4 = vector.shape_cast %3 : vector<64x2304xf32> to vector<8x8x2304xf32>
    %5 = vector.extract_strided_slice %4 {offsets = [0, 0, 0], sizes = [8, 7, 256], strides = [1, 1, 1]} : vector<8x8x2304xf32> to vector<8x7x256xf32>
    %6 = vector.extract_strided_slice %4 {offsets = [0, 1, 256], sizes = [8, 7, 256], strides = [1, 1, 1]} : vector<8x8x2304xf32> to vector<8x7x256xf32>
    %7 = arith.addf %5, %6 : vector<8x7x256xf32>
    %c0_4 = arith.constant 0 : index
    %c0_5 = arith.constant 0 : index
    %8 = vector.load %arg3[%c0_4, %c0_5] : memref<1x768xf32, #tpu.memory_space<vmem>>, vector<1x256xf32>
    %9 = vector.shape_cast %8 : vector<1x256xf32> to vector<1x1x256xf32>
    %10 = vector.broadcast %9 : vector<1x1x256xf32> to vector<8x7x256xf32>
    %11 = arith.addf %7, %10 : vector<8x7x256xf32>
    %cst_6 = arith.constant 0.000000e+00 : f32
    %12 = vector.broadcast %cst_6 : f32 to vector<8x7x256xf32>
    %13 = arith.maximumf %11, %12 : vector<8x7x256xf32>
    %cst_7 = arith.constant dense<0xFF800000> : vector<8x256xf32>
    %14 = vector.multi_reduction <maximumf>, %13, %cst_7 [1] : vector<8x7x256xf32> to vector<8x256xf32>
    %15 = vector.extract_strided_slice %4 {offsets = [0, 0, 512], sizes = [8, 6, 256], strides = [1, 1, 1]} : vector<8x8x2304xf32> to vector<8x6x256xf32>
    %16 = vector.extract_strided_slice %4 {offsets = [0, 1, 768], sizes = [8, 6, 256], strides = [1, 1, 1]} : vector<8x8x2304xf32> to vector<8x6x256xf32>
    %17 = arith.addf %15, %16 : vector<8x6x256xf32>
    %18 = vector.extract_strided_slice %4 {offsets = [0, 2, 1024], sizes = [8, 6, 256], strides = [1, 1, 1]} : vector<8x8x2304xf32> to vector<8x6x256xf32>
    %19 = arith.addf %17, %18 : vector<8x6x256xf32>
    %c0_8 = arith.constant 0 : index
    %c256 = arith.constant 256 : index
    %20 = vector.load %arg3[%c0_8, %c256] : memref<1x768xf32, #tpu.memory_space<vmem>>, vector<1x256xf32>
    %21 = vector.shape_cast %20 : vector<1x256xf32> to vector<1x1x256xf32>
    %22 = vector.broadcast %21 : vector<1x1x256xf32> to vector<8x6x256xf32>
    %23 = arith.addf %19, %22 : vector<8x6x256xf32>
    %cst_9 = arith.constant 0.000000e+00 : f32
    %24 = vector.broadcast %cst_9 : f32 to vector<8x6x256xf32>
    %25 = arith.maximumf %23, %24 : vector<8x6x256xf32>
    %cst_10 = arith.constant dense<0xFF800000> : vector<8x256xf32>
    %26 = vector.multi_reduction <maximumf>, %25, %cst_10 [1] : vector<8x6x256xf32> to vector<8x256xf32>
    %27 = vector.extract_strided_slice %4 {offsets = [0, 0, 1280], sizes = [8, 5, 256], strides = [1, 1, 1]} : vector<8x8x2304xf32> to vector<8x5x256xf32>
    %28 = vector.extract_strided_slice %4 {offsets = [0, 1, 1536], sizes = [8, 5, 256], strides = [1, 1, 1]} : vector<8x8x2304xf32> to vector<8x5x256xf32>
    %29 = arith.addf %27, %28 : vector<8x5x256xf32>
    %30 = vector.extract_strided_slice %4 {offsets = [0, 2, 1792], sizes = [8, 5, 256], strides = [1, 1, 1]} : vector<8x8x2304xf32> to vector<8x5x256xf32>
    %31 = arith.addf %29, %30 : vector<8x5x256xf32>
    %32 = vector.extract_strided_slice %4 {offsets = [0, 3, 2048], sizes = [8, 5, 256], strides = [1, 1, 1]} : vector<8x8x2304xf32> to vector<8x5x256xf32>
    %33 = arith.addf %31, %32 : vector<8x5x256xf32>
    %c0_11 = arith.constant 0 : index
    %c512 = arith.constant 512 : index
    %34 = vector.load %arg3[%c0_11, %c512] : memref<1x768xf32, #tpu.memory_space<vmem>>, vector<1x256xf32>
    %35 = vector.shape_cast %34 : vector<1x256xf32> to vector<1x1x256xf32>
    %36 = vector.broadcast %35 : vector<1x1x256xf32> to vector<8x5x256xf32>
    %37 = arith.addf %33, %36 : vector<8x5x256xf32>
    %cst_12 = arith.constant 0.000000e+00 : f32
    %38 = vector.broadcast %cst_12 : f32 to vector<8x5x256xf32>
    %39 = arith.maximumf %37, %38 : vector<8x5x256xf32>
    %cst_13 = arith.constant dense<0xFF800000> : vector<8x256xf32>
    %40 = vector.multi_reduction <maximumf>, %39, %cst_13 [1] : vector<8x5x256xf32> to vector<8x256xf32>
    %41 = tpu.concatenate %14, %26, %40 in 1 : vector<8x256xf32>, vector<8x256xf32>, vector<8x256xf32> -> vector<8x768xf32>
    %42 = arith.truncf %41 : vector<8x768xf32> to vector<8x768xbf16>
    %c0_14 = arith.constant 0 : index
    %c0_15 = arith.constant 0 : index
    %43 = vector.load %arg4[%c0_14, %c0_15] : memref<768x128xbf16, #tpu.memory_space<vmem>>, vector<768x128xbf16>
    %cst_16 = arith.constant dense<0.000000e+00> : vector<8x128xf32>
    %44 = tpu.matmul %42, %43, %cst_16 {dimension_numbers = #tpu.dot_dimension_numbers<[1], [0], [0], [1], [0, 0, 1, 1], [], []>} : vector<8x768xbf16>, vector<768x128xbf16>, vector<8x128xf32> -> vector<8x128xf32>
    %c0_17 = arith.constant 0 : index
    %c0_18 = arith.constant 0 : index
    %45 = vector.load %arg5[%c0_17, %c0_18] : memref<1x128xf32, #tpu.memory_space<vmem>>, vector<1x128xf32>
    %46 = vector.broadcast %45 : vector<1x128xf32> to vector<8x128xf32>
    %47 = arith.addf %44, %46 : vector<8x128xf32>
    %48 = arith.truncf %47 : vector<8x128xf32> to vector<8x128xbf16>
    %c0_19 = arith.constant 0 : index
    %c0_20 = arith.constant 0 : index
    %49 = vector.load %arg6[%c0_19, %c0_20] : memref<128x128xbf16, #tpu.memory_space<vmem>>, vector<128x128xbf16>
    %cst_21 = arith.constant dense<0.000000e+00> : vector<8x128xf32>
    %50 = tpu.matmul %48, %49, %cst_21 {dimension_numbers = #tpu.dot_dimension_numbers<[1], [0], [0], [1], [0, 0, 1, 1], [], []>} : vector<8x128xbf16>, vector<128x128xbf16>, vector<8x128xf32> -> vector<8x128xf32>
    %c0_22 = arith.constant 0 : index
    %c0_23 = arith.constant 0 : index
    %51 = vector.load %arg7[%c0_22, %c0_23] : memref<1x128xf32, #tpu.memory_space<vmem>>, vector<1x128xf32>
    %52 = vector.broadcast %51 : vector<1x128xf32> to vector<8x128xf32>
    %53 = arith.addf %50, %52 : vector<8x128xf32>
    %c0_24 = arith.constant 0 : index
    %c0_25 = arith.constant 0 : index
    %54 = vector.load %arg8[%c0_24, %c0_25] : memref<8x128xf32, #tpu.memory_space<vmem>>, vector<8x128xf32>
    tpu.vector_store %arg8[%c0_24, %c0_25], %53 {strides = array<i32>} : memref<8x128xf32, #tpu.memory_space<vmem>>, vector<8x128xf32>,
    return
  }
  func.func @transform_0(%arg0: i32) -> (i32, i32, i32) {
    %c0_i32 = arith.constant 0 : i32
    %c0_i32_0 = arith.constant 0 : i32
    %c0_i32_1 = arith.constant 0 : i32
    return %arg0, %c0_i32, %c0_i32_0 : i32, i32, i32
  }
  func.func @transform_1(%arg0: i32) -> (i32, i32) {
    %c0_i32 = arith.constant 0 : i32
    %c0_i32_0 = arith.constant 0 : i32
    %c0_i32_1 = arith.constant 0 : i32
    return %c0_i32, %c0_i32_0 : i32, i32
  }
  func.func @transform_2(%arg0: i32) -> (i32, i32) {
    %c0_i32 = arith.constant 0 : i32
    %c0_i32_0 = arith.constant 0 : i32
    %c0_i32_1 = arith.constant 0 : i32
    return %c0_i32, %c0_i32_0 : i32, i32
  }
  func.func @transform_3(%arg0: i32) -> (i32, i32) {
    %c0_i32 = arith.constant 0 : i32
    %c0_i32_0 = arith.constant 0 : i32
    %c0_i32_1 = arith.constant 0 : i32
    return %c0_i32, %c0_i32_0 : i32, i32
  }
  func.func @transform_4(%arg0: i32) -> (i32, i32) {
    %c0_i32 = arith.constant 0 : i32
    %c0_i32_0 = arith.constant 0 : i32
    %c0_i32_1 = arith.constant 0 : i32
    return %c0_i32, %c0_i32_0 : i32, i32
  }
  func.func @transform_5(%arg0: i32) -> (i32, i32) {
    %c0_i32 = arith.constant 0 : i32
    %c0_i32_0 = arith.constant 0 : i32
    %c0_i32_1 = arith.constant 0 : i32
    return %c0_i32, %c0_i32_0 : i32, i32
  }
  func.func @transform_6(%arg0: i32) -> (i32, i32) {
    %c0_i32 = arith.constant 0 : i32
    %c0_i32_0 = arith.constant 0 : i32
    %c0_i32_1 = arith.constant 0 : i32
    return %c0_i32, %c0_i32_0 : i32, i32
  }
  func.func @transform_7(%arg0: i32) -> (i32, i32) {
    %c0_i32 = arith.constant 0 : i32
    %c0_i32_0 = arith.constant 0 : i32
    return %arg0, %c0_i32 : i32, i32
  }
}

</mosaic_0001>

<bundles_post_ra>
// kernel: tpu_custom_call.1
= control target key start
LH: loop header
LB: loop body
LE: loop exit
PB: predicated region body
PF: predicated region fallthrough
CT: control target
= control target key end

     0   :  { %12 = vsyncpa [#allocation3], 0  ;;  %s8306_s0 = inlined_call_operand.hbm [shape: bf16[8,8,384], index: 0, kind: input, shape index: {}]   ;;  %s8307_s1 = inlined_call_operand.hbm [shape: bf16[384,2304], index: 1, kind: input, shape index: {}]   ;;  %s8308_s2 = inlined_call_operand.hbm [shape: f32[1,768], index: 2, kind: input, shape index: {}]   ;;  %s8309_s3 = inlined_call_operand.hbm [shape: bf16[768,128], index: 3, kind: input, shape index: {}]   ;;  %s8310_s4 = inlined_call_operand.hbm [shape: f32[1,128], index: 4, kind: input, shape index: {}]   ;;  %s8311_s5 = inlined_call_operand.hbm [shape: bf16[128,128], index: 5, kind: input, shape index: {}]   ;;  %s8312_s6 = inlined_call_operand.hbm [shape: f32[1,128], index: 6, kind: input, shape index: {}]   ;;  %s8313_s7 = inlined_call_operand.hbm [shape: f32[8,128], index: 7, kind: output, shape index: {}]  }
   0x1   :  { %13 = vsyncpa [#allocation6], 0 }
   0x2   :  { %14 = vsyncpa [#allocation9], 0 }
   0x3   :  { %15 = vsyncpa [#allocation12], 0 }
   0x4   :  { %16 = vsyncpa [#allocation4], 0  ;;  %s7237_s24 = smov [#allocation5]  }
   0x5   :  { %s34_s25 = sshll.u32 %s7237_s24, 4  ;;  %s35_s25 = int_to_ptr.vmem [resolvable:$true] %s34_s25 }
   0x6   :  { %s7075_s26 = scalar_lea.vmem %s35_s25, 55296  ;;  %p7080_p1 = scmp.lt.s32.totalorder %s35_s25, %s35_s25 }
   0x7   :  { %p7076_p0 = scmp.ne.s32.totalorder %s35_s25, %s7075_s26  ;;  %p7081_p2 = scmp.lt.s32.totalorder %s7075_s26, %s7075_s26 }
   0x9   :  { %p7082_p3 = por %p7081_p2, %p7080_p1 }
   0xb   :  { %p7083_p4 = pnand %p7082_p3, %p7076_p0 }
   0xd   :  { %7086 = shalt.err (!%p7083_p4)
}
   0xe   :  { %s7238_s27 = smov 1152   ;;  %s7239_s28 = smov 72  }
   0xf   :  { %40 = dma.hbm_to_vmem [thread:$0]  %s8307_s1, 55296, %s35_s25, [#allocation6], %s7238_s27, %s7238_s27, %s7239_s28  }
  0x10   :  { %s7240_s8 = smov [#allocation8]  }
  0x11   :  { %s56_s9 = sshll.u32 %s7240_s8, 4  ;;  %s57_s9 = int_to_ptr.vmem [resolvable:$true] %s56_s9 }
  0x12   :  { %s7095_s10 = scalar_lea.vmem %s57_s9, 6144  ;;  %p7100_p6 = scmp.lt.s32.totalorder %s57_s9, %s57_s9 }
  0x13   :  { %p7096_p5 = scmp.ne.s32.totalorder %s57_s9, %s7095_s10  ;;  %p7101_p7 = scmp.lt.s32.totalorder %s7095_s10, %s7095_s10 }
  0x15   :  { %p7102_p8 = por %p7101_p7, %p7100_p6 }
  0x17   :  { %p7103_p9 = pnand %p7102_p8, %p7096_p5 }
  0x19   :  { %7106 = shalt.err (!%p7103_p9)
}
  0x1a   :  { %s7241_s11 = smov 64   ;;  %s7242_s12 = smov 4  }
  0x1b   :  { %62 = dma.hbm_to_vmem [thread:$0]  %s8309_s3, 6144, %s57_s9, [#allocation9], %s7241_s11, %s7241_s11, %s7242_s12  }
  0x1c   :  { %s7243_s15 = smov [#allocation11]   ;;  %s7244_s17 = smov [#allocation2]  }
  0x1d   :  { %s78_s16 = sshll.u32 %s7243_s15, 4  ;;  %s22_s1 = sshll.u32 %s7244_s17, 4  ;;  %s79_s16 = int_to_ptr.vmem [resolvable:$true] %s78_s16  ;;  %s23_s1 = int_to_ptr.vmem [resolvable:$true] %s22_s1 }
  0x1e   :  { %s7115_s18 = scalar_lea.vmem %s79_s16, 1024  ;;  %p7120_p11 = scmp.lt.s32.totalorder %s79_s16, %s79_s16 }
  0x1f   :  { %p7116_p10 = scmp.ne.s32.totalorder %s79_s16, %s7115_s18  ;;  %p7121_p12 = scmp.lt.s32.totalorder %s7115_s18, %s7115_s18 }
  0x21   :  { %p7122_p13 = por %p7121_p12, %p7120_p11 }
  0x23   :  { %p7123_p0 = pnand %p7122_p13, %p7116_p10 }
  0x25   :  { %7126 = shalt.err (!%p7123_p0)
}
  0x26   :  { %84 = dma.hbm_to_vmem [thread:$0]  %s8311_s5, 1024, %s79_s16, [#allocation12], %s7241_s11, %s7241_s11, %s7242_s12  }
  0x27   :  { %s7135_s21 = scalar_lea.vmem %s23_s1, 1536  ;;  %p7140_p2 = scmp.lt.s32.totalorder %s23_s1, %s23_s1 }
  0x28   :  { %p7136_p1 = scmp.ne.s32.totalorder %s23_s1, %s7135_s21  ;;  %p7141_p3 = scmp.lt.s32.totalorder %s7135_s21, %s7135_s21 }
  0x2a   :  { %p7142_p4 = por %p7141_p3, %p7140_p2 }
  0x2c   :  { %p7143_p5 = pnand %p7142_p4, %p7136_p1 }
  0x2e   :  { %7146 = shalt.err (!%p7143_p5)
}
  0x2f   :  { %s7245_s3 = smov 192   ;;  %s7246_s22 = smov 12  }
  0x30   :  { %28 = dma.hbm_to_vmem [thread:$0]  %s8306_s0, 1536, %s23_s1, [#allocation3], %s7245_s3, %s7245_s3, %s7246_s22  }
  0x31   :  { %s7247_s25 = smov [#allocation7]   ;;  %s7248_s27 = smov [#allocation10]  }
  0x32   :  { %s47_s26 = sshll.u32 %s7247_s25, 4  ;;  %s69_s28 = sshll.u32 %s7248_s27, 4  ;;  %s48_s26 = int_to_ptr.vmem [resolvable:$true] %s47_s26  ;;  %s70_s28 = int_to_ptr.vmem [resolvable:$true] %s69_s28 }
  0x33   :  { %s7155_s5 = scalar_lea.vmem %s48_s26, 96  ;;  %p7160_p7 = scmp.lt.s32.totalorder %s48_s26, %s48_s26 }
  0x34   :  { %p7156_p6 = scmp.ne.s32.totalorder %s48_s26, %s7155_s5  ;;  %p7161_p8 = scmp.lt.s32.totalorder %s7155_s5, %s7155_s5 }
  0x36   :  { %p7162_p9 = por %p7161_p8, %p7160_p7 }
  0x38   :  { %p7163_p10 = pnand %p7162_p9, %p7156_p6 }
  0x3a   :  { %7166 = shalt.err (!%p7163_p10)
}
  0x3b   :  { %50 = dma.hbm_to_vmem [thread:$0]  %s8308_s2, 96, %s48_s26, [#allocation6]  }
  0x3c   :  { %s7175_s8 = scalar_lea.vmem %s70_s28, 16  ;;  %s7179_s0 = scalar_lea.vmem %s70_s28, 32 }
  0x3d   :  { %p7176_p11 = scmp.ne.s32.totalorder %s70_s28, %s7175_s8  ;;  %p7180_p12 = scmp.lt.s32.totalorder %s70_s28, %s70_s28 }
  0x3e   :  { %p7181_p13 = scmp.lt.s32.totalorder %s7179_s0, %s7175_s8 }
  0x40   :  { %p7182_p0 = por %p7181_p13, %p7180_p12 }
  0x42   :  { %p7183_p1 = pnand %p7182_p0, %p7176_p11 }
  0x44   :  { %7186 = shalt.err (!%p7183_p1)
}
  0x45   :  { %72 = dma.hbm_to_vmem [thread:$0]  %s8310_s4, 16, %s70_s28, [#allocation9]  }
  0x46   :  { %s7249_s11 = smov [#allocation13]  }
  0x47   :  { %s91_s12 = sshll.u32 %s7249_s11, 4  ;;  %s92_s12 = int_to_ptr.vmem [resolvable:$true] %s91_s12 }
  0x48   :  { %s7195_s13 = scalar_lea.vmem %s92_s12, 16  ;;  %s7199_s14 = scalar_lea.vmem %s92_s12, 32 }
  0x49   :  { %p7196_p2 = scmp.ne.s32.totalorder %s92_s12, %s7195_s13  ;;  %p7200_p3 = scmp.lt.s32.totalorder %s92_s12, %s92_s12 }
  0x4a   :  { %p7201_p4 = scmp.lt.s32.totalorder %s7199_s14, %s7195_s13 }
  0x4c   :  { %p7202_p5 = por %p7201_p4, %p7200_p3 }
  0x4e   :  { %p7203_p6 = pnand %p7202_p5, %p7196_p2 }
  0x50   :  { %7206 = shalt.err (!%p7203_p6)
}
  0x51   :  { %94 = dma.hbm_to_vmem [thread:$0]  %s8312_s6, 16, %s92_s12, [#allocation12]  }
  0x52   :  { %7227 = dma.done.wait [#allocation3], 1536  }
  0x53   :  { %7228 = vsyncadd [#allocation3], 4294965760 }
  0x54   :  { %7229 = dma.done.wait [#allocation6], 55392  }
  0x55   :  { %7230 = vsyncadd [#allocation6], 4294911904 }
  0x56   :  { %7231 = dma.done.wait [#allocation9], 6160  }
  0x57   :  { %7232 = vsyncadd [#allocation9], 4294961136 }
  0x58   :  { %7233 = dma.done.wait [#allocation12], 1040  }
  0x59   :  { %7234 = vsyncadd [#allocation12], 4294966256  ;;  %v8314_v0 = vmov 0   ;;  %v6323_v1 = vld [vmem:[#allocation5 + $0x3f4] ss:$72 sps:$4 sm:$0xff]   ;;  %vm4211_vm0 = vcmask 1046528  }
  0x5a   :  { %2894 = vmatprep.mubr.bf16.mxu1 %v8314_v0  ;;  %v6325_v2 = vld [vmem:[#allocation5 + $0xcf4] ss:$72 sps:$4 sm:$0xff]   ;;  %2789 = vmatprep.subr.bf16.mxu0 %v6323_v1  ;;  %v6327_v3 = vld [vmem:[#allocation5 + $0x3f0] ss:$72 sps:$4 sm:$0xff]   ;;  %v6329_v5 = vld [vmem:[#allocation5 + $0x364] ss:$72 sps:$4 sm:$0xff]  }
  0x5b   :  { %v6328_v4 = vld [vmem:[#allocation5 + $0xcf0] ss:$72 sps:$4 sm:$0xff]   ;;  %2862 = vmatprep.subr.bf16.mxu1 %v6325_v2  ;;  %2790 = vmatpush1.bf16.msra.mxu0 %v6327_v3  ;;  %v6331_v6 = vld [vmem:[#allocation5 + $0xc64] ss:$72 sps:$4 sm:$0xff]   ;;  %v6333_v7 = vld [vmem:[#allocation5 + $0x360] ss:$72 sps:$4 sm:$0xff]  }
  0x5c   :  { %2863 = vmatpush1.bf16.msra.mxu1 %v6328_v4  ;;  %2791 = vmatprep.subr.bf16.mxu0 %v6329_v5  ;;  %v6334_v8 = vld [vmem:[#allocation5 + $0xc60] ss:$72 sps:$4 sm:$0xff]   ;;  %v6335_v9 = vld [vmem:[#allocation5 + $0x2d4] ss:$72 sps:$4 sm:$0xff]   ;;  %v6339_v11 = vld [vmem:[#allocation5 + $0x2d0] ss:$72 sps:$4 sm:$0xff]  }
  0x5d   :  { %2864 = vmatprep.subr.bf16.mxu1 %v6331_v6  ;;  %v6337_v10 = vld [vmem:[#allocation5 + $0xbd4] ss:$72 sps:$4 sm:$0xff]   ;;  %v6340_v12 = vld [vmem:[#allocation5 + $0xbd0] ss:$72 sps:$4 sm:$0xff]   ;;  %v6341_v13 = vld [vmem:[#allocation5 + $0x244] ss:$72 sps:$4 sm:$0xff]  }
  0x5e   :  { %v6343_v14 = vld [vmem:[#allocation5 + $0xb44] ss:$72 sps:$4 sm:$0xff]   ;;  %v6345_v15 = vld [vmem:[#allocation5 + $0x240] ss:$72 sps:$4 sm:$0xff]   ;;  %v6347_v17 = vld [vmem:[#allocation5 + $0x1b4] ss:$72 sps:$4 sm:$0xff]  }
  0x5f   :  { %2792 = vmatpush1.bf16.msra.mxu0 %v6333_v7  ;;  %v6346_v16 = vld [vmem:[#allocation5 + $0xb40] ss:$72 sps:$4 sm:$0xff]   ;;  %v6349_v18 = vld [vmem:[#allocation5 + $0xab4] ss:$72 sps:$4 sm:$0xff]   ;;  %v6351_v19 = vld [vmem:[#allocation5 + $0x1b0] ss:$72 sps:$4 sm:$0xff]  }
  0x60   :  { %2865 = vmatpush1.bf16.msra.mxu1 %v6334_v8  ;;  %2793 = vmatprep.subr.bf16.mxu0 %v6335_v9  ;;  %v6352_v20 = vld [vmem:[#allocation5 + $0xab0] ss:$72 sps:$4 sm:$0xff]   ;;  %v6353_v21 = vld [vmem:[#allocation5 + $0x124] ss:$72 sps:$4 sm:$0xff]   ;;  %v6357_v23 = vld [vmem:[#allocation5 + $0x120] ss:$72 sps:$4 sm:$0xff]  }
  0x61   :  { %2866 = vmatprep.subr.bf16.mxu1 %v6337_v10  ;;  %v6355_v22 = vld [vmem:[#allocation5 + $0xa24] ss:$72 sps:$4 sm:$0xff]   ;;  %v6358_v24 = vld [vmem:[#allocation5 + $0xa20] ss:$72 sps:$4 sm:$0xff]   ;;  %v6359_v25 = vld [vmem:[#allocation5 + $0x94] ss:$72 sps:$4 sm:$0xff]  }
  0x62   :  { %v6361_v26 = vld [vmem:[#allocation5 + $0x994] ss:$72 sps:$4 sm:$0xff]   ;;  %v6363_v27 = vld [vmem:[#allocation5 + $0x90] ss:$72 sps:$4 sm:$0xff]   ;;  %v6365_v29 = vld [vmem:[#allocation5 + $0x4] ss:$72 sps:$4 sm:$0xff]  }
  0x63   :  { %2794 = vmatpush1.bf16.msra.mxu0 %v6339_v11  ;;  %v6364_v28 = vld [vmem:[#allocation5 + $0x990] ss:$72 sps:$4 sm:$0xff]   ;;  %v6367_v30 = vld [vmem:[#allocation5 + $0x904] ss:$72 sps:$4 sm:$0xff]   ;;  %v6369_v31 = vld [vmem:[#allocation5] ss:$72 sps:$4 sm:$0xff]  }
  0x64   :  { %2867 = vmatpush1.bf16.msra.mxu1 %v6340_v12  ;;  %2795 = vmatprep.subr.bf16.mxu0 %v6341_v13  ;;  %v6370_v32 = vld [vmem:[#allocation5 + $0x900] ss:$72 sps:$4 sm:$0xff]   ;;  %v6371_v33 = vld [vmem:[#allocation5 + $0x874] ss:$72 sps:$4 sm:$0xff]   ;;  %v6376_v37 = vld [vmem:[#allocation5 + $0x870] ss:$72 sps:$4 sm:$0xff]  }
  0x65   :  { %2868 = vmatprep.subr.bf16.mxu1 %v6343_v14  ;;  %v6375_v34 = vld [vmem:[#allocation5 + $0x3fc] ss:$72 sps:$4 sm:$0xff]   ;;  %v7316_v35 = vld [vmem:[#allocation2 + $0x8] ss:$12 sps:$4 sm:$0xff]   ;;  %v6373_v36 = vld [vmem:[#allocation5 + $0x3f8] ss:$72 sps:$4 sm:$0xff]  }
  0x66   :  { %v6378_v38 = vld [vmem:[#allocation5 + $0x7e4] ss:$72 sps:$4 sm:$0xff]   ;;  %v6380_v40 = vld [vmem:[#allocation5 + $0x368] ss:$72 sps:$4 sm:$0xff]   ;;  %v6384_v42 = vld [vmem:[#allocation5 + $0x754] ss:$72 sps:$4 sm:$0xff]  }
  0x67   :  { %2796 = vmatpush1.bf16.msra.mxu0 %v6345_v15  ;;  %v6382_v39 = vld [vmem:[#allocation5 + $0x36c] ss:$72 sps:$4 sm:$0xff]   ;;  %v6383_v41 = vld [vmem:[#allocation5 + $0x7e0] ss:$72 sps:$4 sm:$0xff]   ;;  %v6388_v43 = vld [vmem:[#allocation5 + $0x2dc] ss:$72 sps:$4 sm:$0xff]  }
  0x68   :  { %2869 = vmatpush1.bf16.msra.mxu1 %v6346_v16  ;;  %2797 = vmatprep.subr.bf16.mxu0 %v6347_v17  ;;  %v6386_v44 = vld [vmem:[#allocation5 + $0x2d8] ss:$72 sps:$4 sm:$0xff]   ;;  %v6390_v46 = vld [vmem:[#allocation5 + $0x6c4] ss:$72 sps:$4 sm:$0xff]   ;;  %v6392_v48 = vld [vmem:[#allocation5 + $0x248] ss:$72 sps:$4 sm:$0xff]  }
  0x69   :  { %2870 = vmatprep.subr.bf16.mxu1 %v6349_v18  ;;  %v6389_v45 = vld [vmem:[#allocation5 + $0x750] ss:$72 sps:$4 sm:$0xff]   ;;  %v6394_v47 = vld [vmem:[#allocation5 + $0x24c] ss:$72 sps:$4 sm:$0xff]   ;;  %v6395_v49 = vld [vmem:[#allocation5 + $0x6c0] ss:$72 sps:$4 sm:$0xff]  }
  0x6a   :  { %v6396_v50 = vld [vmem:[#allocation5 + $0x634] ss:$72 sps:$4 sm:$0xff]   ;;  %v7320_v51 = vld [vmem:[#allocation2 + $0x4] ss:$12 sps:$4 sm:$0xff]   ;;  %v6398_v53 = vld [vmem:[#allocation5 + $0x1b8] ss:$72 sps:$4 sm:$0xff]  }
  0x6b   :  { %2798 = vmatpush1.bf16.msra.mxu0 %v6351_v19  ;;  %v6400_v52 = vld [vmem:[#allocation5 + $0x1bc] ss:$72 sps:$4 sm:$0xff]   ;;  %2821 = vmatprep.mubr.bf16.mxu0 %v7320_v51  ;;  %v6401_v54 = vld [vmem:[#allocation5 + $0x630] ss:$72 sps:$4 sm:$0xff]   ;;  %v6406_v56 = vld [vmem:[#allocation5 + $0x12c] ss:$72 sps:$4 sm:$0xff]  }
  0x6c   :  { %2871 = vmatpush1.bf16.msra.mxu1 %v6352_v20  ;;  %2799 = vmatprep.subr.bf16.mxu0 %v6353_v21  ;;  %v6402_v55 = vld [vmem:[#allocation5 + $0x5a4] ss:$72 sps:$4 sm:$0xff]   ;;  %v6404_v57 = vld [vmem:[#allocation5 + $0x128] ss:$72 sps:$4 sm:$0xff]   ;;  %v6408_v60 = vld [vmem:[#allocation5 + $0x514] ss:$72 sps:$4 sm:$0xff]  }
  0x6d   :  { %2872 = vmatprep.subr.bf16.mxu1 %v6355_v22  ;;  %v6407_v58 = vld [vmem:[#allocation5 + $0x5a0] ss:$72 sps:$4 sm:$0xff]   ;;  %v6412_v61 = vld [vmem:[#allocation5 + $0x9c] ss:$72 sps:$4 sm:$0xff]   ;;  %v6413_v63 = vld [vmem:[#allocation5 + $0x510] ss:$72 sps:$4 sm:$0xff]  }
  0x6e   :  { %v7323_v59 = vld [vmem:[#allocation2 + $0x20] ss:$12 sps:$4 sm:$0xff]   ;;  %v6416_v3 = vld [vmem:[#allocation5 + $0x8] ss:$72 sps:$4 sm:$0xff]   ;;  %v7327_v5 = vld [vmem:[#allocation2 + $0x38] ss:$12 sps:$4 sm:$0xff]  }
  0x6f   :  { %2800 = vmatpush1.bf16.msra.mxu0 %v6357_v23  ;;  %v6410_v62 = vld [vmem:[#allocation5 + $0x98] ss:$72 sps:$4 sm:$0xff]   ;;  %v6414_v1 = vld [vmem:[#allocation5 + $0x484] ss:$72 sps:$4 sm:$0xff]   ;;  %v6429_v13 = vld [vmem:[#allocation5 + $0x7e8] ss:$72 sps:$4 sm:$0xff]  }
  0x70   :  { %2873 = vmatpush1.bf16.msra.mxu1 %v6358_v24  ;;  %2801 = vmatprep.subr.bf16.mxu0 %v6359_v25  ;;  %v6418_v2 = vld [vmem:[#allocation5 + $0xc] ss:$72 sps:$4 sm:$0xff]   ;;  %v6419_v4 = vld [vmem:[#allocation5 + $0x480] ss:$72 sps:$4 sm:$0xff]   ;;  %v6425_v6 = vld [vmem:[#allocation5 + $0x87c] ss:$72 sps:$4 sm:$0xff]  }
  0x71   :  { %2874 = vmatprep.subr.bf16.mxu1 %v6361_v26  ;;  %v6428_v7 = vld [vmem:[#allocation5 + $0xcfc] ss:$72 sps:$4 sm:$0xff]   ;;  %v7329_v8 = vld [vmem:[#allocation2] ss:$12 sps:$4 sm:$0xff]   ;;  %v6432_v14 = vld [vmem:[#allocation5 + $0xc68] ss:$72 sps:$4 sm:$0xff]  }
  0x72   :  { %v6423_v9 = vld [vmem:[#allocation5 + $0x878] ss:$72 sps:$4 sm:$0xff]   ;;  %v6431_v11 = vld [vmem:[#allocation5 + $0x7ec] ss:$72 sps:$4 sm:$0xff]   ;;  %v7333_v15 = vld [vmem:[#allocation2 + $0x1c] ss:$12 sps:$4 sm:$0xff]  }
  0x73   :  { %2802 = vmatpush1.bf16.msra.mxu0 %v6363_v27  ;;  %v6426_v10 = vld [vmem:[#allocation5 + $0xcf8] ss:$72 sps:$4 sm:$0xff]   ;;  %v6434_v12 = vld [vmem:[#allocation5 + $0xc6c] ss:$72 sps:$4 sm:$0xff]   ;;  %v7336_v16 = vld [vmem:[#allocation2 + $0x50] ss:$12 sps:$4 sm:$0xff]  }
  0x74   :  { %2875 = vmatpush1.bf16.msra.mxu1 %v6364_v28  ;;  %2803 = vmatprep.subr.bf16.mxu0 %v6365_v29  ;;  %v6441_v17 = vld [vmem:[#allocation5 + $0x75c] ss:$72 sps:$4 sm:$0xff]   ;;  %v6439_v20 = vld [vmem:[#allocation5 + $0x758] ss:$72 sps:$4 sm:$0xff]   ;;  %v6447_v22 = vld [vmem:[#allocation5 + $0x6cc] ss:$72 sps:$4 sm:$0xff]  }
  0x75   :  { %2876 = vmatprep.subr.bf16.mxu1 %v6367_v30  ;;  %v6444_v18 = vld [vmem:[#allocation5 + $0xbdc] ss:$72 sps:$4 sm:$0xff]   ;;  %v6442_v21 = vld [vmem:[#allocation5 + $0xbd8] ss:$72 sps:$4 sm:$0xff]   ;;  %v6450_v23 = vld [vmem:[#allocation5 + $0xb4c] ss:$72 sps:$4 sm:$0xff]  }
  0x76   :  { %v7339_v19 = vld [vmem:[#allocation2 + $0x18] ss:$12 sps:$4 sm:$0xff]   ;;  %v7343_v24 = vld [vmem:[#allocation2 + $0x34] ss:$12 sps:$4 sm:$0xff]   ;;  %v6445_v25 = vld [vmem:[#allocation5 + $0x6c8] ss:$72 sps:$4 sm:$0xff]  }
  0x77   :  { %2804 = vmatpush1.bf16.msra.mxu0 %v6369_v31  ;;  %v6448_v26 = vld [vmem:[#allocation5 + $0xb48] ss:$72 sps:$4 sm:$0xff]   ;;  %v6457_v27 = vld [vmem:[#allocation5 + $0x63c] ss:$72 sps:$4 sm:$0xff]   ;;  %v6455_v30 = vld [vmem:[#allocation5 + $0x638] ss:$72 sps:$4 sm:$0xff]  }
  0x78   :  { %2877 = vmatpush1.bf16.msra.mxu1 %v6370_v32  ;;  %2805 = vmatprep.subr.bf16.mxu0 %v6371_v33  ;;  %v6460_v28 = vld [vmem:[#allocation5 + $0xabc] ss:$72 sps:$4 sm:$0xff]   ;;  %v6458_v31 = vld [vmem:[#allocation5 + $0xab8] ss:$72 sps:$4 sm:$0xff]   ;;  %v6463_v32 = vld [vmem:[#allocation5 + $0x5ac] ss:$72 sps:$4 sm:$0xff]  }
  0x79   :  { %2935 = vmatprep.subr.bf16.mxu1 %v6375_v34  ;;  %v7347_v29 = vld [vmem:[#allocation2 + $0x30] ss:$12 sps:$4 sm:$0xff]   ;;  %v6466_v33 = vld [vmem:[#allocation5 + $0xa2c] ss:$72 sps:$4 sm:$0xff]   ;;  %vm4974_vm1 = vcmask 1041409   ;;  %vm4976_vm2 = vcmask 1042434  }
  0x7a   :  { %v7349_v34 = vld [vmem:[#allocation2 + $0x4c] ss:$12 sps:$4 sm:$0xff]   ;;  %vm4978_vm3 = vcmask 1043459   ;;  %vm4980_vm4 = vcmask 1044484   ;;  %vm4982_vm5 = vcmask 1045509   ;;  %vm4984_vm6 = vcmask 1046534  }
  0x7b   :  { %2895 = vmatmul.mubr.bf16.vlgmr.msra.gmra.mxu1 %v7316_v35  ;;  %2806 = vmatpush2.bf16.msra.mxu0 %v6376_v37  ;;  %v6464_v37 = vld [vmem:[#allocation5 + $0xa28] ss:$72 sps:$4 sm:$0xff]   ;;  %vm4986_vm7 = vcmask 1047559   ;;  %vm4496_vm8 = vcmask 1045504   ;;  %vm4845_vm9 = vcmask 1044480   ;;  %vm7252_vm10 = vmmov 0  }
  0x7c   :  { %2936 = vmatpush1.bf16.msra.mxu1 %v6373_v36  ;;  %2807 = vmatprep.subr.bf16.mxu0 %v6378_v38  ;;  %v6461_v36 = vld [vmem:[#allocation5 + $0x5a8] ss:$72 sps:$4 sm:$0xff]   ;;  %v6473_v38 = vld [vmem:[#allocation5 + $0x51c] ss:$72 sps:$4 sm:$0xff]   ;;  %s7253_s4 = smov [#allocation14]  }
  0x7d   :  { %2937 = vmatprep.subr.bf16.mxu1 %v6382_v39  ;;  %2904 = vmatprep.mubr.bf16.mxu1 %v8314_v0  ;;  %v6476_v39 = vld [vmem:[#allocation5 + $0x99c] ss:$72 sps:$4 sm:$0xff]   ;;  %s5697_s6 = sshll.u32 %s7253_s4, 4  ;;  %s5698_s6 = int_to_ptr.vmem [resolvable:$true] %s5697_s6 }
  0x7e   :  { %s7207_s16 = scalar_lea.vmem %s5698_s6, 128  ;;  %p7212_p8 = scmp.lt.s32.totalorder %s5698_s6, %s5698_s6 }
  0x7f   :  { %2808 = vmatpush2.bf16.msra.mxu0 %v6383_v41  ;;  %v6471_v41 = vld [vmem:[#allocation5 + $0x518] ss:$72 sps:$4 sm:$0xff]   ;;  %p7208_p7 = scmp.ne.s32.totalorder %s5698_s6, %s7207_s16  ;;  %p7213_p9 = scmp.lt.s32.totalorder %s7207_s16, %s7207_s16 }
  0x80   :  { %2938 = vmatpush1.bf16.msra.mxu1 %v6380_v40  ;;  %2809 = vmatprep.subr.bf16.mxu0 %v6384_v42  ;;  %v7353_v40 = vld [vmem:[#allocation2 + $0x48] ss:$12 sps:$4 sm:$0xff]   ;;  %v6474_v42 = vld [vmem:[#allocation5 + $0x998] ss:$72 sps:$4 sm:$0xff]  }
  0x81   :  { %2939 = vmatprep.subr.bf16.mxu1 %v6388_v43  ;;  %v6479_v43 = vld [vmem:[#allocation5 + $0x48c] ss:$72 sps:$4 sm:$0xff]   ;;  %p7214_p10 = por %p7213_p9, %p7212_p8 }
  0x83   :  { %2810 = vmatpush2.bf16.msra.mxu0 %v6389_v45  ;;  %2905 = vmatmul.mubr.bf16.gmra.mxu1 %v7323_v59  ;;  %v6477_v45 = vld [vmem:[#allocation5 + $0x488] ss:$72 sps:$4 sm:$0xff]   ;;  %p7215_p11 = pnand %p7214_p10, %p7208_p7 }
  0x84   :  { %2940 = vmatpush1.bf16.msra.mxu1 %v6386_v44  ;;  %2811 = vmatprep.subr.bf16.mxu0 %v6390_v46  ;;  %v6482_v44 = vld [vmem:[#allocation5 + $0x90c] ss:$72 sps:$4 sm:$0xff]   ;;  %v6480_v46 = vld [vmem:[#allocation5 + $0x908] ss:$72 sps:$4 sm:$0xff]  }
  0x85   :  { %2941 = vmatprep.subr.bf16.mxu1 %v6394_v47  ;;  %2914 = vmatprep.mubr.bf16.mxu1 %v8314_v0  ;;  %v6485_v47 = vld [vmem:[#allocation5 + $0x404] ss:$72 sps:$4 sm:$0xff]  }
  0x87   :  { %2812 = vmatpush2.bf16.msra.mxu0 %v6395_v49  ;;  %v6483_v49 = vld [vmem:[#allocation5 + $0x400] ss:$72 sps:$4 sm:$0xff]  }
  0x88   :  { %2942 = vmatpush1.bf16.msra.mxu1 %v6392_v48  ;;  %2813 = vmatprep.subr.bf16.mxu0 %v6396_v50  ;;  %v6488_v48 = vld [vmem:[#allocation5 + $0xd04] ss:$72 sps:$4 sm:$0xff]   ;;  %v6486_v50 = vld [vmem:[#allocation5 + $0xd00] ss:$72 sps:$4 sm:$0xff]  }
  0x89   :  { %2943 = vmatprep.subr.bf16.mxu1 %v6400_v52  ;;  %v6491_v52 = vld [vmem:[#allocation5 + $0x374] ss:$72 sps:$4 sm:$0xff]  }
  0x8b   :  { %2814 = vmatpush2.bf16.msra.mxu0 %v6401_v54  ;;  %2915 = vmatmul.mubr.bf16.gmra.mxu1 %v7327_v5  ;;  %v6489_v54 = vld [vmem:[#allocation5 + $0x370] ss:$72 sps:$4 sm:$0xff]  }
  0x8c   :  { %2944 = vmatpush1.bf16.msra.mxu1 %v6398_v53  ;;  %2815 = vmatprep.subr.bf16.mxu0 %v6402_v55  ;;  %v6494_v53 = vld [vmem:[#allocation5 + $0xc74] ss:$72 sps:$4 sm:$0xff]   ;;  %v6492_v55 = vld [vmem:[#allocation5 + $0xc70] ss:$72 sps:$4 sm:$0xff]  }
  0x8d   :  { %2945 = vmatprep.subr.bf16.mxu1 %v6406_v56  ;;  %2924 = vmatprep.mubr.bf16.mxu1 %v8314_v0  ;;  %v6497_v56 = vld [vmem:[#allocation5 + $0x2e4] ss:$72 sps:$4 sm:$0xff]  }
  0x8f   :  { %2816 = vmatpush2.bf16.msra.mxu0 %v6407_v58  ;;  %v6495_v58 = vld [vmem:[#allocation5 + $0x2e0] ss:$72 sps:$4 sm:$0xff]  }
  0x90   :  { %2946 = vmatpush1.bf16.msra.mxu1 %v6404_v57  ;;  %2817 = vmatprep.subr.bf16.mxu0 %v6408_v60  ;;  %v6500_v57 = vld [vmem:[#allocation5 + $0xbe4] ss:$72 sps:$4 sm:$0xff]   ;;  %v6498_v60 = vld [vmem:[#allocation5 + $0xbe0] ss:$72 sps:$4 sm:$0xff]  }
  0x91   :  { %2947 = vmatprep.subr.bf16.mxu1 %v6412_v61  ;;  %v6503_v61 = vld [vmem:[#allocation5 + $0x254] ss:$72 sps:$4 sm:$0xff]  }
  0x93   :  { %2818 = vmatpush2.bf16.msra.mxu0 %v6413_v63  ;;  %2925 = vmatmul.mubr.bf16.gmra.mxu1 %v7336_v16  ;;  %v6501_v63 = vld [vmem:[#allocation5 + $0x250] ss:$72 sps:$4 sm:$0xff]  }
  0x94   :  { %2948 = vmatpush1.bf16.msra.mxu1 %v6410_v62  ;;  %2819 = vmatprep.subr.bf16.mxu0 %v6414_v1  ;;  %v6506_v62 = vld [vmem:[#allocation5 + $0xb54] ss:$72 sps:$4 sm:$0xff]   ;;  %v6504_v1 = vld [vmem:[#allocation5 + $0xb50] ss:$72 sps:$4 sm:$0xff]  }
  0x95   :  { %2949 = vmatprep.subr.bf16.mxu1 %v6418_v2  ;;  %2967 = vmatprep.mubr.bf16.mxu1 %v7320_v51  ;;  %v6509_v2 = vld [vmem:[#allocation5 + $0x1c4] ss:$72 sps:$4 sm:$0xff]  }
  0x97   :  { %2820 = vmatpush2.bf16.msra.mxu0 %v6419_v4  ;;  %v6507_v4 = vld [vmem:[#allocation5 + $0x1c0] ss:$72 sps:$4 sm:$0xff]  }
  0x98   :  { %2950 = vmatpush1.bf16.msra.mxu1 %v6416_v3  ;;  %3008 = vmatprep.subr.bf16.mxu0 %v6428_v7  ;;  %v6512_v3 = vld [vmem:[#allocation5 + $0xac4] ss:$72 sps:$4 sm:$0xff]   ;;  %v6515_v7 = vld [vmem:[#allocation5 + $0x134] ss:$72 sps:$4 sm:$0xff]  }
  0x99   :  { %2951 = vmatprep.subr.bf16.mxu1 %v6425_v6  ;;  %v6510_v6 = vld [vmem:[#allocation5 + $0xac0] ss:$72 sps:$4 sm:$0xff]  }
  0x9a   :  { %2822 = vmatmul.mubr.bf16.vlgmr.msra.gmra.mxu0 %v7329_v8 }
  0x9b   :  { %3009 = vmatpush1.bf16.msra.mxu0 %v6426_v10  ;;  %2831 = vmatprep.mubr.bf16.mxu0 %v7333_v15  ;;  %v6513_v10 = vld [vmem:[#allocation5 + $0x130] ss:$72 sps:$4 sm:$0xff]  }
  0x9c   :  { %2952 = vmatpush2.bf16.msra.mxu1 %v6423_v9  ;;  %3010 = vmatprep.subr.bf16.mxu0 %v6434_v12  ;;  %v6518_v9 = vld [vmem:[#allocation5 + $0xa34] ss:$72 sps:$4 sm:$0xff]   ;;  %v6521_v12 = vld [vmem:[#allocation5 + $0xa4] ss:$72 sps:$4 sm:$0xff]  }
  0x9d   :  { %2953 = vmatprep.subr.bf16.mxu1 %v6431_v11  ;;  %v6516_v11 = vld [vmem:[#allocation5 + $0xa30] ss:$72 sps:$4 sm:$0xff]  }
  0x9f   :  { %3011 = vmatpush1.bf16.msra.mxu0 %v6432_v14  ;;  %v6519_v14 = vld [vmem:[#allocation5 + $0xa0] ss:$72 sps:$4 sm:$0xff]  }
  0xa0   :  { %2954 = vmatpush2.bf16.msra.mxu1 %v6429_v13  ;;  %3012 = vmatprep.subr.bf16.mxu0 %v6444_v18  ;;  %v6524_v13 = vld [vmem:[#allocation5 + $0x9a4] ss:$72 sps:$4 sm:$0xff]   ;;  %v6527_v18 = vld [vmem:[#allocation5 + $0x14] ss:$72 sps:$4 sm:$0xff]  }
  0xa1   :  { %2955 = vmatprep.subr.bf16.mxu1 %v6441_v17  ;;  %v6522_v17 = vld [vmem:[#allocation5 + $0x9a0] ss:$72 sps:$4 sm:$0xff]  }
  0xa2   :  { %2832 = vmatmul.mubr.bf16.gmra.mxu0 %v7339_v19 }
  0xa3   :  { %3013 = vmatpush1.bf16.msra.mxu0 %v6442_v21  ;;  %2841 = vmatprep.mubr.bf16.mxu0 %v7343_v24  ;;  %v6525_v21 = vld [vmem:[#allocation5 + $0x10] ss:$72 sps:$4 sm:$0xff]  }
  0xa4   :  { %2956 = vmatpush2.bf16.msra.mxu1 %v6439_v20  ;;  %3014 = vmatprep.subr.bf16.mxu0 %v6450_v23  ;;  %v6530_v20 = vld [vmem:[#allocation5 + $0x914] ss:$72 sps:$4 sm:$0xff]   ;;  %v6533_v23 = vld [vmem:[#allocation5 + $0x884] ss:$72 sps:$4 sm:$0xff]  }
  0xa5   :  { %2957 = vmatprep.subr.bf16.mxu1 %v6447_v22  ;;  %v6528_v22 = vld [vmem:[#allocation5 + $0x910] ss:$72 sps:$4 sm:$0xff]  }
  0xa7   :  { %3015 = vmatpush1.bf16.msra.mxu0 %v6448_v26  ;;  %v6531_v26 = vld [vmem:[#allocation5 + $0x880] ss:$72 sps:$4 sm:$0xff]  }
  0xa8   :  { %2958 = vmatpush2.bf16.msra.mxu1 %v6445_v25  ;;  %3016 = vmatprep.subr.bf16.mxu0 %v6460_v28  ;;  %v6536_v25 = vld [vmem:[#allocation5 + $0x40c] ss:$72 sps:$4 sm:$0xff]  }
  0xa9   :  { %2959 = vmatprep.subr.bf16.mxu1 %v6457_v27  ;;  %v6534_v27 = vld [vmem:[#allocation5 + $0x408] ss:$72 sps:$4 sm:$0xff]   ;;  %v6539_v28 = vld [vmem:[#allocation5 + $0x7f4] ss:$72 sps:$4 sm:$0xff]  }
  0xaa   :  { %2842 = vmatmul.mubr.bf16.gmra.mxu0 %v7347_v29 }
  0xab   :  { %3017 = vmatpush1.bf16.msra.mxu0 %v6458_v31  ;;  %2851 = vmatprep.mubr.bf16.mxu0 %v7349_v34  ;;  %v6537_v31 = vld [vmem:[#allocation5 + $0x7f0] ss:$72 sps:$4 sm:$0xff]  }
  0xac   :  { %2960 = vmatpush2.bf16.msra.mxu1 %v6455_v30  ;;  %3018 = vmatprep.subr.bf16.mxu0 %v6466_v33  ;;  %v6542_v30 = vld [vmem:[#allocation5 + $0x37c] ss:$72 sps:$4 sm:$0xff]  }
  0xad   :  { %2961 = vmatprep.subr.bf16.mxu1 %v6463_v32  ;;  %v6540_v32 = vld [vmem:[#allocation5 + $0x378] ss:$72 sps:$4 sm:$0xff]   ;;  %v6545_v33 = vld [vmem:[#allocation5 + $0x764] ss:$72 sps:$4 sm:$0xff]  }
  0xaf   :  { %3019 = vmatpush1.bf16.msra.mxu0 %v6464_v37  ;;  %v6543_v37 = vld [vmem:[#allocation5 + $0x760] ss:$72 sps:$4 sm:$0xff]  }
  0xb0   :  { %2962 = vmatpush2.bf16.msra.mxu1 %v6461_v36  ;;  %3020 = vmatprep.subr.bf16.mxu0 %v6476_v39  ;;  %v6548_v36 = vld [vmem:[#allocation5 + $0x2ec] ss:$72 sps:$4 sm:$0xff]  }
  0xb1   :  { %2963 = vmatprep.subr.bf16.mxu1 %v6473_v38  ;;  %v6546_v38 = vld [vmem:[#allocation5 + $0x2e8] ss:$72 sps:$4 sm:$0xff]   ;;  %v6551_v39 = vld [vmem:[#allocation5 + $0x6d4] ss:$72 sps:$4 sm:$0xff]  }
  0xb2   :  { %2852 = vmatmul.mubr.bf16.gmra.mxu0 %v7353_v40 }
  0xb3   :  { %3021 = vmatpush1.bf16.msra.mxu0 %v6474_v42  ;;  %3040 = vmatprep.mubr.bf16.mxu0 %v8314_v0  ;;  %v6549_v42 = vld [vmem:[#allocation5 + $0x6d0] ss:$72 sps:$4 sm:$0xff]  }
  0xb4   :  { %2964 = vmatpush2.bf16.msra.mxu1 %v6471_v41  ;;  %3022 = vmatprep.subr.bf16.mxu0 %v6482_v44  ;;  %v6554_v41 = vld [vmem:[#allocation5 + $0x25c] ss:$72 sps:$4 sm:$0xff]   ;;  %v6560_v44 = vld [vmem:[#allocation5 + $0x1cc] ss:$72 sps:$4 sm:$0xff]  }
  0xb5   :  { %2965 = vmatprep.subr.bf16.mxu1 %v6479_v43  ;;  %v6557_v43 = vld [vmem:[#allocation5 + $0x644] ss:$72 sps:$4 sm:$0xff]  }
  0xb7   :  { %3023 = vmatpush1.bf16.msra.mxu0 %v6480_v46  ;;  %v6558_v46 = vld [vmem:[#allocation5 + $0x1c8] ss:$72 sps:$4 sm:$0xff]  }
  0xb8   :  { %2966 = vmatpush2.bf16.msra.mxu1 %v6477_v45  ;;  %3081 = vmatprep.subr.bf16.mxu0 %v6485_v47  ;;  %v6555_v45 = vld [vmem:[#allocation5 + $0x640] ss:$72 sps:$4 sm:$0xff]   ;;  %v6563_v47 = vld [vmem:[#allocation5 + $0x5b4] ss:$72 sps:$4 sm:$0xff]  }
  0xb9   :  { %3154 = vmatprep.subr.bf16.mxu1 %v6488_v48  ;;  %v6566_v48 = vld [vmem:[#allocation5 + $0x13c] ss:$72 sps:$4 sm:$0xff]  }
  0xba   :  { %3041 = vmatmul.mubr.bf16.vlgmr.msra.gmra.mxu0 %v7316_v35 }
  0xbb   :  { %2968 = vmatmul.mubr.bf16.vlgmr.msra.gmra.mxu1 %v7329_v8  ;;  %3082 = vmatpush1.bf16.msra.mxu0 %v6483_v49  ;;  %v6561_v49 = vld [vmem:[#allocation5 + $0x5b0] ss:$72 sps:$4 sm:$0xff]  }
  0xbc   :  { %3155 = vmatpush1.bf16.msra.mxu1 %v6486_v50  ;;  %3083 = vmatprep.subr.bf16.mxu0 %v6491_v52  ;;  %v6564_v50 = vld [vmem:[#allocation5 + $0x138] ss:$72 sps:$4 sm:$0xff]   ;;  %v6572_v52 = vld [vmem:[#allocation5 + $0xac] ss:$72 sps:$4 sm:$0xff]  }
  0xbd   :  { %3156 = vmatprep.subr.bf16.mxu1 %v6494_v53  ;;  %2977 = vmatprep.mubr.bf16.mxu1 %v7333_v15  ;;  %v6567_v53 = vld [vmem:[#allocation5 + $0x520] ss:$72 sps:$4 sm:$0xff]  }
  0xbe   :  { %3050 = vmatprep.mubr.bf16.mxu0 %v8314_v0 }
  0xbf   :  { %3084 = vmatpush1.bf16.msra.mxu0 %v6489_v54  ;;  %v6570_v54 = vld [vmem:[#allocation5 + $0xa8] ss:$72 sps:$4 sm:$0xff]  }
  0xc0   :  { %3157 = vmatpush1.bf16.msra.mxu1 %v6492_v55  ;;  %3085 = vmatprep.subr.bf16.mxu0 %v6497_v56  ;;  %v6575_v55 = vld [vmem:[#allocation5 + $0x494] ss:$72 sps:$4 sm:$0xff]  }
  0xc1   :  { %3158 = vmatprep.subr.bf16.mxu1 %v6500_v57  ;;  %v6578_v56 = vld [vmem:[#allocation5 + $0x1c] ss:$72 sps:$4 sm:$0xff]   ;;  %v6573_v57 = vld [vmem:[#allocation5 + $0x490] ss:$72 sps:$4 sm:$0xff]  }
  0xc2   :  { %3051 = vmatmul.mubr.bf16.gmra.mxu0 %v7323_v59 }
  0xc3   :  { %2978 = vmatmul.mubr.bf16.gmra.mxu1 %v7339_v19  ;;  %3086 = vmatpush1.bf16.msra.mxu0 %v6495_v58  ;;  %v6576_v58 = vld [vmem:[#allocation5 + $0x18] ss:$72 sps:$4 sm:$0xff]  }
  0xc4   :  { %3159 = vmatpush1.bf16.msra.mxu1 %v6498_v60  ;;  %3087 = vmatprep.subr.bf16.mxu0 %v6503_v61  ;;  %v6584_v60 = vld [vmem:[#allocation5 + $0xd0c] ss:$72 sps:$4 sm:$0xff]   ;;  %v6579_v61 = vld [vmem:[#allocation5 + $0x888] ss:$72 sps:$4 sm:$0xff]  }
  0xc5   :  { %3160 = vmatprep.subr.bf16.mxu1 %v6506_v62  ;;  %2987 = vmatprep.mubr.bf16.mxu1 %v7343_v24  ;;  %v6582_v62 = vld [vmem:[#allocation5 + $0xd08] ss:$72 sps:$4 sm:$0xff]  }
  0xc6   :  { %3060 = vmatprep.mubr.bf16.mxu0 %v8314_v0 }
  0xc7   :  { %3088 = vmatpush1.bf16.msra.mxu0 %v6501_v63  ;;  %v6587_v63 = vld [vmem:[#allocation5 + $0x7fc] ss:$72 sps:$4 sm:$0xff]  }
  0xc8   :  { %3161 = vmatpush1.bf16.msra.mxu1 %v6504_v1  ;;  %3089 = vmatprep.subr.bf16.mxu0 %v6509_v2  ;;  %v6590_v1 = vld [vmem:[#allocation5 + $0xc7c] ss:$72 sps:$4 sm:$0xff]   ;;  %v6585_v2 = vld [vmem:[#allocation5 + $0x7f8] ss:$72 sps:$4 sm:$0xff]  }
  0xc9   :  { %3162 = vmatprep.subr.bf16.mxu1 %v6512_v3  ;;  %v6593_v3 = vld [vmem:[#allocation5 + $0x76c] ss:$72 sps:$4 sm:$0xff]  }
  0xca   :  { %3061 = vmatmul.mubr.bf16.gmra.mxu0 %v7327_v5 }
  0xcb   :  { %2988 = vmatmul.mubr.bf16.gmra.mxu1 %v7347_v29  ;;  %3090 = vmatpush1.bf16.msra.mxu0 %v6507_v4  ;;  %v6596_v4 = vld [vmem:[#allocation5 + $0xbec] ss:$72 sps:$4 sm:$0xff]  }
  0xcc   :  { %3163 = vmatpush1.bf16.msra.mxu1 %v6510_v6  ;;  %3091 = vmatprep.subr.bf16.mxu0 %v6515_v7  ;;  %v6594_v6 = vld [vmem:[#allocation5 + $0xbe8] ss:$72 sps:$4 sm:$0xff]   ;;  %v6599_v7 = vld [vmem:[#allocation5 + $0x6dc] ss:$72 sps:$4 sm:$0xff]  }
  0xcd   :  { %3164 = vmatprep.subr.bf16.mxu1 %v6518_v9  ;;  %2997 = vmatprep.mubr.bf16.mxu1 %v7349_v34  ;;  %v6602_v9 = vld [vmem:[#allocation5 + $0xb5c] ss:$72 sps:$4 sm:$0xff]  }
  0xce   :  { %3070 = vmatprep.mubr.bf16.mxu0 %v8314_v0 }
  0xcf   :  { %3092 = vmatpush1.bf16.msra.mxu0 %v6513_v10  ;;  %v6600_v10 = vld [vmem:[#allocation5 + $0xb58] ss:$72 sps:$4 sm:$0xff]  }
  0xd0   :  { %3165 = vmatpush1.bf16.msra.mxu1 %v6516_v11  ;;  %3093 = vmatprep.subr.bf16.mxu0 %v6521_v12  ;;  %v6605_v11 = vld [vmem:[#allocation5 + $0x64c] ss:$72 sps:$4 sm:$0xff]  }
  0xd1   :  { %3166 = vmatprep.subr.bf16.mxu1 %v6524_v13  ;;  %v6608_v12 = vld [vmem:[#allocation5 + $0xacc] ss:$72 sps:$4 sm:$0xff]   ;;  %v6606_v13 = vld [vmem:[#allocation5 + $0xac8] ss:$72 sps:$4 sm:$0xff]  }
  0xd2   :  { %3071 = vmatmul.mubr.bf16.gmra.mxu0 %v7336_v16 }
  0xd3   :  { %2998 = vmatmul.mubr.bf16.gmra.mxu1 %v7353_v40  ;;  %3094 = vmatpush1.bf16.msra.mxu0 %v6519_v14  ;;  %v6611_v14 = vld [vmem:[#allocation5 + $0x5bc] ss:$72 sps:$4 sm:$0xff]  }
  0xd4   :  { %3167 = vmatpush1.bf16.msra.mxu1 %v6522_v17  ;;  %3095 = vmatprep.subr.bf16.mxu0 %v6527_v18  ;;  %v6614_v17 = vld [vmem:[#allocation5 + $0xa3c] ss:$72 sps:$4 sm:$0xff]   ;;  %v6609_v18 = vld [vmem:[#allocation5 + $0x5b8] ss:$72 sps:$4 sm:$0xff]  }
  0xd5   :  { %3168 = vmatprep.subr.bf16.mxu1 %v6530_v20  ;;  %3186 = vmatprep.mubr.bf16.mxu1 %v8314_v0  ;;  %v6612_v20 = vld [vmem:[#allocation5 + $0xa38] ss:$72 sps:$4 sm:$0xff]  }
  0xd6   :  { %3113 = vmatprep.mubr.bf16.mxu0 %v7320_v51 }
  0xd7   :  { %3096 = vmatpush1.bf16.msra.mxu0 %v6525_v21  ;;  %v6617_v21 = vld [vmem:[#allocation5 + $0x52c] ss:$72 sps:$4 sm:$0xff]  }
  0xd8   :  { %3169 = vmatpush1.bf16.msra.mxu1 %v6528_v22  ;;  %3097 = vmatprep.subr.bf16.mxu0 %v6533_v23  ;;  %v6620_v22 = vld [vmem:[#allocation5 + $0x9ac] ss:$72 sps:$4 sm:$0xff]   ;;  %v6615_v23 = vld [vmem:[#allocation5 + $0x528] ss:$72 sps:$4 sm:$0xff]  }
  0xd9   :  { %3227 = vmatprep.subr.bf16.mxu1 %v6536_v25  ;;  %v6618_v25 = vld [vmem:[#allocation5 + $0x9a8] ss:$72 sps:$4 sm:$0xff]  }
  0xdb   :  { %3187 = vmatmul.mubr.bf16.vlgmr.msra.gmra.mxu1 %v7316_v35  ;;  %3098 = vmatpush2.bf16.msra.mxu0 %v6531_v26  ;;  %v6552_v35 = vld [vmem:[#allocation5 + $0x258] ss:$72 sps:$4 sm:$0xff]   ;;  %v6623_v26 = vld [vmem:[#allocation5 + $0x49c] ss:$72 sps:$4 sm:$0xff]  }
  0xdc   :  { %3228 = vmatpush1.bf16.msra.mxu1 %v6534_v27  ;;  %3099 = vmatprep.subr.bf16.mxu0 %v6539_v28  ;;  %v6626_v27 = vld [vmem:[#allocation5 + $0x91c] ss:$72 sps:$4 sm:$0xff]   ;;  %v6621_v28 = vld [vmem:[#allocation5 + $0x498] ss:$72 sps:$4 sm:$0xff]  }
  0xdd   :  { %3229 = vmatprep.subr.bf16.mxu1 %v6542_v30  ;;  %3196 = vmatprep.mubr.bf16.mxu1 %v8314_v0  ;;  %v6624_v30 = vld [vmem:[#allocation5 + $0x918] ss:$72 sps:$4 sm:$0xff]  }
  0xdf   :  { %3100 = vmatpush2.bf16.msra.mxu0 %v6537_v31  ;;  %v6629_v31 = vld [vmem:[#allocation5 + $0x414] ss:$72 sps:$4 sm:$0xff]  }
  0xe0   :  { %3230 = vmatpush1.bf16.msra.mxu1 %v6540_v32  ;;  %3101 = vmatprep.subr.bf16.mxu0 %v6545_v33  ;;  %v6632_v32 = vld [vmem:[#allocation5 + $0xd14] ss:$72 sps:$4 sm:$0xff]   ;;  %v6627_v33 = vld [vmem:[#allocation5 + $0x410] ss:$72 sps:$4 sm:$0xff]  }
  0xe1   :  { %3231 = vmatprep.subr.bf16.mxu1 %v6548_v36  ;;  %v6630_v36 = vld [vmem:[#allocation5 + $0xd10] ss:$72 sps:$4 sm:$0xff]  }
  0xe3   :  { %3197 = vmatmul.mubr.bf16.gmra.mxu1 %v7323_v59  ;;  %3102 = vmatpush2.bf16.msra.mxu0 %v6543_v37  ;;  %v6569_v59 = vld [vmem:[#allocation5 + $0x524] ss:$72 sps:$4 sm:$0xff]  }
  0xe4   :  { %3232 = vmatpush1.bf16.msra.mxu1 %v6546_v38  ;;  %3103 = vmatprep.subr.bf16.mxu0 %v6551_v39  ;;  %v6635_v37 = vld [vmem:[#allocation5 + $0x384] ss:$72 sps:$4 sm:$0xff]  }
  0xe5   :  { %3233 = vmatprep.subr.bf16.mxu1 %v6554_v41  ;;  %3206 = vmatprep.mubr.bf16.mxu1 %v8314_v0  ;;  %v6638_v38 = vld [vmem:[#allocation5 + $0xc84] ss:$72 sps:$4 sm:$0xff]   ;;  %v7392_v41 = vld [vmem:[#allocation2 + $0x8] ss:$12 sps:$4 sm:$0xff]  }
  0xe6   :  { %v7389_v39 = vld [vmem:[#allocation2] ss:$12 sps:$4 sm:$0xff]  }
  0xe7   :  { %3104 = vmatpush2.bf16.msra.mxu0 %v6549_v42  ;;  %v6633_v42 = vld [vmem:[#allocation5 + $0x380] ss:$72 sps:$4 sm:$0xff]  }
  0xe8   :  { %3234 = vmatpush1.bf16.msra.mxu1 %v6552_v35  ;;  %3105 = vmatprep.subr.bf16.mxu0 %v6557_v43  ;;  %v6636_v35 = vld [vmem:[#allocation5 + $0xc80] ss:$72 sps:$4 sm:$0xff]   ;;  %v6641_v43 = vld [vmem:[#allocation5 + $0x2f4] ss:$72 sps:$4 sm:$0xff]  }
  0xe9   :  { %3235 = vmatprep.subr.bf16.mxu1 %v6560_v44  ;;  %v6644_v44 = vld [vmem:[#allocation5 + $0xbf4] ss:$72 sps:$4 sm:$0xff]  }
  0xeb   :  { %3207 = vmatmul.mubr.bf16.gmra.mxu1 %v7327_v5  ;;  %3106 = vmatpush2.bf16.msra.mxu0 %v6555_v45  ;;  %v6581_v5 = vld [vmem:[#allocation5 + $0x88c] ss:$72 sps:$4 sm:$0xff]   ;;  %v7395_v45 = vld [vmem:[#allocation2 + $0x1c] ss:$12 sps:$4 sm:$0xff]  }
  0xec   :  { %3236 = vmatpush1.bf16.msra.mxu1 %v6558_v46  ;;  %3107 = vmatprep.subr.bf16.mxu0 %v6563_v47  ;;  %v6639_v46 = vld [vmem:[#allocation5 + $0x2f0] ss:$72 sps:$4 sm:$0xff]  }
  0xed   :  { %3237 = vmatprep.subr.bf16.mxu1 %v6566_v48  ;;  %3216 = vmatprep.mubr.bf16.mxu1 %v8314_v0  ;;  %v6642_v47 = vld [vmem:[#allocation5 + $0xbf0] ss:$72 sps:$4 sm:$0xff]   ;;  %v6647_v48 = vld [vmem:[#allocation5 + $0x264] ss:$72 sps:$4 sm:$0xff]  }
  0xef   :  { %3108 = vmatpush2.bf16.msra.mxu0 %v6561_v49  ;;  %v6650_v49 = vld [vmem:[#allocation5 + $0xb64] ss:$72 sps:$4 sm:$0xff]  }
  0xf0   :  { %3238 = vmatpush1.bf16.msra.mxu1 %v6564_v50  ;;  %3109 = vmatprep.subr.bf16.mxu0 %v6569_v59  ;;  %v7400_v50 = vld [vmem:[#allocation2 + $0x20] ss:$12 sps:$4 sm:$0xff]  }
  0xf1   :  { %3239 = vmatprep.subr.bf16.mxu1 %v6572_v52  ;;  %v6645_v59 = vld [vmem:[#allocation5 + $0x260] ss:$72 sps:$4 sm:$0xff]  }
  0xf2   :  { %v6648_v52 = vld [vmem:[#allocation5 + $0xb60] ss:$72 sps:$4 sm:$0xff]  }
  0xf3   :  { %3217 = vmatmul.mubr.bf16.gmra.mxu1 %v7336_v16  ;;  %3110 = vmatpush2.bf16.msra.mxu0 %v6567_v53  ;;  %v6588_v16 = vld [vmem:[#allocation5 + $0xc78] ss:$72 sps:$4 sm:$0xff]   ;;  %v6653_v53 = vld [vmem:[#allocation5 + $0x1d4] ss:$72 sps:$4 sm:$0xff]  }
  0xf4   :  { %3240 = vmatpush1.bf16.msra.mxu1 %v6570_v54  ;;  %3111 = vmatprep.subr.bf16.mxu0 %v6575_v55  ;;  %v6656_v54 = vld [vmem:[#allocation5 + $0xad4] ss:$72 sps:$4 sm:$0xff]   ;;  %v6651_v55 = vld [vmem:[#allocation5 + $0x1d0] ss:$72 sps:$4 sm:$0xff]  }
  0xf5   :  { %3241 = vmatprep.subr.bf16.mxu1 %v6578_v56  ;;  %3259 = vmatprep.mubr.bf16.mxu1 %v7320_v51  ;;  %v6591_v51 = vld [vmem:[#allocation5 + $0x768] ss:$72 sps:$4 sm:$0xff]   ;;  %v6659_v56 = vld [vmem:[#allocation5 + $0x144] ss:$72 sps:$4 sm:$0xff]  }
  0xf7   :  { %3112 = vmatpush2.bf16.msra.mxu0 %v6573_v57  ;;  %v6662_v57 = vld [vmem:[#allocation5 + $0xa44] ss:$72 sps:$4 sm:$0xff]  }
  0xf8   :  { %3242 = vmatpush1.bf16.msra.mxu1 %v6576_v58  ;;  %3300 = vmatprep.subr.bf16.mxu0 %v6584_v60  ;;  %v7406_v58 = vld [vmem:[#allocation2 + $0x38] ss:$12 sps:$4 sm:$0xff]   ;;  %v6665_v60 = vld [vmem:[#allocation5 + $0xb4] ss:$72 sps:$4 sm:$0xff]  }
  0xf9   :  { %3243 = vmatprep.subr.bf16.mxu1 %v6581_v5  ;;  %v6657_v5 = vld [vmem:[#allocation5 + $0x140] ss:$72 sps:$4 sm:$0xff]  }
  0xfa   :  { %3114 = vmatmul.mubr.bf16.vlgmr.msra.gmra.mxu0 %v7329_v8  ;;  %v6597_v8 = vld [vmem:[#allocation5 + $0x6d8] ss:$72 sps:$4 sm:$0xff]  }
  0xfb   :  { %3301 = vmatpush1.bf16.msra.mxu0 %v6582_v62  ;;  %3123 = vmatprep.mubr.bf16.mxu0 %v7333_v15  ;;  %v6603_v15 = vld [vmem:[#allocation5 + $0x648] ss:$72 sps:$4 sm:$0xff]  }
  0xfc   :  { %3244 = vmatpush2.bf16.msra.mxu1 %v6579_v61  ;;  %3302 = vmatprep.subr.bf16.mxu0 %v6590_v1  ;;  %v6668_v61 = vld [vmem:[#allocation5 + $0x9b4] ss:$72 sps:$4 sm:$0xff]   ;;  %v6663_v62 = vld [vmem:[#allocation5 + $0xb0] ss:$72 sps:$4 sm:$0xff]   ;;  %v6674_v1 = vld [vmem:[#allocation5 + $0x924] ss:$72 sps:$4 sm:$0xff]  }
  0xfd   :  { %3245 = vmatprep.subr.bf16.mxu1 %v6587_v63  ;;  %v6671_v63 = vld [vmem:[#allocation5 + $0x24] ss:$72 sps:$4 sm:$0xff]  }
  0xff   :  { %3303 = vmatpush1.bf16.msra.mxu0 %v6588_v16  ;;  %v6669_v16 = vld [vmem:[#allocation5 + $0x20] ss:$72 sps:$4 sm:$0xff]  }
 0x100   :  { %3246 = vmatpush2.bf16.msra.mxu1 %v6585_v2  ;;  %3304 = vmatprep.subr.bf16.mxu0 %v6596_v4  ;;  %v7412_v2 = vld [vmem:[#allocation2 + $0x50] ss:$12 sps:$4 sm:$0xff]  }
 0x101   :  { %3247 = vmatprep.subr.bf16.mxu1 %v6593_v3  ;;  %v6677_v3 = vld [vmem:[#allocation5 + $0x894] ss:$72 sps:$4 sm:$0xff]  }
 0x102   :  { %3124 = vmatmul.mubr.bf16.gmra.mxu0 %v7339_v19  ;;  %v6680_v4 = vld [vmem:[#allocation5 + $0x41c] ss:$72 sps:$4 sm:$0xff]  }
 0x103   :  { %3305 = vmatpush1.bf16.msra.mxu0 %v6594_v6  ;;  %3133 = vmatprep.mubr.bf16.mxu0 %v7343_v24  ;;  %v6675_v6 = vld [vmem:[#allocation5 + $0x890] ss:$72 sps:$4 sm:$0xff]  }
 0x104   :  { %3248 = vmatpush2.bf16.msra.mxu1 %v6591_v51  ;;  %3306 = vmatprep.subr.bf16.mxu0 %v6602_v9  ;;  %v7416_v51 = vld [vmem:[#allocation2 + $0x4] ss:$12 sps:$4 sm:$0xff]   ;;  %v6686_v9 = vld [vmem:[#allocation5 + $0x38c] ss:$72 sps:$4 sm:$0xff]  }
 0x105   :  { %3249 = vmatprep.subr.bf16.mxu1 %v6599_v7  ;;  %v6683_v7 = vld [vmem:[#allocation5 + $0x804] ss:$72 sps:$4 sm:$0xff]  }
 0x107   :  { %3307 = vmatpush1.bf16.msra.mxu0 %v6600_v10  ;;  %v6684_v10 = vld [vmem:[#allocation5 + $0x388] ss:$72 sps:$4 sm:$0xff]  }
 0x108   :  { %3250 = vmatpush2.bf16.msra.mxu1 %v6597_v8  ;;  %3308 = vmatprep.subr.bf16.mxu0 %v6608_v12  ;;  %v6681_v8 = vld [vmem:[#allocation5 + $0x800] ss:$72 sps:$4 sm:$0xff]   ;;  %v6692_v12 = vld [vmem:[#allocation5 + $0x2fc] ss:$72 sps:$4 sm:$0xff]  }
 0x109   :  { %3251 = vmatprep.subr.bf16.mxu1 %v6605_v11  ;;  %v6689_v11 = vld [vmem:[#allocation5 + $0x774] ss:$72 sps:$4 sm:$0xff]  }
 0x10a   :  { %3134 = vmatmul.mubr.bf16.gmra.mxu0 %v7347_v29 }
 0x10b   :  { %3309 = vmatpush1.bf16.msra.mxu0 %v6606_v13  ;;  %3143 = vmatprep.mubr.bf16.mxu0 %v7349_v34  ;;  %v6690_v13 = vld [vmem:[#allocation5 + $0x2f8] ss:$72 sps:$4 sm:$0xff]  }
 0x10c   :  { %3252 = vmatpush2.bf16.msra.mxu1 %v6603_v15  ;;  %3310 = vmatprep.subr.bf16.mxu0 %v6614_v17  ;;  %v6687_v15 = vld [vmem:[#allocation5 + $0x770] ss:$72 sps:$4 sm:$0xff]   ;;  %v6695_v17 = vld [vmem:[#allocation5 + $0x6e4] ss:$72 sps:$4 sm:$0xff]  }
 0x10d   :  { %3253 = vmatprep.subr.bf16.mxu1 %v6611_v14 }
 0x10f   :  { %3311 = vmatpush1.bf16.msra.mxu0 %v6612_v20  ;;  %v6693_v20 = vld [vmem:[#allocation5 + $0x6e0] ss:$72 sps:$4 sm:$0xff]  }
 0x110   :  { %3254 = vmatpush2.bf16.msra.mxu1 %v6609_v18  ;;  %3312 = vmatprep.subr.bf16.mxu0 %v6620_v22  ;;  %v6698_v18 = vld [vmem:[#allocation5 + $0x26c] ss:$72 sps:$4 sm:$0xff]  }
 0x111   :  { %3255 = vmatprep.subr.bf16.mxu1 %v6617_v21  ;;  %v6696_v21 = vld [vmem:[#allocation5 + $0x268] ss:$72 sps:$4 sm:$0xff]  }
 0x112   :  { %3144 = vmatmul.mubr.bf16.gmra.mxu0 %v7353_v40 }
 0x113   :  { %3313 = vmatpush1.bf16.msra.mxu0 %v6618_v25  ;;  %3332 = vmatprep.mubr.bf16.mxu0 %v8314_v0  ;;  %v6704_v25 = vld [vmem:[#allocation5 + $0x1dc] ss:$72 sps:$4 sm:$0xff]  }
 0x114   :  { %3256 = vmatpush2.bf16.msra.mxu1 %v6615_v23  ;;  %3314 = vmatprep.subr.bf16.mxu0 %v6626_v27  ;;  %v6701_v23 = vld [vmem:[#allocation5 + $0x654] ss:$72 sps:$4 sm:$0xff]   ;;  %v6702_v27 = vld [vmem:[#allocation5 + $0x1d8] ss:$72 sps:$4 sm:$0xff]  }
 0x115   :  { %3257 = vmatprep.subr.bf16.mxu1 %v6623_v26  ;;  %v6699_v26 = vld [vmem:[#allocation5 + $0x650] ss:$72 sps:$4 sm:$0xff]  }
 0x117   :  { %3315 = vmatpush1.bf16.msra.mxu0 %v6624_v30  ;;  %v6707_v30 = vld [vmem:[#allocation5 + $0x5c4] ss:$72 sps:$4 sm:$0xff]  }
 0x118   :  { %3258 = vmatpush2.bf16.msra.mxu1 %v6621_v28  ;;  %3373 = vmatprep.subr.bf16.mxu0 %v6629_v31  ;;  %v6710_v31 = vld [vmem:[#allocation5 + $0x14c] ss:$72 sps:$4 sm:$0xff]  }
 0x119   :  { %3446 = vmatprep.subr.bf16.mxu1 %v6632_v32  ;;  %v6705_v32 = vld [vmem:[#allocation5 + $0x5c0] ss:$72 sps:$4 sm:$0xff]  }
 0x11a   :  { %3333 = vmatmul.mubr.bf16.vlgmr.msra.gmra.mxu0 %v7392_v41 }
 0x11b   :  { %3260 = vmatmul.mubr.bf16.vlgmr.msra.gmra.mxu1 %v7389_v39  ;;  %3374 = vmatpush1.bf16.msra.mxu0 %v6627_v33  ;;  %v6708_v33 = vld [vmem:[#allocation5 + $0x148] ss:$72 sps:$4 sm:$0xff]  }
 0x11c   :  { %3447 = vmatpush1.bf16.msra.mxu1 %v6630_v36  ;;  %3375 = vmatprep.subr.bf16.mxu0 %v6635_v37  ;;  %v6713_v37 = vld [vmem:[#allocation5 + $0x534] ss:$72 sps:$4 sm:$0xff]  }
 0x11d   :  { %3448 = vmatprep.subr.bf16.mxu1 %v6638_v38  ;;  %3269 = vmatprep.mubr.bf16.mxu1 %v7395_v45  ;;  %v6716_v38 = vld [vmem:[#allocation5 + $0xbc] ss:$72 sps:$4 sm:$0xff]  }
 0x11e   :  { %3342 = vmatprep.mubr.bf16.mxu0 %v8314_v0 }
 0x11f   :  { %3376 = vmatpush1.bf16.msra.mxu0 %v6633_v42 }
 0x120   :  { %3449 = vmatpush1.bf16.msra.mxu1 %v6636_v35  ;;  %3377 = vmatprep.subr.bf16.mxu0 %v6641_v43  ;;  %v6711_v35 = vld [vmem:[#allocation5 + $0x530] ss:$72 sps:$4 sm:$0xff]  }
 0x121   :  { %3450 = vmatprep.subr.bf16.mxu1 %v6644_v44  ;;  %v6714_v43 = vld [vmem:[#allocation5 + $0xb8] ss:$72 sps:$4 sm:$0xff]  }
 0x122   :  { %3343 = vmatmul.mubr.bf16.gmra.mxu0 %v7400_v50 }
 0x123   :  { %3270 = vmatmul.mubr.bf16.gmra.mxu1 %v7339_v19  ;;  %3378 = vmatpush1.bf16.msra.mxu0 %v6639_v46  ;;  %v6654_v19 = vld [vmem:[#allocation5 + $0xad0] ss:$72 sps:$4 sm:$0xff]   ;;  %v6719_v46 = vld [vmem:[#allocation5 + $0x4a4] ss:$72 sps:$4 sm:$0xff]  }
 0x124   :  { %3451 = vmatpush1.bf16.msra.mxu1 %v6642_v47  ;;  %3379 = vmatprep.subr.bf16.mxu0 %v6647_v48  ;;  %v6722_v47 = vld [vmem:[#allocation5 + $0x2c] ss:$72 sps:$4 sm:$0xff]   ;;  %v6717_v48 = vld [vmem:[#allocation5 + $0x4a0] ss:$72 sps:$4 sm:$0xff]  }
 0x125   :  { %3452 = vmatprep.subr.bf16.mxu1 %v6650_v49  ;;  %3279 = vmatprep.mubr.bf16.mxu1 %v7343_v24  ;;  %v6660_v24 = vld [vmem:[#allocation5 + $0xa40] ss:$72 sps:$4 sm:$0xff]  }
 0x126   :  { %3352 = vmatprep.mubr.bf16.mxu0 %v8314_v0 }
 0x127   :  { %3380 = vmatpush1.bf16.msra.mxu0 %v6645_v59  ;;  %v6720_v59 = vld [vmem:[#allocation5 + $0x28] ss:$72 sps:$4 sm:$0xff]  }
 0x128   :  { %3453 = vmatpush1.bf16.msra.mxu1 %v6648_v52  ;;  %3381 = vmatprep.subr.bf16.mxu0 %v6653_v53  ;;  %v6725_v52 = vld [vmem:[#allocation5 + $0x89c] ss:$72 sps:$4 sm:$0xff]  }
 0x129   :  { %3454 = vmatprep.subr.bf16.mxu1 %v6656_v54  ;;  %v6728_v53 = vld [vmem:[#allocation5 + $0xd1c] ss:$72 sps:$4 sm:$0xff]   ;;  %v6723_v54 = vld [vmem:[#allocation5 + $0x898] ss:$72 sps:$4 sm:$0xff]  }
 0x12a   :  { %3353 = vmatmul.mubr.bf16.gmra.mxu0 %v7406_v58 }
 0x12b   :  { %3280 = vmatmul.mubr.bf16.gmra.mxu1 %v7347_v29  ;;  %3382 = vmatpush1.bf16.msra.mxu0 %v6651_v55  ;;  %v6666_v29 = vld [vmem:[#allocation5 + $0x9b0] ss:$72 sps:$4 sm:$0xff]  }
 0x12c   :  { %3455 = vmatpush1.bf16.msra.mxu1 %v6654_v19  ;;  %3383 = vmatprep.subr.bf16.mxu0 %v6659_v56  ;;  %v6726_v19 = vld [vmem:[#allocation5 + $0xd18] ss:$72 sps:$4 sm:$0xff]   ;;  %v6731_v56 = vld [vmem:[#allocation5 + $0x80c] ss:$72 sps:$4 sm:$0xff]  }
 0x12d   :  { %3456 = vmatprep.subr.bf16.mxu1 %v6662_v57  ;;  %3289 = vmatprep.mubr.bf16.mxu1 %v7349_v34  ;;  %v6672_v34 = vld [vmem:[#allocation5 + $0x920] ss:$72 sps:$4 sm:$0xff]   ;;  %v6734_v57 = vld [vmem:[#allocation5 + $0xc8c] ss:$72 sps:$4 sm:$0xff]  }
 0x12e   :  { %3362 = vmatprep.mubr.bf16.mxu0 %v8314_v0 }
 0x12f   :  { %3384 = vmatpush1.bf16.msra.mxu0 %v6657_v5 }
 0x130   :  { %3457 = vmatpush1.bf16.msra.mxu1 %v6660_v24  ;;  %3385 = vmatprep.subr.bf16.mxu0 %v6665_v60  ;;  %v6729_v24 = vld [vmem:[#allocation5 + $0x808] ss:$72 sps:$4 sm:$0xff]  }
 0x131   :  { %3458 = vmatprep.subr.bf16.mxu1 %v6668_v61 }
 0x132   :  { %3363 = vmatmul.mubr.bf16.gmra.mxu0 %v7412_v2 }
 0x133   :  { %3290 = vmatmul.mubr.bf16.gmra.mxu1 %v7353_v40  ;;  %3386 = vmatpush1.bf16.msra.mxu0 %v6663_v62  ;;  %v6678_v40 = vld [vmem:[#allocation5 + $0x418] ss:$72 sps:$4 sm:$0xff]   ;;  %v6732_v62 = vld [vmem:[#allocation5 + $0xc88] ss:$72 sps:$4 sm:$0xff]  }
 0x134   :  { %3459 = vmatpush1.bf16.msra.mxu1 %v6666_v29  ;;  %3387 = vmatprep.subr.bf16.mxu0 %v6671_v63  ;;  %v6737_v63 = vld [vmem:[#allocation5 + $0x77c] ss:$72 sps:$4 sm:$0xff]  }
 0x135   :  { %3460 = vmatprep.subr.bf16.mxu1 %v6674_v1  ;;  %3478 = vmatprep.mubr.bf16.mxu1 %v8314_v0  ;;  %v6740_v1 = vld [vmem:[#allocation5 + $0xbfc] ss:$72 sps:$4 sm:$0xff]  }
 0x136   :  { %3405 = vmatprep.mubr.bf16.mxu0 %v7416_v51 }
 0x137   :  { %3388 = vmatpush1.bf16.msra.mxu0 %v6669_v16 }
 0x138   :  { %3461 = vmatpush1.bf16.msra.mxu1 %v6672_v34  ;;  %3389 = vmatprep.subr.bf16.mxu0 %v6677_v3  ;;  %v6735_v3 = vld [vmem:[#allocation5 + $0x778] ss:$72 sps:$4 sm:$0xff]  }
 0x139   :  { %3519 = vmatprep.subr.bf16.mxu1 %v6680_v4 }
 0x13b   :  { %3479 = vmatmul.mubr.bf16.vlgmr.msra.gmra.mxu1 %v7392_v41  ;;  %3390 = vmatpush2.bf16.msra.mxu0 %v6675_v6  ;;  %v7421_v14 = vpop.f32.mrf.mxu1  ;;  %v6738_v6 = vld [vmem:[#allocation5 + $0xbf8] ss:$72 sps:$4 sm:$0xff]  }
 0x13c   :  { %3520 = vmatpush1.bf16.msra.mxu1 %v6678_v40  ;;  %3391 = vmatprep.subr.bf16.mxu0 %v6683_v7  ;;  %v6743_v7 = vld [vmem:[#allocation5 + $0x6ec] ss:$72 sps:$4 sm:$0xff]  }
 0x13d   :  { %3521 = vmatprep.subr.bf16.mxu1 %v6686_v9  ;;  %3488 = vmatprep.mubr.bf16.mxu1 %v8314_v0  ;;  %v7424_v22 = vpop.f32.mrf.mxu1  ;;  %v6746_v9 = vld [vmem:[#allocation5 + $0xb6c] ss:$72 sps:$4 sm:$0xff]  }
 0x13f   :  { %3392 = vmatpush2.bf16.msra.mxu0 %v6681_v8  ;;  %v7427_v28 = vpop.f32.mrf.mxu1 }
 0x140   :  { %3522 = vmatpush1.bf16.msra.mxu1 %v6684_v10  ;;  %3393 = vmatprep.subr.bf16.mxu0 %v6689_v11  ;;  %v7456_v10 = vld [vmem:[#allocation2 + $0x18] ss:$12 sps:$4 sm:$0xff]   ;;  %v6741_v11 = vld [vmem:[#allocation5 + $0x6e8] ss:$72 sps:$4 sm:$0xff]  }
 0x141   :  { %3523 = vmatprep.subr.bf16.mxu1 %v6692_v12  ;;  %v7430_v36 = vpop.f32.mrf.mxu1 }
 0x143   :  { %3489 = vmatmul.mubr.bf16.gmra.mxu1 %v7400_v50  ;;  %3394 = vmatpush2.bf16.msra.mxu0 %v6687_v15  ;;  %v7432_v42 = vpop.f32.mrf.mxu1 }
 0x144   :  { %3524 = vmatpush1.bf16.msra.mxu1 %v6690_v13  ;;  %3395 = vmatprep.subr.bf16.mxu0 %v6695_v17  ;;  %v6744_v13 = vld [vmem:[#allocation5 + $0xb68] ss:$72 sps:$4 sm:$0xff]   ;;  %v6749_v17 = vld [vmem:[#allocation5 + $0x65c] ss:$72 sps:$4 sm:$0xff]  }
 0x145   :  { %3525 = vmatprep.subr.bf16.mxu1 %v6698_v18  ;;  %3498 = vmatprep.mubr.bf16.mxu1 %v8314_v0  ;;  %v7435_v44 = vpop.f32.mrf.mxu1  ;;  %v6752_v18 = vld [vmem:[#allocation5 + $0xadc] ss:$72 sps:$4 sm:$0xff]  }
 0x147   :  { %3396 = vmatpush2.bf16.msra.mxu0 %v6693_v20  ;;  %v7437_v49 = vpop.f32.mrf.mxu1 }
 0x148   :  { %3526 = vmatpush1.bf16.msra.mxu1 %v6696_v21  ;;  %3397 = vmatprep.subr.bf16.mxu0 %v6701_v23  ;;  %v7465_v21 = vld [vmem:[#allocation2 + $0x34] ss:$12 sps:$4 sm:$0xff]  }
 0x149   :  { %3527 = vmatprep.subr.bf16.mxu1 %v6704_v25  ;;  %v7441_v55 = vpop.f32.mrf.mxu1 }
 0x14b   :  { %3499 = vmatmul.mubr.bf16.gmra.mxu1 %v7406_v58  ;;  %3398 = vmatpush2.bf16.msra.mxu0 %v6699_v26  ;;  %v2916_v60 = vpop.f32.mrf.mxu1  ;;  %v6747_v26 = vld [vmem:[#allocation5 + $0x658] ss:$72 sps:$4 sm:$0xff]  }
 0x14c   :  { %3528 = vmatpush1.bf16.msra.mxu1 %v6702_v27  ;;  %3399 = vmatprep.subr.bf16.mxu0 %v6707_v30  ;;  %v6750_v27 = vld [vmem:[#allocation5 + $0xad8] ss:$72 sps:$4 sm:$0xff]   ;;  %v6755_v30 = vld [vmem:[#allocation5 + $0x5cc] ss:$72 sps:$4 sm:$0xff]  }
 0x14d   :  { %3529 = vmatprep.subr.bf16.mxu1 %v6710_v31  ;;  %3508 = vmatprep.mubr.bf16.mxu1 %v8314_v0  ;;  %v2918_v4 = vpop.f32.mrf.mxu1  ;;  %v6758_v31 = vld [vmem:[#allocation5 + $0xa4c] ss:$72 sps:$4 sm:$0xff]  }
 0x14f   :  { %3400 = vmatpush2.bf16.msra.mxu0 %v6705_v32  ;;  %v2920_v12 = vpop.f32.mrf.mxu1 }
 0x150   :  { %3530 = vmatpush1.bf16.msra.mxu1 %v6708_v33  ;;  %3401 = vmatprep.subr.bf16.mxu0 %v6713_v37  ;;  %v7475_v33 = vld [vmem:[#allocation2 + $0x30] ss:$12 sps:$4 sm:$0xff]  }
 0x151   :  { %3531 = vmatprep.subr.bf16.mxu1 %v6716_v38  ;;  %v7468_v23 = vpop.f32.mrf.mxu1 }
 0x153   :  { %3509 = vmatmul.mubr.bf16.gmra.mxu1 %v7412_v2  ;;  %3402 = vmatpush2.bf16.msra.mxu0 %v6711_v35  ;;  %v2926_v37 = vpop.f32.mrf.mxu1  ;;  %v6756_v35 = vld [vmem:[#allocation5 + $0xa48] ss:$72 sps:$4 sm:$0xff]  }
 0x154   :  { %3532 = vmatpush1.bf16.msra.mxu1 %v6714_v43  ;;  %3403 = vmatprep.subr.bf16.mxu0 %v6719_v46  ;;  %v6761_v43 = vld [vmem:[#allocation5 + $0x53c] ss:$72 sps:$4 sm:$0xff]  }
 0x155   :  { %3533 = vmatprep.subr.bf16.mxu1 %v6722_v47  ;;  %3551 = vmatprep.mubr.bf16.mxu1 %v7416_v51  ;;  %v6764_v46 = vld [vmem:[#allocation5 + $0x9bc] ss:$72 sps:$4 sm:$0xff]  }
 0x157   :  { %3404 = vmatpush2.bf16.msra.mxu0 %v6717_v48  ;;  %v7482_v48 = vld [vmem:[#allocation2 + $0x4c] ss:$12 sps:$4 sm:$0xff]  }
 0x158   :  { %3534 = vmatpush1.bf16.msra.mxu1 %v6720_v59  ;;  %3592 = vmatprep.subr.bf16.mxu0 %v6728_v53  ;;  %v7485_v59 = vpop.f32.mrf.mxu1  ;;  %v6759_v53 = vld [vmem:[#allocation5 + $0x538] ss:$72 sps:$4 sm:$0xff]  }
 0x159   :  { %3535 = vmatprep.subr.bf16.mxu1 %v6725_v52 }
 0x15a   :  { %v2823_v5 = vpop.f32.mrf.mxu0  ;;  %3406 = vmatmul.mubr.bf16.vlgmr.msra.gmra.mxu0 %v7389_v39 }
 0x15b   :  { %v7445_v61 = vadd.f32 %v7421_v14, %v2823_v5  ;;  %3593 = vmatpush1.bf16.msra.mxu0 %v6726_v19  ;;  %3415 = vmatprep.mubr.bf16.mxu0 %v7395_v45  ;;  %v6767_v19 = vld [vmem:[#allocation5 + $0x4ac] ss:$72 sps:$4 sm:$0xff]   ;;  %v4169_v5 = vlaneseq }
 0x15c   :  { %3536 = vmatpush2.bf16.msra.mxu1 %v6723_v54  ;;  %v2825_v29 = vpop.f32.mrf.mxu0  ;;  %3594 = vmatprep.subr.bf16.mxu0 %v6734_v57  ;;  %v6762_v54 = vld [vmem:[#allocation5 + $0x9b8] ss:$72 sps:$4 sm:$0xff]   ;;  %v6770_v57 = vld [vmem:[#allocation5 + $0x92c] ss:$72 sps:$4 sm:$0xff]  }
 0x15d   :  { %3537 = vmatprep.subr.bf16.mxu1 %v6731_v56  ;;  %v7448_v16 = vadd.f32 %v7424_v22, %v2825_v29 }
 0x15e   :  { %v2827_v34 = vpop.f32.mrf.mxu0 }
 0x15f   :  { %v7452_v51 = vadd.f32 %v7427_v28, %v2827_v34  ;;  %3595 = vmatpush1.bf16.msra.mxu0 %v6732_v62  ;;  %v2930_v62 = vpop.f32.mrf.mxu1  ;;  %v6773_v34 = vld [vmem:[#allocation5 + $0x424] ss:$72 sps:$4 sm:$0xff]  }
 0x160   :  { %3538 = vmatpush2.bf16.msra.mxu1 %v6729_v24  ;;  %v7454_v40 = vpop.f32.mrf.mxu0  ;;  %3596 = vmatprep.subr.bf16.mxu0 %v6740_v1  ;;  %v6768_v1 = vld [vmem:[#allocation5 + $0x928] ss:$72 sps:$4 sm:$0xff]  }
 0x161   :  { %3539 = vmatprep.subr.bf16.mxu1 %v6737_v63  ;;  %v6765_v63 = vld [vmem:[#allocation5 + $0x4a8] ss:$72 sps:$4 sm:$0xff]  }
 0x162   :  { %v2833_v8 = vpop.f32.mrf.mxu0  ;;  %3416 = vmatmul.mubr.bf16.gmra.mxu0 %v7456_v10 }
 0x163   :  { %v7460_v15 = vadd.f32 %v7432_v42, %v2833_v8  ;;  %3597 = vmatpush1.bf16.msra.mxu0 %v6738_v6  ;;  %3425 = vmatprep.mubr.bf16.mxu0 %v7465_v21  ;;  %v6753_v42 = vld [vmem:[#allocation5 + $0x5c8] ss:$72 sps:$4 sm:$0xff]   ;;  %v4170_v6 = vshrl.u32 %v4169_v5, 7 }
 0x164   :  { %3540 = vmatpush2.bf16.msra.mxu1 %v6735_v3  ;;  %v2835_v14 = vpop.f32.mrf.mxu0  ;;  %3598 = vmatprep.subr.bf16.mxu0 %v6746_v9  ;;  %v7499_v9 = vpop.f32.mrf.mxu1  ;;  %v6786_v5 = vld [vmem:[#allocation5 + $0xc00] ss:$72 sps:$4 sm:$0xff]  }
 0x165   :  { %3541 = vmatprep.subr.bf16.mxu1 %v6743_v7  ;;  %v7463_v20 = vadd.f32 %v7435_v44, %v2835_v14 }
 0x166   :  { %v2837_v22 = vpop.f32.mrf.mxu0 }
 0x167   :  { %v7471_v25 = vadd.f32 %v7437_v49, %v2837_v22  ;;  %3599 = vmatpush1.bf16.msra.mxu0 %v6744_v13  ;;  %v6779_v13 = vld [vmem:[#allocation5 + $0x394] ss:$72 sps:$4 sm:$0xff]   ;;  %v7507_v22 = vsub.s32 0, %v4170_v6 }
 0x168   :  { %3542 = vmatpush2.bf16.msra.mxu1 %v6741_v11  ;;  %v7473_v28 = vpop.f32.mrf.mxu0  ;;  %3600 = vmatprep.subr.bf16.mxu0 %v6752_v18  ;;  %v6771_v11 = vld [vmem:[#allocation5 + $0x420] ss:$72 sps:$4 sm:$0xff]   ;;  %v6782_v18 = vld [vmem:[#allocation5 + $0xc94] ss:$72 sps:$4 sm:$0xff]  }
 0x169   :  { %3543 = vmatprep.subr.bf16.mxu1 %v6749_v17  ;;  %v7505_v17 = vld [vmem:[#allocation7] sm:$0x3] }
 0x16a   :  { %v2843_v32 = vpop.f32.mrf.mxu0  ;;  %3426 = vmatmul.mubr.bf16.gmra.mxu0 %v7475_v33 }
 0x16b   :  { %v7478_v38 = vadd.f32 %v2916_v60, %v2843_v32  ;;  %3601 = vmatpush1.bf16.msra.mxu0 %v6750_v27  ;;  %3435 = vmatprep.mubr.bf16.mxu0 %v7482_v48  ;;  %v7491_v60 = vld [vmem:[#allocation2 + $0x48] ss:$12 sps:$4 sm:$0xff]   ;;  %v6780_v32 = vld [vmem:[#allocation5 + $0xc90] ss:$72 sps:$4 sm:$0xff]  }
 0x16c   :  { %3544 = vmatpush2.bf16.msra.mxu1 %v6747_v26  ;;  %v2845_v44 = vpop.f32.mrf.mxu0  ;;  %3602 = vmatprep.subr.bf16.mxu0 %v6758_v31  ;;  %v6777_v31 = vld [vmem:[#allocation5 + $0x390] ss:$72 sps:$4 sm:$0xff]  }
 0x16d   :  { %3545 = vmatprep.subr.bf16.mxu1 %v6755_v30  ;;  %v7480_v47 = vadd.f32 %v2918_v4, %v2845_v44  ;;  %v6776_v4 = vld [vmem:[#allocation5 + $0xd24] ss:$72 sps:$4 sm:$0xff]  }
 0x16e   :  { %v2847_v49 = vpop.f32.mrf.mxu0 }
 0x16f   :  { %v7487_v52 = vadd.f32 %v2920_v12, %v2847_v49  ;;  %3603 = vmatpush1.bf16.msra.mxu0 %v6756_v35  ;;  %v6774_v12 = vld [vmem:[#allocation5 + $0xd20] ss:$72 sps:$4 sm:$0xff]  }
 0x170   :  { %3546 = vmatpush2.bf16.msra.mxu1 %v6753_v42  ;;  %v7489_v56 = vpop.f32.mrf.mxu0  ;;  %3604 = vmatprep.subr.bf16.mxu0 %v6764_v46  ;;  %v7513_v46 = vrot.slane %v7505_v17, %v7507_v22 }
 0x171   :  { %3547 = vmatprep.subr.bf16.mxu1 %v6761_v43  ;;  %v6788_v43 = vld [vmem:[#allocation5 + $0xc04] ss:$72 sps:$4 sm:$0xff]  }
 0x172   :  { %v2853_v24 = vpop.f32.mrf.mxu0  ;;  %3436 = vmatmul.mubr.bf16.gmra.mxu0 %v7491_v60 }
 0x173   :  { %v7494_v29 = vadd.f32 %v2926_v37, %v2853_v24  ;;  %3605 = vmatpush1.bf16.msra.mxu0 %v6762_v54  ;;  %3624 = vmatprep.mubr.bf16.mxu0 %v8314_v0  ;;  %v6785_v37 = vld [vmem:[#allocation5 + $0x304] ss:$72 sps:$4 sm:$0xff]   ;;  %v6791_v24 = vld [vmem:[#allocation5 + $0x274] ss:$72 sps:$4 sm:$0xff]  }
 0x174   :  { %3548 = vmatpush2.bf16.msra.mxu1 %v6759_v53  ;;  %v7496_v3 = vpop.f32.mrf.mxu0  ;;  %3606 = vmatprep.subr.bf16.mxu0 %v6770_v57  ;;  %v6783_v57 = vld [vmem:[#allocation5 + $0x300] ss:$72 sps:$4 sm:$0xff]  }
 0x175   :  { %3549 = vmatprep.subr.bf16.mxu1 %v6767_v19 }
 0x176   :  { %v2857_v7 = vpop.f32.mrf.mxu0 }
 0x177   :  { %v7501_v8 = vadd.f32 %v2930_v62, %v2857_v7  ;;  %3607 = vmatpush1.bf16.msra.mxu0 %v6768_v1 }
 0x178   :  { %3550 = vmatpush2.bf16.msra.mxu1 %v6765_v63  ;;  %v7503_v14 = vpop.f32.mrf.mxu0  ;;  %3665 = vmatprep.subr.bf16.mxu0 %v6773_v34 }
 0x179   :  { %3738 = vmatprep.subr.bf16.mxu1 %v6776_v4 }
 0x17a   :  { %v3042_v27 = vpop.f32.mrf.mxu0  ;;  %3625 = vmatmul.mubr.bf16.vlgmr.msra.gmra.mxu0 %v7392_v41 }
 0x17b   :  { %v2969_v26 = vpop.f32.mrf.mxu1  ;;  %3552 = vmatmul.mubr.bf16.vlgmr.msra.gmra.mxu1 %v7389_v39  ;;  %3666 = vmatpush1.bf16.msra.mxu0 %v6771_v11  ;;  %v7517_v39 = vsub.s32 1, %v4170_v6  ;;  %v6789_v11 = vld [vmem:[#allocation5 + $0x270] ss:$72 sps:$4 sm:$0xff]  }
 0x17c   :  { %v3043_v30 = vadd.f32 %v3042_v27, %v2969_v26  ;;  %3739 = vmatpush1.bf16.msra.mxu1 %v6774_v12  ;;  %v3044_v35 = vpop.f32.mrf.mxu0  ;;  %3667 = vmatprep.subr.bf16.mxu0 %v6779_v13  ;;  %v6792_v27 = vld [vmem:[#allocation5 + $0xb70] ss:$72 sps:$4 sm:$0xff]  }
 0x17d   :  { %v2971_v42 = vpop.f32.mrf.mxu1  ;;  %3740 = vmatprep.subr.bf16.mxu1 %v6782_v18  ;;  %3561 = vmatprep.mubr.bf16.mxu1 %v7395_v45  ;;  %v6794_v45 = vld [vmem:[#allocation5 + $0xb74] ss:$72 sps:$4 sm:$0xff]  }
 0x17e   :  { %v4119_v44 = vrot.slane %v3043_v30, 1  ;;  %3634 = vmatprep.mubr.bf16.mxu0 %v8314_v0  ;;  %v3046_v49 = vpop.f32.mrf.mxu0  ;;  %v3045_v54 = vadd.f32 %v3044_v35, %v2971_v42  ;;  %v6795_v42 = vld [vmem:[#allocation5 + $0x1e0] ss:$72 sps:$4 sm:$0xff]   ;;  %v7532_v35 = vrot.slane %v7505_v17, %v7517_v39 }
 0x17f   :  { %v2973_v41 = vpop.f32.mrf.mxu1  ;;  %3668 = vmatpush1.bf16.msra.mxu0 %v6777_v31 }
 0x180   :  { %v4151_v53 = vadd.f32 %v4119_v44, %v7445_v61  ;;  %v3047_v19 = vadd.f32 %v3046_v49, %v2973_v41  ;;  %3741 = vmatpush1.bf16.msra.mxu1 %v6780_v32  ;;  %v3048_v63 = vpop.f32.mrf.mxu0  ;;  %3669 = vmatprep.subr.bf16.mxu0 %v6785_v37  ;;  %v2903_v61 = vadd.f32 %v7430_v36, %v7454_v40  ;;  %v4120_v13 = vrot.slane %v3045_v54, 1  ;;  %v6797_v36 = vld [vmem:[#allocation5 + $0x1e4] ss:$72 sps:$4 sm:$0xff]  }
 0x181   :  { %v2975_v62 = vpop.f32.mrf.mxu1  ;;  %3742 = vmatprep.subr.bf16.mxu1 %v6788_v43  ;;  %v6800_v40 = vld [vmem:[#allocation5 + $0xae4] ss:$72 sps:$4 sm:$0xff]  }
 0x182   :  { %v4179_v1 = vadd.f32 %v7513_v46, %v4151_v53  ;;  %v4121_v34 = vrot.slane %v3047_v19, 1  ;;  %v3049_v4 = vadd.f32 %v3048_v63, %v2975_v62  ;;  %v3052_v7 = vpop.f32.mrf.mxu0  ;;  %3635 = vmatmul.mubr.bf16.gmra.mxu0 %v7400_v50  ;;  %v4152_v53 = vadd.f32 %v4120_v13, %v7448_v16 }
 0x183   :  { %v2979_v6 = vpop.f32.mrf.mxu1  ;;  %3562 = vmatmul.mubr.bf16.gmra.mxu1 %v7456_v10  ;;  %3670 = vmatpush1.bf16.msra.mxu0 %v6783_v57  ;;  %v6798_v57 = vld [vmem:[#allocation5 + $0xae0] ss:$72 sps:$4 sm:$0xff]  }
 0x184   :  { %v4195_v12 = vmax.f32 %v4179_v1, 0.0  ;;  %v4153_v18 = vadd.f32 %v4121_v34, %v7452_v51  ;;  %v4122_v26 = vrot.slane %v3049_v4, 1  ;;  %3743 = vmatpush1.bf16.msra.mxu1 %v6786_v5  ;;  %v3053_v30 = vadd.f32 %v3052_v7, %v2979_v6  ;;  %v3054_v32 = vpop.f32.mrf.mxu0  ;;  %3671 = vmatprep.subr.bf16.mxu0 %v6791_v24  ;;  %v6806_v1 = vld [vmem:[#allocation5 + $0xa54] ss:$72 sps:$4 sm:$0xff]  }
 0x185   :  { %v2981_v31 = vpop.f32.mrf.mxu1  ;;  %3744 = vmatprep.subr.bf16.mxu1 %v6794_v45  ;;  %3571 = vmatprep.mubr.bf16.mxu1 %v7465_v21  ;;  %v6803_v21 = vld [vmem:[#allocation5 + $0x154] ss:$72 sps:$4 sm:$0xff]  }
 0x186   :  { %v4212_v10 = vsel %vm4211_vm0, %v4195_v12, -inf  ;;  %v4181_v37 = vadd.f32 %v7513_v46, %v4153_v18  ;;  %v4154_v50 = vadd.f32 %v4122_v26, %v2903_v61  ;;  %3644 = vmatprep.mubr.bf16.mxu0 %v8314_v0  ;;  %v4123_v43 = vrot.slane %v3053_v30, 1  ;;  %v3056_v49 = vpop.f32.mrf.mxu0  ;;  %v6804_v30 = vld [vmem:[#allocation5 + $0xa50] ss:$72 sps:$4 sm:$0xff]  }
 0x187   :  { %v4213_v51 = vrot.slane %v4212_v10, 4  ;;  %v3055_v44 = vadd.f32 %v3054_v32, %v2981_v31  ;;  %v2983_v41 = vpop.f32.mrf.mxu1  ;;  %3672 = vmatpush1.bf16.msra.mxu0 %v6789_v11  ;;  %v4180_v32 = vadd.f32 %v7532_v35, %v4152_v53 }
 0x188   :  { %v4197_v54 = vmax.f32 %v4181_v37, 0.0  ;;  %v3057_v19 = vadd.f32 %v3056_v49, %v2983_v41  ;;  %3745 = vmatpush1.bf16.msra.mxu1 %v6792_v27  ;;  %v7536_v24 = vadd.f32 %v7532_v35, %v4154_v50  ;;  %v4155_v62 = vadd.f32 %v4123_v43, %v7460_v15  ;;  %v3058_v45 = vpop.f32.mrf.mxu0  ;;  %3673 = vmatprep.subr.bf16.mxu0 %v6797_v36  ;;  %v6801_v27 = vld [vmem:[#allocation5 + $0x150] ss:$72 sps:$4 sm:$0xff]   ;;  %v6807_v50 = vld [vmem:[#allocation5 + $0xc0] ss:$72 sps:$4 sm:$0xff]  }
 0x189   :  { %v4214_v5 = vmax.f32 %v4212_v10, %v4213_v51  ;;  %v4124_v17 = vrot.slane %v3055_v44, 1  ;;  %v2985_v63 = vpop.f32.mrf.mxu1  ;;  %3746 = vmatprep.subr.bf16.mxu1 %v6800_v40  ;;  %v2913_v15 = vadd.f32 %v7441_v55, %v7473_v28  ;;  %v6809_v55 = vld [vmem:[#allocation5 + $0xc4] ss:$72 sps:$4 sm:$0xff]  }
 0x18a   :  { %v4226_v16 = vsel %vm4211_vm0, %v4197_v54, -inf  ;;  %v4125_v34 = vrot.slane %v3057_v19, 1  ;;  %v3059_v4 = vadd.f32 %v3058_v45, %v2985_v63  ;;  %v4183_v7 = vadd.f32 %v7513_v46, %v4155_v62  ;;  %v3062_v12 = vpop.f32.mrf.mxu0  ;;  %3645 = vmatmul.mubr.bf16.gmra.mxu0 %v7406_v58  ;;  %v6812_v28 = vld [vmem:[#allocation5 + $0x9c4] ss:$72 sps:$4 sm:$0xff]   ;;  %v6815_v19 = vld [vmem:[#allocation5 + $0x34] ss:$72 sps:$4 sm:$0xff]  }
 0x18b   :  { %v4215_v61 = vrot.slane %v4214_v5, 2  ;;  %v4227_v6 = vrot.slane %v4226_v16, 4  ;;  %v2989_v11 = vpop.f32.mrf.mxu1  ;;  %3572 = vmatmul.mubr.bf16.gmra.mxu1 %v7475_v33  ;;  %v4156_v13 = vadd.f32 %v4124_v17, %v7463_v20  ;;  %3674 = vmatpush1.bf16.msra.mxu0 %v6795_v42  ;;  %v4198_v33 = vmax.f32 %v7536_v24, 0.0  ;;  %v6810_v42 = vld [vmem:[#allocation5 + $0x9c0] ss:$72 sps:$4 sm:$0xff]  }
 0x18c   :  { %v4157_v18 = vadd.f32 %v4125_v34, %v7471_v25  ;;  %v4126_v26 = vrot.slane %v3059_v4, 1  ;;  %3747 = vmatpush1.bf16.msra.mxu1 %v6798_v57  ;;  %v3064_v58 = vpop.f32.mrf.mxu0  ;;  %3675 = vmatprep.subr.bf16.mxu0 %v6803_v21  ;;  %v4199_v20 = vmax.f32 %v4183_v7, 0.0  ;;  %v6818_v24 = vld [vmem:[#allocation5 + $0x934] ss:$72 sps:$4 sm:$0xff]   ;;  %v6813_v4 = vld [vmem:[#allocation5 + $0x30] ss:$72 sps:$4 sm:$0xff]  }
 0x18d   :  { %v4216_v31 = vmax.f32 %v4214_v5, %v4215_v61  ;;  %v4228_v36 = vmax.f32 %v4226_v16, %v4227_v6  ;;  %v2991_v40 = vpop.f32.mrf.mxu1  ;;  %3748 = vmatprep.subr.bf16.mxu1 %v6806_v1  ;;  %v4184_v25 = vadd.f32 %v7532_v35, %v4156_v13  ;;  %3581 = vmatprep.mubr.bf16.mxu1 %v7482_v48  ;;  %v4196_v48 = vmax.f32 %v4180_v32, 0.0  ;;  %v6816_v13 = vld [vmem:[#allocation5 + $0x930] ss:$72 sps:$4 sm:$0xff]  }
 0x18e   :  { %v4185_v10 = vadd.f32 %v7513_v46, %v4157_v18  ;;  %v4158_v37 = vadd.f32 %v4126_v26, %v2913_v15  ;;  %3654 = vmatprep.mubr.bf16.mxu0 %v8314_v0  ;;  %v7555_v44 = vpop.f32.mrf.mxu0  ;;  %v4240_v41 = vsel %vm4211_vm0, %v4199_v20, -inf  ;;  %v4233_v62 = vsel %vm4211_vm0, %v4198_v33, -inf  ;;  %v6819_v20 = vld [vmem:[#allocation5 + $0x8a0] ss:$72 sps:$4 sm:$0xff]  }
 0x18f   :  { %v4229_v51 = vrot.slane %v4228_v36, 2  ;;  %v7553_v43 = vpop.f32.mrf.mxu1  ;;  %v4200_v49 = vmax.f32 %v4184_v25, 0.0  ;;  %3676 = vmatpush1.bf16.msra.mxu0 %v6801_v27  ;;  %v4217_v57 = vrot.slane %v4216_v31, 1  ;;  %v4241_v17 = vrot.slane %v4240_v41, 4 }
 0x190   :  { %v4201_v53 = vmax.f32 %v4185_v10, 0.0  ;;  %v4186_v54 = vadd.f32 %v7532_v35, %v4158_v37  ;;  %3749 = vmatpush1.bf16.msra.mxu1 %v6804_v30  ;;  %3677 = vmatprep.subr.bf16.mxu0 %v6809_v55  ;;  %v7563_v16 = vpop.f32.mrf.mxu0  ;;  %v3063_v15 = vadd.f32 %v3062_v12, %v2989_v11  ;;  %v4219_v26 = vsel %vm4211_vm0, %v4196_v48, -inf  ;;  %v6822_v11 = vld [vmem:[#allocation5 + $0x428] ss:$72 sps:$4 sm:$0xff]  }
 0x191   :  { %v4230_v21 = vmax.f32 %v4228_v36, %v4229_v51  ;;  %v7559_v5 = vpop.f32.mrf.mxu1  ;;  %3750 = vmatprep.subr.bf16.mxu1 %v6812_v28  ;;  %v4242_v61 = vmax.f32 %v4240_v41, %v4241_v17  ;;  %v4247_v6 = vsel %vm4211_vm0, %v4200_v49, -inf  ;;  %v4218_v18 = vmax.f32 %v4216_v31, %v4217_v57  ;;  %v6824_v36 = vld [vmem:[#allocation5 + $0x42c] ss:$72 sps:$4 sm:$0xff]   ;;  %v7574_v12 = vld [vmem:[#allocation2 + $0x4] ss:$12 sps:$4 sm:$0xff]  }
 0x192   :  { %v4254_v63 = vsel %vm4211_vm0, %v4201_v53, -inf  ;;  %v4202_v1 = vmax.f32 %v4186_v54, 0.0  ;;  %3655 = vmatmul.mubr.bf16.gmra.mxu0 %v7412_v2  ;;  %v4234_v30 = vrot.slane %v4233_v62, 4  ;;  %v4127_v55 = vrot.slane %v3063_v15, 1  ;;  %v3072_v37 = vpop.f32.mrf.mxu0  ;;  %v6830_v49 = vld [vmem:[#allocation5 + $0x39c] ss:$72 sps:$4 sm:$0xff]  }
 0x193   :  { %v4231_v45 = vrot.slane %v4230_v21, 1  ;;  %v7565_v34 = vpop.f32.mrf.mxu1  ;;  %3582 = vmatmul.mubr.bf16.gmra.mxu1 %v7491_v60  ;;  %v4255_v7 = vrot.slane %v4254_v63, 4  ;;  %3678 = vmatpush1.bf16.msra.mxu0 %v6807_v50  ;;  %v6821_v60 = vld [vmem:[#allocation5 + $0x8a4] ss:$72 sps:$4 sm:$0xff]   ;;  %v4243_v2 = vrot.slane %v4242_v61, 2  ;;  %v3065_v28 = vadd.f32 %v3064_v58, %v2991_v40 }
 0x194   :  { %3751 = vmatpush1.bf16.msra.mxu1 %v6810_v42  ;;  %3679 = vmatprep.subr.bf16.mxu0 %v6815_v19  ;;  %v4248_v25 = vrot.slane %v4247_v6, 4  ;;  %v4261_v10 = vsel %vm4211_vm0, %v4202_v1, -inf  ;;  %v6827_v42 = vld [vmem:[#allocation5 + $0x814] ss:$72 sps:$4 sm:$0xff]   ;;  %v4159_v40 = vadd.f32 %v4127_v55, %v7478_v38  ;;  %v4220_v53 = vrot.slane %v4219_v26, 4 }
 0x195   :  { %v4232_v27 = vmax.f32 %v4230_v21, %v4231_v45  ;;  %v7571_v32 = vpop.f32.mrf.mxu1  ;;  %3752 = vmatprep.subr.bf16.mxu1 %v6818_v24  ;;  %v4256_v33 = vmax.f32 %v4254_v63, %v4255_v7  ;;  %3770 = vmatprep.mubr.bf16.mxu1 %v8314_v0  ;;  %v4244_v51 = vmax.f32 %v4242_v61, %v4243_v2  ;;  %v4128_v58 = vrot.slane %v3065_v28, 1  ;;  %v6825_v17 = vld [vmem:[#allocation5 + $0x810] ss:$72 sps:$4 sm:$0xff]   ;;  %v7590_v61 = vld [vmem:[#allocation2 + $0x8] ss:$12 sps:$4 sm:$0xff]  }
 0x196   :  { %3697 = vmatprep.mubr.bf16.mxu0 %v7574_v12  ;;  %v4235_v54 = vmax.f32 %v4233_v62, %v4234_v30  ;;  %v3067_v19 = vadd.f32 %v7555_v44, %v7553_v43  ;;  %v4187_v21 = vadd.f32 %v7513_v46, %v4159_v40  ;;  %v6828_v38 = vld [vmem:[#allocation5 + $0x398] ss:$72 sps:$4 sm:$0xff]   ;;  %v4249_v63 = vmax.f32 %v4247_v6, %v4248_v25  ;;  %v6833_v43 = vld [vmem:[#allocation5 + $0x784] ss:$72 sps:$4 sm:$0xff]   ;;  %v6834_v28 = vld [vmem:[#allocation5 + $0x308] ss:$72 sps:$4 sm:$0xff]  }
 0x197   :  { %v4975_v31 = vsel %vm4974_vm1, %v4232_v27, %v4218_v18  ;;  %v7579_v50 = vpop.f32.mrf.mxu1  ;;  %v4257_v41 = vrot.slane %v4256_v33, 2  ;;  %3680 = vmatpush1.bf16.msra.mxu0 %v6813_v4  ;;  %v4245_v57 = vrot.slane %v4244_v51, 1  ;;  %v4160_v24 = vadd.f32 %v4128_v58, %v7480_v47  ;;  %v7586_v4 = vpop.f32.mrf.mxu0  ;;  %v6836_v44 = vld [vmem:[#allocation5 + $0x30c] ss:$72 sps:$4 sm:$0xff]   ;;  %v6831_v55 = vld [vmem:[#allocation5 + $0x780] ss:$72 sps:$4 sm:$0xff]  }
 0x198   :  { %3753 = vmatpush1.bf16.msra.mxu1 %v6816_v13  ;;  %3681 = vmatprep.subr.bf16.mxu0 %v6821_v60  ;;  %v4262_v45 = vrot.slane %v4261_v10, 4  ;;  %v4129_v1 = vrot.slane %v3067_v19, 1  ;;  %v4203_v13 = vmax.f32 %v4187_v21, 0.0  ;;  %v4221_v6 = vmax.f32 %v4219_v26, %v4220_v53  ;;  %v6842_v40 = vld [vmem:[#allocation5 + $0x27c] ss:$72 sps:$4 sm:$0xff]  }
 0x199   :  { %3811 = vmatprep.subr.bf16.mxu1 %v6824_v36  ;;  %v4258_v48 = vmax.f32 %v4256_v33, %v4257_v41  ;;  %v7588_v62 = vpop.f32.mrf.mxu1  ;;  %v4246_v7 = vmax.f32 %v4244_v51, %v4245_v57  ;;  %v4188_v47 = vadd.f32 %v7532_v35, %v4160_v24  ;;  %v4236_v18 = vrot.slane %v4235_v54, 2  ;;  %v3076_v25 = vpop.f32.mrf.mxu0  ;;  %v6837_v24 = vld [vmem:[#allocation5 + $0x6f0] ss:$72 sps:$4 sm:$0xff]  }
 0x19a   :  { %v4161_v27 = vadd.f32 %v4129_v1, %v7487_v52  ;;  %v4268_v2 = vsel %vm4211_vm0, %v4203_v13, -inf  ;;  %v6839_v52 = vld [vmem:[#allocation5 + $0x6f4] ss:$72 sps:$4 sm:$0xff]   ;;  %v3073_v41 = vadd.f32 %v3072_v37, %v7565_v34  ;;  %v4222_v58 = vrot.slane %v4221_v6, 2 }
 0x19b   :  { %3771 = vmatmul.mubr.bf16.vlgmr.msra.gmra.mxu1 %v7590_v61  ;;  %v4259_v15 = vrot.slane %v4258_v48, 1  ;;  %3682 = vmatpush2.bf16.msra.mxu0 %v6819_v20  ;;  %v7595_v30 = vpop.f32.mrf.mxu1  ;;  %v4977_v60 = vsel %vm4976_vm2, %v4246_v7, %v4975_v31  ;;  %v4204_v33 = vmax.f32 %v4188_v47, 0.0  ;;  %v4263_v20 = vmax.f32 %v4261_v10, %v4262_v45  ;;  %v6840_v45 = vld [vmem:[#allocation5 + $0x278] ss:$72 sps:$4 sm:$0xff]  }
 0x19c   :  { %3812 = vmatpush1.bf16.msra.mxu1 %v6822_v11  ;;  %3683 = vmatprep.subr.bf16.mxu0 %v6827_v42  ;;  %v4269_v26 = vrot.slane %v4268_v2, 4  ;;  %v4189_v11 = vadd.f32 %v7513_v46, %v4161_v27  ;;  %v4250_v42 = vrot.slane %v4249_v63, 2  ;;  %v4237_v57 = vmax.f32 %v4235_v54, %v4236_v18  ;;  %v6848_v18 = vld [vmem:[#allocation5 + $0x1ec] ss:$72 sps:$4 sm:$0xff]  }
 0x19d   :  { %3813 = vmatprep.subr.bf16.mxu1 %v6830_v49  ;;  %v4260_v36 = vmax.f32 %v4258_v48, %v4259_v15  ;;  %3780 = vmatprep.mubr.bf16.mxu1 %v8314_v0  ;;  %v4275_v31 = vsel %vm4211_vm0, %v4204_v33, -inf  ;;  %v7606_v19 = vpop.f32.mrf.mxu1  ;;  %v4131_v48 = vrot.slane %v3073_v41, 1  ;;  %v3077_v21 = vadd.f32 %v3076_v25, %v7579_v50 }
 0x19e   :  { %v4270_v49 = vmax.f32 %v4268_v2, %v4269_v26  ;;  %v4276_v53 = vrot.slane %v4275_v31, 4  ;;  %v4205_v10 = vmax.f32 %v4189_v11, 0.0  ;;  %v4264_v1 = vrot.slane %v4263_v20, 2  ;;  %v6843_v2 = vld [vmem:[#allocation5 + $0x660] ss:$72 sps:$4 sm:$0xff]  }
 0x19f   :  { %v7602_v51 = vsel %vm4978_vm3, %v4260_v36, %v4977_v60  ;;  %3684 = vmatpush2.bf16.msra.mxu0 %v6825_v17  ;;  %v6845_v17 = vld [vmem:[#allocation5 + $0x664] ss:$72 sps:$4 sm:$0xff]   ;;  %v4163_v54 = vadd.f32 %v4131_v48, %v7494_v29  ;;  %v4223_v50 = vmax.f32 %v4221_v6, %v4222_v58  ;;  %v4133_v47 = vrot.slane %v3077_v21, 1  ;;  %v7614_v27 = vpop.f32.mrf.mxu1 }
 0x1a0   :  { %3814 = vmatpush1.bf16.msra.mxu1 %v6828_v38  ;;  %3685 = vmatprep.subr.bf16.mxu0 %v6833_v43  ;;  %v4271_v7 = vrot.slane %v4270_v49, 2  ;;  %v4277_v34 = vmax.f32 %v4275_v31, %v4276_v53  ;;  %v4282_v37 = vsel %vm4211_vm0, %v4205_v10, -inf  ;;  %v7610_v38 = vld [vmem:[#allocation2 + $0x20] ss:$12 sps:$4 sm:$0xff]   ;;  %v4251_v43 = vmax.f32 %v4249_v63, %v4250_v42  ;;  %v6846_v63 = vld [vmem:[#allocation5 + $0x1e8] ss:$72 sps:$4 sm:$0xff]  }
 0x1a1   :  { %3815 = vmatprep.subr.bf16.mxu1 %v6836_v44  ;;  %v4283_v44 = vrot.slane %v4282_v37, 4  ;;  %v4191_v36 = vadd.f32 %v7513_v46, %v4163_v54  ;;  %v4238_v33 = vrot.slane %v4237_v57, 1  ;;  %v4265_v29 = vmax.f32 %v4263_v20, %v4264_v1  ;;  %v6854_v26 = vld [vmem:[#allocation5 + $0x15c] ss:$72 sps:$4 sm:$0xff]   ;;  %v7620_v58 = vpop.f32.mrf.mxu1  ;;  %v6852_v53 = vld [vmem:[#allocation5 + $0x158] ss:$72 sps:$4 sm:$0xff]  }
 0x1a2   :  { %v4272_v15 = vmax.f32 %v4270_v49, %v4271_v7  ;;  %v4278_v13 = vrot.slane %v4277_v34, 2  ;;  %v4165_v6 = vadd.f32 %v4133_v47, %v7501_v8  ;;  %v4252_v11 = vrot.slane %v4251_v43, 1  ;;  %v6849_v49 = vld [vmem:[#allocation5 + $0x5d0] ss:$72 sps:$4 sm:$0xff]   ;;  %v6860_v54 = vld [vmem:[#allocation5 + $0xcc] ss:$72 sps:$4 sm:$0xff]  }
 0x1a3   :  { %3781 = vmatmul.mubr.bf16.gmra.mxu1 %v7610_v38  ;;  %3686 = vmatpush2.bf16.msra.mxu0 %v6831_v55  ;;  %v4284_v60 = vmax.f32 %v4282_v37, %v4283_v44  ;;  %v4207_v42 = vmax.f32 %v4191_v36, 0.0  ;;  %v4224_v31 = vrot.slane %v4223_v50, 1  ;;  %v4239_v10 = vmax.f32 %v4237_v57, %v4238_v33  ;;  %v7625_v1 = vpop.f32.mrf.mxu1  ;;  %v6858_v47 = vld [vmem:[#allocation5 + $0xc8] ss:$72 sps:$4 sm:$0xff]   ;;  %v6863_v36 = vld [vmem:[#allocation5 + $0x4b4] ss:$72 sps:$4 sm:$0xff]  }
 0x1a4   :  { %3816 = vmatpush1.bf16.msra.mxu1 %v6834_v28  ;;  %3687 = vmatprep.subr.bf16.mxu0 %v6839_v52  ;;  %v4273_v55 = vrot.slane %v4272_v15, 1  ;;  %v6851_v28 = vld [vmem:[#allocation5 + $0x5d4] ss:$72 sps:$4 sm:$0xff]   ;;  %v4279_v25 = vmax.f32 %v4277_v34, %v4278_v13  ;;  %v4266_v48 = vrot.slane %v4265_v29, 1  ;;  %v4253_v7 = vmax.f32 %v4251_v43, %v4252_v11  ;;  %v6855_v13 = vld [vmem:[#allocation5 + $0x540] ss:$72 sps:$4 sm:$0xff]  }
 0x1a5   :  { %3817 = vmatprep.subr.bf16.mxu1 %v6842_v40  ;;  %3790 = vmatprep.mubr.bf16.mxu1 %v8314_v0  ;;  %v4285_v52 = vrot.slane %v4284_v60, 2  ;;  %v4193_v40 = vadd.f32 %v7513_v46, %v4165_v6  ;;  %v4296_v8 = vsel %vm4211_vm0, %v4207_v42, -inf  ;;  %v7627_v46 = vld [vmem:[#allocation2 + $0x38] ss:$12 sps:$4 sm:$0xff]   ;;  %v4225_v44 = vmax.f32 %v4223_v50, %v4224_v31  ;;  %v6869_v31 = vld [vmem:[#allocation5 + $0x8ac] ss:$72 sps:$4 sm:$0xff]  }
 0x1a6   :  { %v4274_v41 = vmax.f32 %v4272_v15, %v4273_v55  ;;  %v4280_v34 = vrot.slane %v4279_v25, 1  ;;  %v6866_v33 = vld [vmem:[#allocation5 + $0x3c] ss:$72 sps:$4 sm:$0xff]   ;;  %v6864_v11 = vld [vmem:[#allocation5 + $0x38] ss:$72 sps:$4 sm:$0xff]  }
 0x1a7   :  { %3688 = vmatpush2.bf16.msra.mxu0 %v6837_v24  ;;  %v4286_v20 = vmax.f32 %v4284_v60, %v4285_v52  ;;  %v4297_v24 = vrot.slane %v4296_v8, 4  ;;  %v4988_v50 = vsel %vm4974_vm1, %v4239_v10, %v4225_v44  ;;  %v6867_v10 = vld [vmem:[#allocation5 + $0x8a8] ss:$72 sps:$4 sm:$0xff]   ;;  %v6873_v44 = vld [vmem:[#allocation5 + $0x818] ss:$72 sps:$4 sm:$0xff]  }
 0x1a8   :  { %3818 = vmatpush1.bf16.msra.mxu1 %v6840_v45  ;;  %3689 = vmatprep.subr.bf16.mxu0 %v6845_v17  ;;  %v4981_v21 = vsel %vm4980_vm4, %v4274_v41, %v7602_v51  ;;  %v6857_v45 = vld [vmem:[#allocation5 + $0x544] ss:$72 sps:$4 sm:$0xff]   ;;  %v4209_v17 = vmax.f32 %v4193_v40, 0.0  ;;  %v4989_v6 = vsel %vm4976_vm2, %v4253_v7, %v4988_v50 }
 0x1a9   :  { %3819 = vmatprep.subr.bf16.mxu1 %v6848_v18  ;;  %v4287_v37 = vrot.slane %v4286_v20, 1  ;;  %v4298_v57 = vmax.f32 %v4296_v8, %v4297_v24  ;;  %v4267_v18 = vmax.f32 %v4265_v29, %v4266_v48  ;;  %v6861_v29 = vld [vmem:[#allocation5 + $0x4b0] ss:$72 sps:$4 sm:$0xff]   ;;  %v6872_v41 = vld [vmem:[#allocation5 + $0xd2c] ss:$72 sps:$4 sm:$0xff]  }
 0x1aa   :  { %v4310_v15 = vsel %vm4211_vm0, %v4209_v17, -inf  ;;  %v6870_v48 = vld [vmem:[#allocation5 + $0xd28] ss:$72 sps:$4 sm:$0xff]   ;;  %v6875_v24 = vld [vmem:[#allocation5 + $0x81c] ss:$72 sps:$4 sm:$0xff]   ;;  %v7650_v17 = vpop.f32.mrf.mxu0 }
 0x1ab   :  { %3791 = vmatmul.mubr.bf16.gmra.mxu1 %v7627_v46  ;;  %3690 = vmatpush2.bf16.msra.mxu0 %v6843_v2  ;;  %v4288_v51 = vmax.f32 %v4286_v20, %v4287_v37  ;;  %v4299_v43 = vrot.slane %v4298_v57, 2  ;;  %v4311_v60 = vrot.slane %v4310_v15, 4  ;;  %v7632_v2 = vpop.f32.mrf.mxu1  ;;  %v7639_v20 = vld [vmem:[#allocation2 + $0x50] ss:$12 sps:$4 sm:$0xff]  }
 0x1ac   :  { %3820 = vmatpush1.bf16.msra.mxu1 %v6846_v63  ;;  %3691 = vmatprep.subr.bf16.mxu0 %v6851_v28  ;;  %v4281_v63 = vmax.f32 %v4279_v25, %v4280_v34  ;;  %v4990_v25 = vsel %vm4978_vm3, %v4267_v18, %v4989_v6  ;;  %v6878_v34 = vld [vmem:[#allocation5 + $0xc9c] ss:$72 sps:$4 sm:$0xff]   ;;  %v6882_v6 = vld [vmem:[#allocation5 + $0xc08] ss:$72 sps:$4 sm:$0xff]  }
 0x1ad   :  { %3821 = vmatprep.subr.bf16.mxu1 %v6854_v26  ;;  %3800 = vmatprep.mubr.bf16.mxu1 %v8314_v0  ;;  %v4983_v55 = vsel %vm4982_vm5, %v4288_v51, %v4981_v21  ;;  %v4300_v28 = vmax.f32 %v4298_v57, %v4299_v43  ;;  %v4312_v26 = vmax.f32 %v4310_v15, %v4311_v60  ;;  %v7637_v40 = vpop.f32.mrf.mxu1  ;;  %v6876_v57 = vld [vmem:[#allocation5 + $0xc98] ss:$72 sps:$4 sm:$0xff]   ;;  %v6881_v43 = vld [vmem:[#allocation5 + $0x78c] ss:$72 sps:$4 sm:$0xff]  }
 0x1ae   :  { %v7644_v8 = vsel %vm4980_vm4, %v4281_v63, %v4990_v25  ;;  %v7652_v51 = vld [vmem:[#allocation2] ss:$12 sps:$4 sm:$0xff]  }
 0x1af   :  { %3692 = vmatpush2.bf16.msra.mxu0 %v6849_v49  ;;  %v4301_v52 = vrot.slane %v4300_v28, 1  ;;  %v4313_v42 = vrot.slane %v4312_v26, 2  ;;  %v6884_v60 = vld [vmem:[#allocation5 + $0xc0c] ss:$72 sps:$4 sm:$0xff]  }
 0x1b0   :  { %3822 = vmatpush1.bf16.msra.mxu1 %v6852_v53  ;;  %3693 = vmatprep.subr.bf16.mxu0 %v6857_v45  ;;  %v7647_v45 = vpop.f32.mrf.mxu1  ;;  %v6893_v25 = vld [vmem:[#allocation5 + $0x66c] ss:$72 sps:$4 sm:$0xff]  }
 0x1b1   :  { %3823 = vmatprep.subr.bf16.mxu1 %v6860_v54  ;;  %v4302_v49 = vmax.f32 %v4300_v28, %v4301_v52  ;;  %v4314_v53 = vmax.f32 %v4312_v26, %v4313_v42  ;;  %v6887_v26 = vld [vmem:[#allocation5 + $0x6fc] ss:$72 sps:$4 sm:$0xff]  }
 0x1b2   :  { %v3208_v15 = vpop.f32.mrf.mxu1 }
 0x1b3   :  { %3801 = vmatmul.mubr.bf16.gmra.mxu1 %v7639_v20  ;;  %3694 = vmatpush2.bf16.msra.mxu0 %v6855_v13  ;;  %v4315_v21 = vrot.slane %v4314_v53, 1  ;;  %v4985_v7 = vsel %vm4984_vm6, %v4302_v49, %v4983_v55  ;;  %v6896_v49 = vld [vmem:[#allocation5 + $0xaec] ss:$72 sps:$4 sm:$0xff]  }
 0x1b4   :  { %3824 = vmatpush1.bf16.msra.mxu1 %v6858_v47  ;;  %3695 = vmatprep.subr.bf16.mxu0 %v6863_v36  ;;  %v3210_v63 = vpop.f32.mrf.mxu1 }
 0x1b5   :  { %3825 = vmatprep.subr.bf16.mxu1 %v6866_v33  ;;  %3843 = vmatprep.mubr.bf16.mxu1 %v7574_v12  ;;  %v4316_v37 = vmax.f32 %v4314_v53, %v4315_v21  ;;  %v7664_v33 = vld [vmem:[#allocation2 + $0x1c] ss:$12 sps:$4 sm:$0xff]  }
 0x1b6   :  { %v3212_v52 = vpop.f32.mrf.mxu1 }
 0x1b7   :  { %3696 = vmatpush2.bf16.msra.mxu0 %v6861_v29  ;;  %v7656_v13 = vsel %vm4986_vm7, %v4316_v37, %v4985_v7  ;;  %v6894_v7 = vld [vmem:[#allocation5 + $0xae8] ss:$72 sps:$4 sm:$0xff]   ;;  %v6899_v37 = vld [vmem:[#allocation5 + $0x5dc] ss:$72 sps:$4 sm:$0xff]  }
 0x1b8   :  { %3826 = vmatpush1.bf16.msra.mxu1 %v6864_v11  ;;  %3884 = vmatprep.subr.bf16.mxu0 %v6872_v41  ;;  %v7672_v11 = vld [vmem:[#allocation2 + $0x18] ss:$12 sps:$4 sm:$0xff]   ;;  %v3214_v21 = vpop.f32.mrf.mxu1 }
 0x1b9   :  { %3827 = vmatprep.subr.bf16.mxu1 %v6869_v31  ;;  %8321 = vst [vmem:[#allocation20_spill] sm:$0xff] %v7672_v11  ;;  %v6888_v31 = vld [vmem:[#allocation5 + $0xb78] ss:$72 sps:$4 sm:$0xff]  }
 0x1ba   :  { %v3115_v54 = vpop.f32.mrf.mxu0  ;;  %3698 = vmatmul.mubr.bf16.vlgmr.msra.gmra.mxu0 %v7652_v51 }
 0x1bb   :  { %v7659_v47 = vadd.f32 %v7595_v30, %v3115_v54  ;;  %3885 = vmatpush1.bf16.msra.mxu0 %v6870_v48  ;;  %3707 = vmatprep.mubr.bf16.mxu0 %v7664_v33  ;;  %v6879_v30 = vld [vmem:[#allocation5 + $0x788] ss:$72 sps:$4 sm:$0xff]   ;;  %v3218_v54 = vpop.f32.mrf.mxu1 }
 0x1bc   :  { %3828 = vmatpush2.bf16.msra.mxu1 %v6867_v10  ;;  %v3117_v18 = vpop.f32.mrf.mxu0  ;;  %3886 = vmatprep.subr.bf16.mxu0 %v6878_v34  ;;  %v7681_v10 = vld [vmem:[#allocation2 + $0x34] ss:$12 sps:$4 sm:$0xff]  }
 0x1bd   :  { %3829 = vmatprep.subr.bf16.mxu1 %v6875_v24  ;;  %v7662_v36 = vadd.f32 %v7606_v19, %v3117_v18  ;;  %v6890_v19 = vld [vmem:[#allocation5 + $0xb7c] ss:$72 sps:$4 sm:$0xff]   ;;  %8323 = vst [vmem:[#allocation22_spill] sm:$0xff] %v7681_v10  ;;  %v6891_v24 = vld [vmem:[#allocation5 + $0x668] ss:$72 sps:$4 sm:$0xff]  }
 0x1be   :  { %v3119_v50 = vpop.f32.mrf.mxu0 }
 0x1bf   :  { %v7668_v55 = vadd.f32 %v7614_v27, %v3119_v50  ;;  %3887 = vmatpush1.bf16.msra.mxu0 %v6876_v57  ;;  %v6885_v27 = vld [vmem:[#allocation5 + $0x6f8] ss:$72 sps:$4 sm:$0xff]   ;;  %v7689_v57 = vld [vmem:[#allocation2 + $0x30] ss:$12 sps:$4 sm:$0xff]   ;;  %v6905_v50 = vld [vmem:[#allocation5 + $0x54c] ss:$72 sps:$4 sm:$0xff]  }
 0x1c0   :  { %3830 = vmatpush2.bf16.msra.mxu1 %v6873_v44  ;;  %v7670_v28 = vpop.f32.mrf.mxu0  ;;  %3888 = vmatprep.subr.bf16.mxu0 %v6884_v60  ;;  %8325 = vst [vmem:[#allocation24_spill] sm:$0xff] %v7689_v57 }
 0x1c1   :  { %3831 = vmatprep.subr.bf16.mxu1 %v6881_v43  ;;  %v6900_v43 = vld [vmem:[#allocation5 + $0xa58] ss:$72 sps:$4 sm:$0xff]  }
 0x1c2   :  { %v3125_v29 = vpop.f32.mrf.mxu0  ;;  %3708 = vmatmul.mubr.bf16.gmra.mxu0 %v7672_v11 }
 0x1c3   :  { %v7676_v42 = vadd.f32 %v7625_v1, %v3125_v29  ;;  %3889 = vmatpush1.bf16.msra.mxu0 %v6882_v6  ;;  %3717 = vmatprep.mubr.bf16.mxu0 %v7681_v10  ;;  %v3220_v29 = vpop.f32.mrf.mxu1 }
 0x1c4   :  { %3832 = vmatpush2.bf16.msra.mxu1 %v6879_v30  ;;  %v3127_v41 = vpop.f32.mrf.mxu0  ;;  %3890 = vmatprep.subr.bf16.mxu0 %v6890_v19  ;;  %v6908_v30 = vld [vmem:[#allocation5 + $0x9cc] ss:$72 sps:$4 sm:$0xff]  }
 0x1c5   :  { %3833 = vmatprep.subr.bf16.mxu1 %v6887_v26  ;;  %v7679_v53 = vadd.f32 %v7632_v2, %v3127_v41  ;;  %v6902_v2 = vld [vmem:[#allocation5 + $0xa5c] ss:$72 sps:$4 sm:$0xff]   ;;  %v7696_v26 = vld [vmem:[#allocation2 + $0x4c] ss:$12 sps:$4 sm:$0xff]  }
 0x1c6   :  { %v3129_v48 = vpop.f32.mrf.mxu0  ;;  %8328 = vst [vmem:[#allocation27_spill] sm:$0xff] %v7696_v26 }
 0x1c7   :  { %8322 = vst [vmem:[#allocation21_spill] sm:$0xff] %v7679_v53  ;;  %v7685_v1 = vadd.f32 %v7637_v40, %v3129_v48  ;;  %3891 = vmatpush1.bf16.msra.mxu0 %v6888_v31  ;;  %v6897_v40 = vld [vmem:[#allocation5 + $0x5d8] ss:$72 sps:$4 sm:$0xff]   ;;  %v6906_v31 = vld [vmem:[#allocation5 + $0x9c8] ss:$72 sps:$4 sm:$0xff]  }
 0x1c8   :  { %3834 = vmatpush2.bf16.msra.mxu1 %v6885_v27  ;;  %v7687_v34 = vpop.f32.mrf.mxu0  ;;  %3892 = vmatprep.subr.bf16.mxu0 %v6896_v49  ;;  %v6914_v49 = vld [vmem:[#allocation5 + $0x93c] ss:$72 sps:$4 sm:$0xff]  }
 0x1c9   :  { %8324 = vst [vmem:[#allocation23_spill] sm:$0xff] %v7685_v1  ;;  %3835 = vmatprep.subr.bf16.mxu1 %v6893_v25  ;;  %v6911_v25 = vld [vmem:[#allocation5 + $0x4bc] ss:$72 sps:$4 sm:$0xff]  }
 0x1ca   :  { %v3135_v44 = vpop.f32.mrf.mxu0  ;;  %3718 = vmatmul.mubr.bf16.gmra.mxu0 %v7689_v57  ;;  %v6985_v53 = vld [vmem:[#allocation5 + $0x674] ss:$72 sps:$4 sm:$0xff]  }
 0x1cb   :  { %v7692_v18 = vadd.f32 %v3208_v15, %v3135_v44  ;;  %3893 = vmatpush1.bf16.msra.mxu0 %v6894_v7  ;;  %3727 = vmatprep.mubr.bf16.mxu0 %v7696_v26  ;;  %v6903_v15 = vld [vmem:[#allocation5 + $0x548] ss:$72 sps:$4 sm:$0xff]   ;;  %v3222_v7 = vpop.f32.mrf.mxu1 }
 0x1cc   :  { %3836 = vmatpush2.bf16.msra.mxu1 %v6891_v24  ;;  %v3137_v60 = vpop.f32.mrf.mxu0  ;;  %3894 = vmatprep.subr.bf16.mxu0 %v6902_v2  ;;  %v7703_v24 = vld [vmem:[#allocation2 + $0x48] ss:$12 sps:$4 sm:$0xff]   ;;  %v6912_v2 = vld [vmem:[#allocation5 + $0x938] ss:$72 sps:$4 sm:$0xff]  }
 0x1cd   :  { %8326 = vst [vmem:[#allocation25_spill] sm:$0xff] %v7692_v18  ;;  %3837 = vmatprep.subr.bf16.mxu1 %v6899_v37  ;;  %v7694_v6 = vadd.f32 %v3210_v63, %v3137_v60  ;;  %8331 = vst [vmem:[#allocation30_spill] sm:$0xff] %v7703_v24  ;;  %v6975_v18 = vld [vmem:[#allocation5 + $0x794] ss:$72 sps:$4 sm:$0xff]  }
 0x1ce   :  { %v3139_v19 = vpop.f32.mrf.mxu0 }
 0x1cf   :  { %8327 = vst [vmem:[#allocation26_spill] sm:$0xff] %v7694_v6  ;;  %v7699_v27 = vadd.f32 %v3212_v52, %v3139_v19  ;;  %3895 = vmatpush1.bf16.msra.mxu0 %v6900_v43  ;;  %v6909_v52 = vld [vmem:[#allocation5 + $0x4b8] ss:$72 sps:$4 sm:$0xff]   ;;  %v6920_v43 = vld [vmem:[#allocation5 + $0xd34] ss:$72 sps:$4 sm:$0xff]  }
 0x1d0   :  { %3838 = vmatpush2.bf16.msra.mxu1 %v6897_v40  ;;  %v3141_v41 = vpop.f32.mrf.mxu0  ;;  %3896 = vmatprep.subr.bf16.mxu0 %v6908_v30  ;;  %v6917_v40 = vld [vmem:[#allocation5 + $0x434] ss:$72 sps:$4 sm:$0xff]   ;;  %v6918_v19 = vld [vmem:[#allocation5 + $0xd30] ss:$72 sps:$4 sm:$0xff]   ;;  %v6968_v6 = vld [vmem:[#allocation5 + $0x820] ss:$72 sps:$4 sm:$0xff]  }
 0x1d1   :  { %8329 = vst [vmem:[#allocation28_spill] sm:$0xff] %v7699_v27  ;;  %3839 = vmatprep.subr.bf16.mxu1 %v6905_v50  ;;  %v7701_v48 = vadd.f32 %v3214_v21, %v3141_v41  ;;  %v3224_v50 = vpop.f32.mrf.mxu1  ;;  %v6926_v41 = vld [vmem:[#allocation5 + $0xca4] ss:$72 sps:$4 sm:$0xff]  }
 0x1d2   :  { %v3145_v63 = vpop.f32.mrf.mxu0  ;;  %3728 = vmatmul.mubr.bf16.gmra.mxu0 %v7703_v24 }
 0x1d3   :  { %8330 = vst [vmem:[#allocation29_spill] sm:$0xff] %v7701_v48  ;;  %v7706_v37 = vadd.f32 %v3218_v54, %v3145_v63  ;;  %3897 = vmatpush1.bf16.msra.mxu0 %v6906_v31  ;;  %3916 = vmatprep.mubr.bf16.mxu0 %v8314_v0  ;;  %v6915_v54 = vld [vmem:[#allocation5 + $0x430] ss:$72 sps:$4 sm:$0xff]   ;;  %v6923_v31 = vld [vmem:[#allocation5 + $0x3a4] ss:$72 sps:$4 sm:$0xff]  }
 0x1d4   :  { %3840 = vmatpush2.bf16.msra.mxu1 %v6903_v15  ;;  %v3147_v44 = vpop.f32.mrf.mxu0  ;;  %3898 = vmatprep.subr.bf16.mxu0 %v6914_v49  ;;  %v6924_v63 = vld [vmem:[#allocation5 + $0xca0] ss:$72 sps:$4 sm:$0xff]  }
 0x1d5   :  { %8332 = vst [vmem:[#allocation31_spill] sm:$0xff] %v7706_v37  ;;  %3841 = vmatprep.subr.bf16.mxu1 %v6911_v25  ;;  %v7708_v60 = vadd.f32 %v3220_v29, %v3147_v44  ;;  %v6921_v29 = vld [vmem:[#allocation5 + $0x3a0] ss:$72 sps:$4 sm:$0xff]   ;;  %v6932_v44 = vld [vmem:[#allocation5 + $0xc14] ss:$72 sps:$4 sm:$0xff]  }
 0x1d6   :  { %v3149_v21 = vpop.f32.mrf.mxu0 }
 0x1d7   :  { %8333 = vst [vmem:[#allocation32_spill] sm:$0xff] %v7708_v60  ;;  %v7711_v30 = vadd.f32 %v3222_v7, %v3149_v21  ;;  %3899 = vmatpush1.bf16.msra.mxu0 %v6912_v2  ;;  %v6929_v2 = vld [vmem:[#allocation5 + $0x314] ss:$72 sps:$4 sm:$0xff]   ;;  %v3075_v21 = vadd.f32 %v7586_v4, %v7571_v32  ;;  %v6933_v4 = vld [vmem:[#allocation5 + $0x280] ss:$72 sps:$4 sm:$0xff]  }
 0x1d8   :  { %3842 = vmatpush2.bf16.msra.mxu1 %v6909_v52  ;;  %v3151_v15 = vpop.f32.mrf.mxu0  ;;  %3957 = vmatprep.subr.bf16.mxu0 %v6917_v40  ;;  %v3069_v40 = vadd.f32 %v7563_v16, %v7559_v5  ;;  %v6938_v5 = vld [vmem:[#allocation5 + $0xb84] ss:$72 sps:$4 sm:$0xff]  }
 0x1d9   :  { %8334 = vst [vmem:[#allocation33_spill] sm:$0xff] %v7711_v30  ;;  %4030 = vmatprep.subr.bf16.mxu1 %v6920_v43  ;;  %v7713_v25 = vadd.f32 %v3224_v50, %v3151_v15  ;;  %v6927_v50 = vld [vmem:[#allocation5 + $0x310] ss:$72 sps:$4 sm:$0xff]   ;;  %v4132_v32 = vrot.slane %v3075_v21, 1  ;;  %v8336_v21 = vmov 0  }
 0x1da   :  { %3917 = vmatmul.mubr.bf16.vlgmr.msra.gmra.mxu0 %v7590_v61  ;;  %v7719_v7 = vpop.f32.mrf.mxu0  ;;  %v4130_v16 = vrot.slane %v3069_v40, 1  ;;  %v6944_v40 = vld [vmem:[#allocation5 + $0xaf4] ss:$72 sps:$4 sm:$0xff]  }
 0x1db   :  { %8335 = vst [vmem:[#allocation34_spill] sm:$0xff] %v7713_v25  ;;  %v7715_v49 = vpop.f32.mrf.mxu1  ;;  %3844 = vmatmul.mubr.bf16.vlgmr.msra.gmra.mxu1 %v7652_v51  ;;  %3958 = vmatpush1.bf16.msra.mxu0 %v6915_v54  ;;  %v6930_v54 = vld [vmem:[#allocation5 + $0xc10] ss:$72 sps:$4 sm:$0xff]   ;;  %v2929_v25 = vadd.f32 %v7485_v59, %v7496_v3  ;;  %v6947_v59 = vld [vmem:[#allocation5 + $0x164] ss:$72 sps:$4 sm:$0xff]  }
 0x1dc   :  { %4031 = vmatpush1.bf16.msra.mxu1 %v6918_v19  ;;  %3959 = vmatprep.subr.bf16.mxu0 %v6923_v31  ;;  %v3079_v19 = vadd.f32 %v7650_v17, %v7588_v62  ;;  %v7733_v15 = vpop.f32.mrf.mxu0  ;;  %v6936_v62 = vld [vmem:[#allocation5 + $0xb80] ss:$72 sps:$4 sm:$0xff]   ;;  %v2923_v17 = vadd.f32 %v7468_v23, %v7489_v56  ;;  %v6950_v3 = vld [vmem:[#allocation5 + $0xa64] ss:$72 sps:$4 sm:$0xff]  }
 0x1dd   :  { %v7721_v52 = vpop.f32.mrf.mxu1  ;;  %4032 = vmatprep.subr.bf16.mxu1 %v6926_v41  ;;  %3853 = vmatprep.mubr.bf16.mxu1 %v7664_v33  ;;  %v6935_v41 = vld [vmem:[#allocation5 + $0x284] ss:$72 sps:$4 sm:$0xff]  }
 0x1de   :  { %3926 = vmatprep.mubr.bf16.mxu0 %v8314_v0  ;;  %v4162_v23 = vadd.f32 %v4130_v16, %v2923_v17  ;;  %v6948_v16 = vld [vmem:[#allocation5 + $0xa60] ss:$72 sps:$4 sm:$0xff]   ;;  %v6953_v17 = vld [vmem:[#allocation5 + $0xd4] ss:$72 sps:$4 sm:$0xff]  }
 0x1df   :  { %v7727_v43 = vpop.f32.mrf.mxu1  ;;  %3960 = vmatpush1.bf16.msra.mxu0 %v6921_v29  ;;  %v4134_v29 = vrot.slane %v3079_v19, 1  ;;  %v6939_v19 = vld [vmem:[#allocation5 + $0x1f0] ss:$72 sps:$4 sm:$0xff]  }
 0x1e0   :  { %4033 = vmatpush1.bf16.msra.mxu1 %v6924_v63  ;;  %3961 = vmatprep.subr.bf16.mxu0 %v6929_v2  ;;  %v7743_v63 = vpop.f32.mrf.mxu0  ;;  %v4190_v37 = vadd.f32 %v7532_v35, %v4162_v23  ;;  %v6951_v23 = vld [vmem:[#allocation5 + $0xd0] ss:$72 sps:$4 sm:$0xff]  }
 0x1e1   :  { %v7735_v31 = vpop.f32.mrf.mxu1  ;;  %4034 = vmatprep.subr.bf16.mxu1 %v6932_v44  ;;  %v6941_v44 = vld [vmem:[#allocation5 + $0x1f4] ss:$72 sps:$4 sm:$0xff]  }
 0x1e2   :  { %3927 = vmatmul.mubr.bf16.gmra.mxu0 %v7610_v38  ;;  %v7755_v30 = vpop.f32.mrf.mxu0 }
 0x1e3   :  { %v7737_v0 = vpop.f32.mrf.mxu1  ;;  %3854 = vmatmul.mubr.bf16.gmra.mxu1 %v7672_v11  ;;  %3962 = vmatpush1.bf16.msra.mxu0 %v6927_v50  ;;  %v2933_v50 = vadd.f32 %v7499_v9, %v7503_v14 }
 0x1e4   :  { %4035 = vmatpush1.bf16.msra.mxu1 %v6930_v54  ;;  %3963 = vmatprep.subr.bf16.mxu0 %v6935_v41  ;;  %v4164_v54 = vadd.f32 %v4132_v32, %v2929_v25  ;;  %v6942_v41 = vld [vmem:[#allocation5 + $0xaf0] ss:$72 sps:$4 sm:$0xff]   ;;  %v6945_v25 = vld [vmem:[#allocation5 + $0x160] ss:$72 sps:$4 sm:$0xff]  }
 0x1e5   :  { %v7745_v2 = vpop.f32.mrf.mxu1  ;;  %4036 = vmatprep.subr.bf16.mxu1 %v6938_v5  ;;  %3863 = vmatprep.mubr.bf16.mxu1 %v7681_v10  ;;  %v4166_v5 = vadd.f32 %v4134_v29, %v2933_v50  ;;  %v6956_v29 = vld [vmem:[#allocation5 + $0x9d4] ss:$72 sps:$4 sm:$0xff]  }
 0x1e6   :  { %3936 = vmatprep.mubr.bf16.mxu0 %v8336_v21  ;;  %v4192_v14 = vadd.f32 %v7532_v35, %v4164_v54 }
 0x1e7   :  { %v7753_v56 = vpop.f32.mrf.mxu1  ;;  %3964 = vmatpush1.bf16.msra.mxu0 %v6933_v4  ;;  %v4194_v32 = vadd.f32 %v7532_v35, %v4166_v5  ;;  %v7766_v4 = vpop.f32.mrf.mxu0  ;;  %v6954_v35 = vld [vmem:[#allocation5 + $0x9d0] ss:$72 sps:$4 sm:$0xff]   ;;  %v6959_v5 = vld [vmem:[#allocation5 + $0x44] ss:$72 sps:$4 sm:$0xff]  }
 0x1e8   :  { %4037 = vmatpush1.bf16.msra.mxu1 %v6936_v62  ;;  %3965 = vmatprep.subr.bf16.mxu0 %v6941_v44  ;;  %v4206_v44 = vmax.f32 %v4190_v37, 0.0  ;;  %v4208_v50 = vmax.f32 %v4192_v14, 0.0  ;;  %v6957_v14 = vld [vmem:[#allocation5 + $0x40] ss:$72 sps:$4 sm:$0xff]  }
 0x1e9   :  { %v7757_v60 = vpop.f32.mrf.mxu1  ;;  %4038 = vmatprep.subr.bf16.mxu1 %v6944_v40  ;;  %v4210_v54 = vmax.f32 %v4194_v32, 0.0 }
 0x1ea   :  { %3937 = vmatmul.mubr.bf16.gmra.mxu0 %v7627_v46  ;;  %v4303_v37 = vsel %vm4211_vm0, %v4208_v50, -inf }
 0x1eb   :  { %v7760_v9 = vpop.f32.mrf.mxu1  ;;  %3864 = vmatmul.mubr.bf16.gmra.mxu1 %v7689_v57  ;;  %3966 = vmatpush1.bf16.msra.mxu0 %v6939_v19  ;;  %v7774_v19 = vpop.f32.mrf.mxu0  ;;  %v4304_v50 = vrot.slane %v4303_v37, 4 }
 0x1ec   :  { %4039 = vmatpush1.bf16.msra.mxu1 %v6942_v41  ;;  %3967 = vmatprep.subr.bf16.mxu0 %v6947_v59  ;;  %v6962_v59 = vld [vmem:[#allocation5 + $0x944] ss:$72 sps:$4 sm:$0xff]  }
 0x1ed   :  { %v7768_v62 = vpop.f32.mrf.mxu1  ;;  %4040 = vmatprep.subr.bf16.mxu1 %v6950_v3  ;;  %3873 = vmatprep.mubr.bf16.mxu1 %v7696_v26  ;;  %v4289_v3 = vsel %vm4211_vm0, %v4206_v44, -inf  ;;  %v7785_v32 = vpop.f32.mrf.mxu0  ;;  %v6966_v44 = vld [vmem:[#allocation8 + $0x78] sm:$0xff]   ;;  %v4305_v48 = vmax.f32 %v4303_v37, %v4304_v50  ;;  %v6977_v37 = vld [vmem:[#allocation8 + $0x28] sm:$0xff]   ;;  %v6981_v50 = vld [vmem:[#allocation8 + $0x60] sm:$0xff]  }
 0x1ee   :  { %3946 = vmatprep.mubr.bf16.mxu0 %v8336_v21  ;;  %v4290_v57 = vrot.slane %v4289_v3, 4 }
 0x1ef   :  { %v7772_v40 = vpop.f32.mrf.mxu1  ;;  %3968 = vmatpush1.bf16.msra.mxu0 %v6945_v25  ;;  %v6960_v25 = vld [vmem:[#allocation5 + $0x940] ss:$72 sps:$4 sm:$0xff]   ;;  %v7793_v10 = vpop.f32.mrf.mxu0 }
 0x1f0   :  { %4041 = vmatpush1.bf16.msra.mxu1 %v6948_v16  ;;  %3969 = vmatprep.subr.bf16.mxu0 %v6953_v17  ;;  %v4317_v16 = vsel %vm4211_vm0, %v4210_v54, -inf  ;;  %v6963_v54 = vld [vmem:[#allocation5 + $0x8b0] ss:$72 sps:$4 sm:$0xff]   ;;  %v4291_v11 = vmax.f32 %v4289_v3, %v4290_v57  ;;  %v4306_v57 = vrot.slane %v4305_v48, 2 }
 0x1f1   :  { %v7776_v41 = vpop.f32.mrf.mxu1  ;;  %4042 = vmatprep.subr.bf16.mxu1 %v6956_v29  ;;  %v6965_v29 = vld [vmem:[#allocation5 + $0x8b4] ss:$72 sps:$4 sm:$0xff]  }
 0x1f2   :  { %3947 = vmatmul.mubr.bf16.gmra.mxu0 %v7639_v20  ;;  %v4292_v1 = vrot.slane %v4291_v11, 2 }
 0x1f3   :  { %v7779_v26 = vpop.f32.mrf.mxu1  ;;  %3874 = vmatmul.mubr.bf16.gmra.mxu1 %v7703_v24  ;;  %3970 = vmatpush1.bf16.msra.mxu0 %v6951_v23  ;;  %v6967_v24 = vld [vmem:[#allocation8 + $0x38] sm:$0xff]  }
 0x1f4   :  { %4043 = vmatpush1.bf16.msra.mxu1 %v6954_v35  ;;  %3971 = vmatprep.subr.bf16.mxu0 %v6959_v5  ;;  %v4318_v35 = vrot.slane %v4317_v16, 4  ;;  %v6970_v5 = vld [vmem:[#allocation5 + $0x824] ss:$72 sps:$4 sm:$0xff]  }
 0x1f5   :  { %v7787_v17 = vpop.f32.mrf.mxu1  ;;  %4044 = vmatprep.subr.bf16.mxu1 %v6962_v59  ;;  %4062 = vmatprep.mubr.bf16.mxu1 %v8336_v21  ;;  %v6971_v59 = vld [vmem:[#allocation8 + $0x70] sm:$0xff]  }
 0x1f6   :  { %3989 = vmatprep.mubr.bf16.mxu0 %v7574_v12  ;;  %v4319_v12 = vmax.f32 %v4317_v16, %v4318_v35  ;;  %v6980_v16 = vld [vmem:[#allocation5 + $0x704] ss:$72 sps:$4 sm:$0xff]  }
 0x1f7   :  { %v7791_v23 = vpop.f32.mrf.mxu1  ;;  %3972 = vmatpush1.bf16.msra.mxu0 %v6957_v14  ;;  %v6972_v14 = vld [vmem:[#allocation8 + $0x30] sm:$0xff]  }
 0x1f8   :  { %8337 = vst [vmem:[#allocation35_spill] sm:$0xff] %v7791_v23  ;;  %4045 = vmatpush1.bf16.msra.mxu1 %v6960_v25  ;;  %3973 = vmatprep.subr.bf16.mxu0 %v6965_v29  ;;  %v7798_v25 = vpop.f32.mrf.mxu0  ;;  %v6976_v29 = vld [vmem:[#allocation8 + $0x68] sm:$0xff]   ;;  %v4320_v3 = vrot.slane %v4319_v12, 2 }
 0x1f9   :  { %6211 = vmatprep.subr.bf16.mxu1 %v6966_v44  ;;  %v7795_v27 = vpop.f32.mrf.mxu1 }
 0x1fa   :  { %8338 = vst [vmem:[#allocation36_spill] sm:$0xff] %v7795_v27  ;;  %v6982_v27 = vld [vmem:[#allocation8 + $0x20] sm:$0xff]  }
 0x1fb   :  { %4063 = vmatmul.mubr.bf16.vlgmr.msra.gmra.mxu1 %v7590_v61  ;;  %3974 = vmatpush2.bf16.msra.mxu0 %v6963_v54  ;;  %v7800_v44 = vpop.f32.mrf.mxu1  ;;  %v6973_v61 = vld [vmem:[#allocation5 + $0x790] ss:$72 sps:$4 sm:$0xff]   ;;  %v4293_v54 = vmax.f32 %v4291_v11, %v4292_v1  ;;  %v6987_v1 = vld [vmem:[#allocation8 + $0x18] sm:$0xff]  }
 0x1fc   :  { %6212 = vmatpush3.bf16.msra.mxu1 %v6967_v24  ;;  %3975 = vmatprep.subr.bf16.mxu0 %v6970_v5  ;;  %v7803_v24 = vpop.f32.mrf.mxu0  ;;  %v4307_v5 = vmax.f32 %v4305_v48, %v4306_v57 }
 0x1fd   :  { %6213 = vmatprep.subr.bf16.mxu1 %v6971_v59  ;;  %4072 = vmatprep.mubr.bf16.mxu1 %v8336_v21  ;;  %v7805_v35 = vpop.f32.mrf.mxu1  ;;  %v6978_v59 = vld [vmem:[#allocation5 + $0x700] ss:$72 sps:$4 sm:$0xff]   ;;  %v4294_v23 = vrot.slane %v4293_v54, 1 }
 0x1fe   :  { %8339 = vst [vmem:[#allocation37_spill] sm:$0xff] %v7805_v35  ;;  %v4308_v11 = vrot.slane %v4307_v5, 1 }
 0x1ff   :  { %3976 = vmatpush2.bf16.msra.mxu0 %v6968_v6  ;;  %v4321_v6 = vmax.f32 %v4319_v12, %v4320_v3  ;;  %v6990_v12 = vld [vmem:[#allocation5 + $0x5e4] ss:$72 sps:$4 sm:$0xff]   ;;  %v6991_v3 = vld [vmem:[#allocation8 + $0x50] sm:$0xff]  }
 0x200   :  { %6214 = vmatpush3.bf16.msra.mxu1 %v6972_v14  ;;  %3977 = vmatprep.subr.bf16.mxu0 %v6975_v18  ;;  %v7808_v14 = vpop.f32.mrf.mxu0  ;;  %v6986_v18 = vld [vmem:[#allocation8 + $0x58] sm:$0xff]  }
 0x201   :  { %6215 = vmatprep.subr.bf16.mxu1 %v6976_v29  ;;  %v7810_v29 = vpop.f32.mrf.mxu1  ;;  %v4322_v48 = vrot.slane %v4321_v6, 1 }
 0x202   :  { %8340 = vst [vmem:[#allocation38_spill] sm:$0xff] %v7810_v29  ;;  %v7813_v57 = vpop.f32.mrf.mxu0 }
 0x203   :  { %4073 = vmatmul.mubr.bf16.gmra.mxu1 %v7610_v38  ;;  %3978 = vmatpush2.bf16.msra.mxu0 %v6973_v61  ;;  %v6983_v38 = vld [vmem:[#allocation5 + $0x670] ss:$72 sps:$4 sm:$0xff]   ;;  %v7815_v61 = vpop.f32.mrf.mxu1  ;;  %v4323_v29 = vmax.f32 %v4321_v6, %v4322_v48  ;;  %v3339_v48 = vadd.f32 %v7743_v63, %v7727_v43  ;;  %v7003_v43 = vld [vmem:[#allocation8 + $0xf8] sm:$0xff]  }
 0x204   :  { %6216 = vmatpush3.bf16.msra.mxu1 %v6977_v37  ;;  %3979 = vmatprep.subr.bf16.mxu0 %v6980_v16  ;;  %v4295_v37 = vmax.f32 %v4293_v54, %v4294_v23  ;;  %v4309_v16 = vmax.f32 %v4307_v5, %v4308_v11  ;;  %v7820_v35 = vpop.f32.mrf.mxu0  ;;  %v6993_v5 = vld [vmem:[#allocation5 + $0x550] ss:$72 sps:$4 sm:$0xff]  }
 0x205   :  { %6217 = vmatprep.subr.bf16.mxu1 %v6981_v50  ;;  %4082 = vmatprep.mubr.bf16.mxu1 %v8336_v21  ;;  %v7818_v50 = vpop.f32.mrf.mxu1  ;;  %v6997_v11 = vld [vmem:[#allocation8 + $0x8] sm:$0xff]   ;;  %v4342_v63 = vrot.slane %v3339_v48, 1 }
 0x206   :  { %v4992_v23 = vsel %vm4982_vm5, %v4295_v37, %v7644_v8  ;;  %v3337_v8 = vadd.f32 %v7733_v15, %v7721_v52  ;;  %v4452_v52 = vld [vmem:[#allocation7 + $0x2] sm:$0x3] }
 0x207   :  { %3980 = vmatpush2.bf16.msra.mxu0 %v6978_v59  ;;  %v6992_v59 = vld [vmem:[#allocation8 + $0x10] sm:$0xff]   ;;  %v7826_v54 = vpop.f32.mrf.mxu1 }
 0x208   :  { %6218 = vmatpush3.bf16.msra.mxu1 %v6982_v27  ;;  %3981 = vmatprep.subr.bf16.mxu0 %v6985_v53  ;;  %v6988_v27 = vld [vmem:[#allocation5 + $0x5e0] ss:$72 sps:$4 sm:$0xff]   ;;  %v6995_v53 = vld [vmem:[#allocation5 + $0x554] ss:$72 sps:$4 sm:$0xff]  }
 0x209   :  { %6219 = vmatprep.subr.bf16.mxu1 %v6986_v18  ;;  %v6996_v18 = vld [vmem:[#allocation8 + $0x48] sm:$0xff]   ;;  %v7838_v37 = vpop.f32.mrf.mxu1 }
 0x20b   :  { %4083 = vmatmul.mubr.bf16.gmra.mxu1 %v7627_v46  ;;  %3982 = vmatpush2.bf16.msra.mxu0 %v6983_v38  ;;  %v4993_v46 = vsel %vm4984_vm6, %v4309_v16, %v4992_v23  ;;  %v3335_v38 = vadd.f32 %v7719_v7, %v7715_v49  ;;  %v3341_v49 = vadd.f32 %v7755_v30, %v7735_v31  ;;  %v7002_v16 = vld [vmem:[#allocation8] sm:$0xff]  }
 0x20c   :  { %6220 = vmatpush3.bf16.msra.mxu1 %v6987_v1  ;;  %3983 = vmatprep.subr.bf16.mxu0 %v6990_v12  ;;  %v4994_v6 = vsel %vm4986_vm7, %v4323_v29, %v4993_v46  ;;  %v7831_v1 = vpop.f32.mrf.mxu0  ;;  %v7001_v12 = vld [vmem:[#allocation8 + $0x40] sm:$0xff]   ;;  %v3345_v7 = vadd.f32 %v7766_v4, %v7737_v0  ;;  %v3349_v30 = vadd.f32 %v7785_v32, %v7753_v56  ;;  %v7854_v4 = vpop.f32.mrf.mxu1  ;;  %v7004_v56 = vld [vmem:[#allocation8 + $0xb8] sm:$0xff]  }
 0x20d   :  { %6221 = vmatprep.subr.bf16.mxu1 %v6991_v3  ;;  %4092 = vmatprep.mubr.bf16.mxu1 %v8336_v21  ;;  %v7000_v21 = vld [vmem:[#allocation5 + $0x4c4] ss:$72 sps:$4 sm:$0xff]   ;;  %v5062_v3 = vpack.c.bf16 %v4994_v6, %v4994_v6  ;;  %v6998_v29 = vld [vmem:[#allocation5 + $0x4c0] ss:$72 sps:$4 sm:$0xff]   ;;  %v4340_v15 = vrot.slane %v3335_v38, 1  ;;  %v7849_v0 = vrot.slane %v4452_v52, %v7507_v22  ;;  %v7852_v31 = vrot.slane %v4452_v52, %v7517_v39 }
 0x20e   :  { %v3351_v23 = vadd.f32 %v7793_v10, %v7757_v60  ;;  %v3205_v32 = vadd.f32 %v7647_v45, %v7687_v34  ;;  %v7005_v10 = vld [vmem:[#allocation8 + $0xf0] sm:$0xff]   ;;  %v4374_v6 = vadd.f32 %v4342_v63, %v7668_v55  ;;  %v4346_v38 = vrot.slane %v3349_v30, 1  ;;  %v7876_v34 = vpop.f32.mrf.mxu1 }
 0x20f   :  { %3984 = vmatpush2.bf16.msra.mxu0 %v6988_v27  ;;  %v3368_v27 = vpop.f32.mrf.mxu0  ;;  %v4372_v46 = vadd.f32 %v4340_v15, %v7659_v47  ;;  %v3359_v45 = vadd.f32 %v7808_v14, %v7772_v40  ;;  %v3361_v47 = vadd.f32 %v7813_v57, %v7776_v41  ;;  %v7006_v40 = vld [vmem:[#allocation8 + $0xb0] sm:$0xff]  }
 0x210   :  { %6222 = vmatpush3.bf16.msra.mxu1 %v6992_v59  ;;  %3985 = vmatprep.subr.bf16.mxu0 %v6995_v53  ;;  %v3347_v59 = vadd.f32 %v7774_v19, %v7745_v2  ;;  %v4343_v53 = vrot.slane %v3341_v49, 1  ;;  %v5061_v2 = vpack.c.bf16 %v7656_v13, %v7656_v13  ;;  %v3195_v19 = vadd.f32 %v7620_v58, %v7670_v28  ;;  %v8347_v63 = vld [vmem:[#allocation25_spill] sm:$0xff] }
 0x211   :  { %6223 = vmatprep.subr.bf16.mxu1 %v6996_v18  ;;  %v4344_v18 = vrot.slane %v3345_v7, 1  ;;  %v3357_v58 = vadd.f32 %v7803_v24, %v7768_v62  ;;  %v8341_v24 = vld [vmem:[#allocation35_spill] sm:$0xff]  ;;  %v4350_v7 = vrot.slane %v3359_v45, 1 }
 0x212   :  { %v4345_v13 = vrot.slane %v3347_v59, 1  ;;  %v3369_v14 = vadd.f32 %v3368_v27, %v8341_v24  ;;  %v8346_v27 = vld [vmem:[#allocation38_spill] sm:$0xff] }
 0x213   :  { %4093 = vmatmul.mubr.bf16.gmra.mxu1 %v7639_v20  ;;  %3986 = vmatpush2.bf16.msra.mxu0 %v6993_v5  ;;  %v4341_v20 = vrot.slane %v3337_v8, 1  ;;  %v3355_v5 = vadd.f32 %v7798_v25, %v7760_v9  ;;  %v7881_v55 = vadd.f32 %v4344_v18, %v7676_v42  ;;  %v4347_v9 = vrot.slane %v3351_v23, 1  ;;  %v7007_v42 = vld [vmem:[#allocation8 + $0xe8] sm:$0xff]  }
 0x214   :  { %6224 = vmatpush3.bf16.msra.mxu1 %v6997_v11  ;;  %5490 = vmatprep.mubr.bf16.mxu1 %v5062_v3  ;;  %v3370_v11 = vpop.f32.mrf.mxu0  ;;  %v3365_v25 = vadd.f32 %v7820_v35, %v7779_v26  ;;  %v4349_v49 = vrot.slane %v3357_v58, 1  ;;  %v4351_v26 = vrot.slane %v3361_v47, 1  ;;  %v8345_v35 = vld [vmem:[#allocation36_spill] sm:$0xff]  ;;  %v4354_v18 = vrot.slane %v3369_v14, 1 }
 0x215   :  { %3987 = vmatprep.subr.bf16.mxu0 %v7000_v21  ;;  %6225 = vmatprep.subr.bf16.mxu1 %v7001_v12  ;;  %v4373_v60 = vadd.f32 %v4341_v20, %v7662_v36  ;;  %v7878_v36 = vadd.f32 %v4343_v53, %v3195_v19  ;;  %v4348_v41 = vrot.slane %v3355_v5, 1  ;;  %v8342_v21 = vld [vmem:[#allocation21_spill] sm:$0xff]  ;;  %v7008_v20 = vld [vmem:[#allocation8 + $0xa8] sm:$0xff]   ;;  %v8348_v5 = vld [vmem:[#allocation26_spill] sm:$0xff] }
 0x216   :  { %v7891_v8 = vadd.f32 %v4345_v13, %v8342_v21  ;;  %v8344_v12 = vld [vmem:[#allocation37_spill] sm:$0xff]  ;;  %v4352_v30 = vrot.slane %v3365_v25, 1  ;;  %v7010_v25 = vld [vmem:[#allocation8 + $0xa0] sm:$0xff]   ;;  %v8354_v14 = vld [vmem:[#allocation32_spill] sm:$0xff] }
 0x217   :  { %3988 = vmatpush2.bf16.msra.mxu0 %v6998_v29  ;;  %v3371_v29 = vadd.f32 %v3370_v11, %v8345_v35  ;;  %v7904_v59 = vadd.f32 %v4348_v41, %v8347_v63  ;;  %v7909_v11 = vadd.f32 %v4349_v49, %v8348_v5  ;;  %v8352_v41 = vld [vmem:[#allocation22_spill] sm:$0xff] }
 0x218   :  { %6226 = vmatpush3.bf16.msra.mxu1 %v7002_v16  ;;  %6233 = vmatprep.subr.bf16.mxu0 %v7003_v43  ;;  %v7900_v16 = vadd.f32 %v4347_v9, %v3205_v32 }
 0x219   :  { %v4355_v45 = vrot.slane %v3371_v29, 1 }
 0x21a   :  { %v3407_v28 = vpop.f32.mrf.mxu0  ;;  %3990 = vmatmul.mubr.bf16.vlgmr.msra.gmra.mxu0 %v7652_v51  ;;  %v3367_v51 = vadd.f32 %v7831_v1, %v7787_v17  ;;  %v7898_v1 = vpop.f32.mrf.mxu1 }
 0x21b   :  { %5491 = vmatmul.mubr.bf16.vlgmr.msra.gmra.mxu1 %v5061_v2  ;;  %v3481_v62 = vadd.f32 %v7800_v44, %v3407_v28  ;;  %3999 = vmatprep.mubr.bf16.mxu0 %v7664_v33  ;;  %v8343_v44 = vld [vmem:[#allocation23_spill] sm:$0xff]  ;;  %v8351_v28 = vld [vmem:[#allocation20_spill] sm:$0xff] }
 0x21c   :  { %6234 = vmatpush3.bf16.msra.mxu0 %v7004_v56  ;;  %v3409_v57 = vpop.f32.mrf.mxu0  ;;  %v7894_v48 = vadd.f32 %v4346_v38, %v8343_v44  ;;  %v4353_v53 = vrot.slane %v3367_v51, 1  ;;  %v7009_v2 = vld [vmem:[#allocation8 + $0xe0] sm:$0xff]   ;;  %v8350_v38 = vld [vmem:[#allocation29_spill] sm:$0xff]  ;;  %v7918_v9 = vpop.f32.mrf.mxu1 }
 0x21d   :  { %6235 = vmatprep.subr.bf16.mxu0 %v7005_v10  ;;  %v4404_v33 = vrot.slane %v3481_v62, 2  ;;  %v3483_v3 = vadd.f32 %v8344_v12, %v3409_v57  ;;  %v8349_v10 = vld [vmem:[#allocation28_spill] sm:$0xff]  ;;  %v7915_v58 = vadd.f32 %v4351_v26, %v8350_v38  ;;  %v8353_v51 = vld [vmem:[#allocation31_spill] sm:$0xff]  ;;  %v7011_v12 = vld [vmem:[#allocation8 + $0xd8] sm:$0xff]  }
 0x21e   :  { %v3411_v17 = vpop.f32.mrf.mxu0  ;;  %v7912_v13 = vadd.f32 %v4350_v7, %v8349_v10  ;;  %v7923_v24 = vadd.f32 %v4352_v30, %v8353_v51  ;;  %v7926_v57 = vadd.f32 %v4353_v53, %v8354_v14  ;;  %v8356_v26 = vld [vmem:[#allocation34_spill] sm:$0xff] }
 0x21f   :  { %v4436_v52 = vadd.f32 %v4404_v33, %v4372_v46  ;;  %v4405_v15 = vrot.slane %v3483_v3, 2  ;;  %v3485_v43 = vadd.f32 %v8346_v27, %v3411_v17  ;;  %v7936_v35 = vadd.f32 %v4355_v45, %v8356_v26  ;;  %v7939_v27 = vpop.f32.mrf.mxu1  ;;  %v7012_v30 = vld [vmem:[#allocation8 + $0x98] sm:$0xff]  }
 0x220   :  { %6236 = vmatpush3.bf16.msra.mxu0 %v7006_v40  ;;  %v3413_v23 = vpop.f32.mrf.mxu0 }
 0x221   :  { %6237 = vmatprep.subr.bf16.mxu0 %v7007_v42  ;;  %v4464_v56 = vadd.f32 %v7849_v0, %v4436_v52  ;;  %v4437_v19 = vadd.f32 %v4405_v15, %v4373_v60  ;;  %v4406_v32 = vrot.slane %v3485_v43, 2  ;;  %v3487_v46 = vadd.f32 %v7815_v61, %v3413_v23  ;;  %v8355_v42 = vld [vmem:[#allocation33_spill] sm:$0xff] }
 0x222   :  { %v3417_v47 = vpop.f32.mrf.mxu0  ;;  %4000 = vmatmul.mubr.bf16.gmra.mxu0 %v8351_v28  ;;  %v7929_v21 = vadd.f32 %v4354_v18, %v8355_v42  ;;  %v7949_v28 = vpop.f32.mrf.mxu1 }
 0x223   :  { %v4480_v62 = vmax.f32 %v4464_v56, 0.0  ;;  %v4465_v60 = vadd.f32 %v7852_v31, %v4437_v19  ;;  %v4438_v40 = vadd.f32 %v4406_v32, %v4374_v6  ;;  %v4407_v61 = vrot.slane %v3487_v46, 2  ;;  %4009 = vmatprep.mubr.bf16.mxu0 %v8352_v41 }
 0x224   :  { %6238 = vmatpush3.bf16.msra.mxu0 %v7008_v20  ;;  %v3491_v44 = vadd.f32 %v7818_v50, %v3417_v47  ;;  %v3419_v33 = vpop.f32.mrf.mxu0  ;;  %v8357_v47 = vld [vmem:[#allocation24_spill] sm:$0xff] }
 0x225   :  { %6239 = vmatprep.subr.bf16.mxu0 %v7009_v2  ;;  %v4497_v6 = vsel %vm4496_vm8, %v4480_v62, -inf  ;;  %v4481_v3 = vmax.f32 %v4465_v60, 0.0  ;;  %v4466_v49 = vadd.f32 %v7849_v0, %v4438_v40  ;;  %v4439_v7 = vadd.f32 %v4407_v61, %v7878_v36  ;;  %v8358_v61 = vld [vmem:[#allocation27_spill] sm:$0xff] }
 0x226   :  { %v4498_v29 = vrot.slane %v4497_v6, 4  ;;  %v4408_v17 = vrot.slane %v3491_v44, 2  ;;  %v3493_v52 = vadd.f32 %v7826_v54, %v3419_v33  ;;  %v3421_v15 = vpop.f32.mrf.mxu0  ;;  %v7013_v54 = vld [vmem:[#allocation8 + $0xd0] sm:$0xff]   ;;  %v7015_v44 = vld [vmem:[#allocation8 + $0xc8] sm:$0xff]  }
 0x227   :  { %v4504_v50 = vsel %vm4496_vm8, %v4481_v3, -inf  ;;  %v4482_v43 = vmax.f32 %v4466_v49, 0.0  ;;  %v4467_v20 = vadd.f32 %v7852_v31, %v4439_v7  ;;  %v3495_v63 = vadd.f32 %v7838_v37, %v3421_v15 }
 0x228   :  { %6240 = vmatpush3.bf16.msra.mxu0 %v7010_v25  ;;  %v4499_v36 = vmax.f32 %v4497_v6, %v4498_v29  ;;  %v4505_v53 = vrot.slane %v4504_v50, 4  ;;  %v4440_v18 = vadd.f32 %v4408_v17, %v7881_v55  ;;  %v4409_v23 = vrot.slane %v3493_v52, 2  ;;  %v3423_v2 = vpop.f32.mrf.mxu0  ;;  %v7958_v29 = vpop.f32.mrf.mxu1 }
 0x229   :  { %6241 = vmatprep.subr.bf16.mxu0 %v7011_v12  ;;  %v4511_v56 = vsel %vm4496_vm8, %v4482_v43, -inf  ;;  %v4483_v19 = vmax.f32 %v4467_v20, 0.0  ;;  %v4410_v32 = vrot.slane %v3495_v63, 2  ;;  %v3497_v46 = vadd.f32 %v7854_v4, %v3423_v2  ;;  %v7014_v4 = vld [vmem:[#allocation8 + $0x90] sm:$0xff]   ;;  %v7016_v43 = vld [vmem:[#allocation8 + $0x88] sm:$0xff]  }
 0x22a   :  { %v4500_v5 = vrot.slane %v4499_v36, 2  ;;  %v4506_v10 = vmax.f32 %v4504_v50, %v4505_v53  ;;  %v4512_v38 = vrot.slane %v4511_v56, 4  ;;  %v4468_v37 = vadd.f32 %v7849_v0, %v4440_v18  ;;  %v3427_v45 = vpop.f32.mrf.mxu0  ;;  %4010 = vmatmul.mubr.bf16.gmra.mxu0 %v8357_v47  ;;  %v7017_v53 = vld [vmem:[#allocation8 + $0xc0] sm:$0xff]  }
 0x22b   :  { %v4518_v55 = vsel %vm4496_vm8, %v4483_v19, -inf  ;;  %v4441_v62 = vadd.f32 %v4409_v23, %v7891_v8  ;;  %v4442_v60 = vadd.f32 %v4410_v32, %v7894_v48  ;;  %v4411_v40 = vrot.slane %v3497_v46, 2  ;;  %4019 = vmatprep.mubr.bf16.mxu0 %v8358_v61 }
 0x22c   :  { %6242 = vmatpush3.bf16.msra.mxu0 %v7012_v30  ;;  %v4501_v41 = vmax.f32 %v4499_v36, %v4500_v5  ;;  %v4507_v25 = vrot.slane %v4506_v10, 2  ;;  %v4513_v51 = vmax.f32 %v4511_v56, %v4512_v38  ;;  %v4519_v14 = vrot.slane %v4518_v55, 4  ;;  %v3429_v42 = vpop.f32.mrf.mxu0  ;;  %v7967_v38 = vpop.f32.mrf.mxu1 }
 0x22d   :  { %6243 = vmatprep.subr.bf16.mxu0 %v7013_v54  ;;  %v4484_v33 = vmax.f32 %v4468_v37, 0.0  ;;  %v4469_v12 = vadd.f32 %v7852_v31, %v4441_v62  ;;  %v4470_v6 = vadd.f32 %v7849_v0, %v4442_v60  ;;  %v4443_v8 = vadd.f32 %v4411_v40, %v7900_v16  ;;  %v7018_v60 = vld [vmem:[#allocation8 + $0x80] sm:$0xff]  }
 0x22e   :  { %v4502_v48 = vrot.slane %v4501_v41, 1  ;;  %v4508_v3 = vmax.f32 %v4506_v10, %v4507_v25  ;;  %v4514_v49 = vrot.slane %v4513_v51, 2  ;;  %v4520_v7 = vmax.f32 %v4518_v55, %v4519_v14  ;;  %v3431_v26 = vpop.f32.mrf.mxu0  ;;  %v8359_v10 = vld [vmem:[#allocation30_spill] sm:$0xff] }
 0x22f   :  { %v4525_v17 = vsel %vm4496_vm8, %v4484_v33, -inf  ;;  %v4485_v52 = vmax.f32 %v4469_v12, 0.0  ;;  %v4486_v15 = vmax.f32 %v4470_v6, 0.0  ;;  %v4471_v50 = vadd.f32 %v7852_v31, %v4443_v8 }
 0x230   :  { %6244 = vmatpush3.bf16.msra.mxu0 %v7014_v4  ;;  %v4503_v20 = vmax.f32 %v4501_v41, %v4502_v48  ;;  %v4509_v63 = vrot.slane %v4508_v3, 1  ;;  %v4515_v30 = vmax.f32 %v4513_v51, %v4514_v49  ;;  %v4521_v36 = vrot.slane %v4520_v7, 2  ;;  %v3433_v16 = vpop.f32.mrf.mxu0 }
 0x231   :  { %6245 = vmatprep.subr.bf16.mxu0 %v7015_v44  ;;  %v4526_v18 = vrot.slane %v4525_v17, 4  ;;  %v4532_v23 = vsel %vm4496_vm8, %v4485_v52, -inf  ;;  %v4539_v2 = vsel %vm4496_vm8, %v4486_v15, -inf  ;;  %v4487_v54 = vmax.f32 %v4471_v50, 0.0 }
 0x232   :  { %v4510_v56 = vmax.f32 %v4508_v3, %v4509_v63  ;;  %v4516_v19 = vrot.slane %v4515_v30, 1  ;;  %v4522_v32 = vmax.f32 %v4520_v7, %v4521_v36  ;;  %v4533_v46 = vrot.slane %v4532_v23, 4  ;;  %v7964_v5 = vpop.f32.mrf.mxu0  ;;  %4020 = vmatmul.mubr.bf16.gmra.mxu0 %v8359_v10 }
 0x233   :  { %v4527_v37 = vmax.f32 %v4525_v17, %v4526_v18  ;;  %v4540_v47 = vrot.slane %v4539_v2, 4  ;;  %v4546_v55 = vsel %vm4496_vm8, %v4487_v54, -inf  ;;  %v3501_v62 = vadd.f32 %v7876_v34, %v3427_v45  ;;  %v3516_v34 = vpop.f32.mrf.mxu1 }
 0x234   :  { %6246 = vmatpush3.bf16.msra.mxu0 %v7016_v43  ;;  %v4517_v40 = vmax.f32 %v4515_v30, %v4516_v19  ;;  %v4523_v61 = vrot.slane %v4522_v32, 1  ;;  %v4534_v4 = vmax.f32 %v4532_v23, %v4533_v46  ;;  %v4547_v41 = vrot.slane %v4546_v55, 4  ;;  %v3439_v25 = vpop.f32.mrf.mxu0 }
 0x235   :  { %6247 = vmatprep.subr.bf16.mxu0 %v7017_v53  ;;  %v4528_v51 = vrot.slane %v4527_v37, 2  ;;  %v4541_v14 = vmax.f32 %v4539_v2, %v4540_v47  ;;  %v4412_v44 = vrot.slane %v3501_v62, 2  ;;  %v3503_v33 = vadd.f32 %v7898_v1, %v3429_v42 }
 0x236   :  { %v5013_v12 = vsel %vm4974_vm1, %v4517_v40, %v4503_v20  ;;  %v4524_v6 = vmax.f32 %v4522_v32, %v4523_v61  ;;  %v4535_v8 = vrot.slane %v4534_v4, 2  ;;  %v4548_v48 = vmax.f32 %v4546_v55, %v4547_v41  ;;  %v3441_v3 = vpop.f32.mrf.mxu0 }
 0x237   :  { %v4529_v45 = vmax.f32 %v4527_v37, %v4528_v51  ;;  %v4542_v49 = vrot.slane %v4541_v14, 2  ;;  %v4444_v7 = vadd.f32 %v4412_v44, %v7904_v59  ;;  %v4413_v17 = vrot.slane %v3503_v33, 2 }
 0x238   :  { %6248 = vmatpush3.bf16.msra.mxu0 %v7018_v60  ;;  %v7975_v52 = vsel %vm4974_vm1, %v4524_v6, %v4510_v56  ;;  %v4536_v15 = vmax.f32 %v4534_v4, %v4535_v8  ;;  %v4549_v50 = vrot.slane %v4548_v48, 2  ;;  %v3505_v1 = vadd.f32 %v7918_v9, %v3431_v26  ;;  %v3443_v42 = vpop.f32.mrf.mxu0 }
 0x239   :  { %v4530_v43 = vrot.slane %v4529_v45, 1  ;;  %v4543_v20 = vmax.f32 %v4541_v14, %v4542_v49  ;;  %v4472_v63 = vadd.f32 %v7849_v0, %v4444_v7  ;;  %v4445_v30 = vadd.f32 %v4413_v17, %v7909_v11 }
 0x23a   :  { %v4537_v36 = vrot.slane %v4536_v15, 1  ;;  %v4550_v53 = vmax.f32 %v4548_v48, %v4549_v50  ;;  %v4414_v18 = vrot.slane %v3505_v1, 2  ;;  %v3507_v59 = vadd.f32 %v7939_v27, %v3433_v16  ;;  %v7983_v2 = vpop.f32.mrf.mxu0 }
 0x23b   :  { %v7981_v23 = vpop.f32.mrf.mxu1  ;;  %v4531_v54 = vmax.f32 %v4529_v45, %v4530_v43  ;;  %v4544_v56 = vrot.slane %v4543_v20, 1  ;;  %v4488_v19 = vmax.f32 %v4472_v63, 0.0  ;;  %v4473_v9 = vadd.f32 %v7852_v31, %v4445_v30 }
 0x23c   :  { %v7986_v26 = vmax.f32 %v4536_v15, %v4537_v36  ;;  %v4551_v32 = vrot.slane %v4550_v53, 1  ;;  %v4446_v46 = vadd.f32 %v4414_v18, %v7912_v13  ;;  %v4415_v11 = vrot.slane %v3507_v59, 2  ;;  %v7991_v37 = vpop.f32.mrf.mxu0 }
 0x23d   :  { %v7989_v10 = vpop.f32.mrf.mxu1  ;;  %v5014_v27 = vsel %vm4976_vm2, %v4531_v54, %v5013_v12  ;;  %v4545_v16 = vmax.f32 %v4543_v20, %v4544_v56  ;;  %v4553_v47 = vsel %vm4496_vm8, %v4488_v19, -inf  ;;  %v4489_v55 = vmax.f32 %v4473_v9, 0.0 }
 0x23e   :  { %v7995_v62 = vmax.f32 %v4550_v53, %v4551_v32  ;;  %v4554_v60 = vrot.slane %v4553_v47, 4  ;;  %v4474_v40 = vadd.f32 %v7849_v0, %v4446_v46  ;;  %v4447_v61 = vadd.f32 %v4415_v11, %v7915_v58  ;;  %v8001_v13 = vpop.f32.mrf.mxu0 }
 0x23f   :  { %v7999_v4 = vpop.f32.mrf.mxu1  ;;  %v5015_v41 = vsel %vm4978_vm3, %v4545_v16, %v5014_v27  ;;  %v4560_v51 = vsel %vm4496_vm8, %v4489_v55, -inf  ;;  %v3511_v14 = vadd.f32 %v7949_v28, %v7964_v5  ;;  %v3513_v44 = vadd.f32 %v7958_v29, %v3439_v25 }
 0x240   :  { %v4555_v33 = vmax.f32 %v4553_v47, %v4554_v60  ;;  %v4561_v12 = vrot.slane %v4560_v51, 4  ;;  %v4490_v6 = vmax.f32 %v4474_v40, 0.0  ;;  %v4475_v8 = vadd.f32 %v7852_v31, %v4447_v61  ;;  %v8011_v58 = vpop.f32.mrf.mxu0 }
 0x241   :  { %v8009_v48 = vpop.f32.mrf.mxu1  ;;  %v4416_v45 = vrot.slane %v3511_v14, 2  ;;  %v4417_v49 = vrot.slane %v3513_v44, 2  ;;  %v3515_v7 = vadd.f32 %v7967_v38, %v3441_v3  ;;  %v3517_v17 = vadd.f32 %v3516_v34, %v3443_v42 }
 0x242   :  { %v4556_v15 = vrot.slane %v4555_v33, 2  ;;  %v4562_v50 = vmax.f32 %v4560_v51, %v4561_v12  ;;  %v4567_v28 = vsel %vm4496_vm8, %v4490_v6, -inf  ;;  %v4491_v5 = vmax.f32 %v4475_v8, 0.0  ;;  %v8017_v25 = vpop.f32.mrf.mxu0 }
 0x243   :  { %v8015_v29 = vpop.f32.mrf.mxu1  ;;  %v4568_v1 = vrot.slane %v4567_v28, 4  ;;  %v4448_v43 = vadd.f32 %v4416_v45, %v7923_v24  ;;  %v4449_v20 = vadd.f32 %v4417_v49, %v7926_v57  ;;  %v4418_v63 = vrot.slane %v3515_v7, 2 }
 0x244   :  { %v4557_v30 = vmax.f32 %v4555_v33, %v4556_v15  ;;  %v4563_v36 = vrot.slane %v4562_v50, 2  ;;  %v4574_v38 = vsel %vm4496_vm8, %v4491_v5, -inf  ;;  %v4419_v3 = vrot.slane %v3517_v17, 2  ;;  %v8024_v42 = vpop.f32.mrf.mxu0 }
 0x245   :  { %v8022_v34 = vpop.f32.mrf.mxu1  ;;  %v4569_v53 = vmax.f32 %v4567_v28, %v4568_v1  ;;  %v4575_v18 = vrot.slane %v4574_v38, 4  ;;  %v4476_v59 = vadd.f32 %v7849_v0, %v4448_v43  ;;  %v4477_v54 = vadd.f32 %v7852_v31, %v4449_v20 }
 0x246   :  { %v4558_v56 = vrot.slane %v4557_v30, 1  ;;  %v4564_v24 = vmax.f32 %v4562_v50, %v4563_v36  ;;  %v4450_v57 = vadd.f32 %v4418_v63, %v7929_v21  ;;  %v4451_v19 = vadd.f32 %v4419_v3, %v7936_v35  ;;  %v3640_v32 = vpop.f32.mrf.mxu0 }
 0x247   :  { %v3567_v9 = vpop.f32.mrf.mxu1  ;;  %v4570_v46 = vrot.slane %v4569_v53, 2  ;;  %v4576_v11 = vmax.f32 %v4574_v38, %v4575_v18  ;;  %v4492_v27 = vmax.f32 %v4476_v59, 0.0  ;;  %v4493_v16 = vmax.f32 %v4477_v54, 0.0 }
 0x248   :  { %v4559_v47 = vmax.f32 %v4557_v30, %v4558_v56  ;;  %v4565_v55 = vrot.slane %v4564_v24, 1  ;;  %v4478_v60 = vadd.f32 %v7849_v0, %v4450_v57  ;;  %v4479_v40 = vadd.f32 %v7852_v31, %v4451_v19  ;;  %v3642_v51 = vpop.f32.mrf.mxu0 }
 0x249   :  { %v3569_v61 = vpop.f32.mrf.mxu1  ;;  %v4571_v14 = vmax.f32 %v4569_v53, %v4570_v46  ;;  %v4577_v44 = vrot.slane %v4576_v11, 2  ;;  %v4581_v21 = vsel %vm4496_vm8, %v4492_v27, -inf  ;;  %v4588_v35 = vsel %vm4496_vm8, %v4493_v16, -inf }
 0x24a   :  { %v5016_v33 = vsel %vm4980_vm4, %v4559_v47, %v5015_v41  ;;  %v4566_v12 = vmax.f32 %v4564_v24, %v4565_v55  ;;  %v4582_v6 = vrot.slane %v4581_v21, 4  ;;  %v4589_v8 = vrot.slane %v4588_v35, 4  ;;  %v3646_v49 = vpop.f32.mrf.mxu0 }
 0x24b   :  { %v3573_v45 = vpop.f32.mrf.mxu1  ;;  %v4572_v7 = vrot.slane %v4571_v14, 1  ;;  %v4578_v17 = vmax.f32 %v4576_v11, %v4577_v44  ;;  %v4494_v0 = vmax.f32 %v4478_v60, 0.0  ;;  %v4495_v15 = vmax.f32 %v4479_v40, 0.0 }
 0x24c   :  { %v4583_v31 = vmax.f32 %v4581_v21, %v4582_v6  ;;  %v4590_v50 = vmax.f32 %v4588_v35, %v4589_v8  ;;  %v8037_v28 = vadd.f32 %v7983_v2, %v7981_v23  ;;  %v8041_v5 = vadd.f32 %v7991_v37, %v7989_v10  ;;  %v3648_v1 = vpop.f32.mrf.mxu0 }
 0x24d   :  { %v3575_v41 = vpop.f32.mrf.mxu1  ;;  %v4573_v43 = vmax.f32 %v4571_v14, %v4572_v7  ;;  %v4579_v20 = vrot.slane %v4578_v17, 1  ;;  %v4595_v63 = vsel %vm4496_vm8, %v4494_v0, -inf  ;;  %v4602_v30 = vsel %vm4496_vm8, %v4495_v15, -inf }
 0x24e   :  { %v4584_v36 = vrot.slane %v4583_v31, 2  ;;  %v4591_v38 = vrot.slane %v4590_v50, 2  ;;  %v4596_v3 = vrot.slane %v4595_v63, 4  ;;  %v4603_v53 = vrot.slane %v4602_v30, 4  ;;  %v3650_v59 = vpop.f32.mrf.mxu0 }
 0x24f   :  { %v3577_v18 = vpop.f32.mrf.mxu1  ;;  %v5017_v23 = vsel %vm4982_vm5, %v4573_v43, %v5016_v33  ;;  %v4580_v2 = vmax.f32 %v4578_v17, %v4579_v20  ;;  %v8048_v10 = vadd.f32 %v8001_v13, %v7999_v4  ;;  %v8052_v37 = vadd.f32 %v8011_v58, %v8009_v48 }
 0x250   :  { %v4585_v54 = vmax.f32 %v4583_v31, %v4584_v36  ;;  %v4592_v56 = vmax.f32 %v4590_v50, %v4591_v38  ;;  %v4597_v24 = vmax.f32 %v4595_v63, %v4596_v3  ;;  %v4604_v57 = vmax.f32 %v4602_v30, %v4603_v53  ;;  %v3652_v46 = vpop.f32.mrf.mxu0 }
 0x251   :  { %v3579_v19 = vpop.f32.mrf.mxu1  ;;  %v5021_v11 = vsel %vm4976_vm2, %v7986_v26, %v7975_v52  ;;  %v8059_v27 = vadd.f32 %v8017_v25, %v8015_v29  ;;  %v8063_v4 = vadd.f32 %v8024_v42, %v8022_v34  ;;  %v8065_v13 = vadd.f32 %v3640_v32, %v3567_v9 }
 0x252   :  { %v4586_v48 = vrot.slane %v4585_v54, 1  ;;  %v4593_v58 = vrot.slane %v4592_v56, 1  ;;  %v4598_v16 = vrot.slane %v4597_v24, 2  ;;  %v4605_v47 = vrot.slane %v4604_v57, 2  ;;  %v3656_v60 = vpop.f32.mrf.mxu0 }
 0x253   :  { %v3583_v55 = vpop.f32.mrf.mxu1  ;;  %v5022_v40 = vsel %vm4978_vm3, %v7995_v62, %v5021_v11  ;;  %v8069_v52 = vadd.f32 %v3642_v51, %v3569_v61  ;;  %v8071_v26 = vadd.f32 %v3646_v49, %v3573_v45  ;;  %v8073_v29 = vadd.f32 %v3648_v1, %v3575_v41 }
 0x254   :  { %v4587_v25 = vmax.f32 %v4585_v54, %v4586_v48  ;;  %v4599_v34 = vmax.f32 %v4597_v24, %v4598_v16  ;;  %v4606_v42 = vmax.f32 %v4604_v57, %v4605_v47  ;;  %v4594_v9 = vmax.f32 %v4592_v56, %v4593_v58  ;;  %v3658_v14 = vpop.f32.mrf.mxu0 }
 0x255   :  { %v3585_v32 = vpop.f32.mrf.mxu1  ;;  %v5023_v44 = vsel %vm4980_vm4, %v4566_v12, %v5022_v40  ;;  %v8076_v21 = vadd.f32 %v3650_v59, %v3577_v18  ;;  %v8078_v35 = vadd.f32 %v3652_v46, %v3579_v19  ;;  %v8080_v33 = vadd.f32 %v3656_v60, %v3583_v55 }
 0x256   :  { %v5018_v62 = vsel %vm4984_vm6, %v4587_v25, %v5017_v23  ;;  %v4600_v61 = vrot.slane %v4599_v34, 1  ;;  %v4607_v51 = vrot.slane %v4606_v42, 1  ;;  %v5024_v6 = vsel %vm4982_vm5, %v4580_v2, %v5023_v44  ;;  %v3660_v45 = vpop.f32.mrf.mxu0 }
 0x257   :  { %v3587_v8 = vpop.f32.mrf.mxu1  ;;  %v5025_v49 = vsel %vm4984_vm6, %v4594_v9, %v5024_v6  ;;  %v8085_v7 = vadd.f32 %v3658_v14, %v3585_v32 }
 0x258   :  { %v8087_v17 = vadd.f32 %v3660_v45, %v3587_v8  ;;  %v4601_v12 = vmax.f32 %v4599_v34, %v4600_v61  ;;  %v4608_v0 = vmax.f32 %v4606_v42, %v4607_v51  ;;  %v3662_v31 = vpop.f32.mrf.mxu0  ;;  %v7019_v8 = vld [vmem:[#allocation8 + $0x178] sm:$0xff]  }
 0x259   :  { %v3589_v15 = vpop.f32.mrf.mxu1  ;;  %6255 = vmatprep.subr.bf16.mxu1 %v7019_v8  ;;  %v7030_v8 = vld [vmem:[#allocation8 + $0x110] sm:$0xff]  }
 0x25a   :  { %v8089_v50 = vadd.f32 %v3662_v31, %v3589_v15  ;;  %v5019_v41 = vsel %vm4986_vm7, %v4601_v12, %v5018_v62  ;;  %v5026_v1 = vsel %vm4986_vm7, %v4608_v0, %v5025_v49  ;;  %v7020_v49 = vld [vmem:[#allocation8 + $0x138] sm:$0xff]  }
 0x25b   :  { %v5064_v43 = vpack.c.bf16 %v5026_v1, %v5026_v1  ;;  %v5063_v20 = vpack.c.bf16 %v5019_v41, %v5019_v41  ;;  %v3772_v63 = vpop.f32.mrf.mxu1  ;;  %6256 = vmatpush3.bf16.msra.mxu1 %v7020_v49  ;;  %v7021_v1 = vld [vmem:[#allocation8 + $0x170] sm:$0xff]  }
 0x25c   :  { %6257 = vmatprep.subr.bf16.mxu1 %v7021_v1 }
 0x25d   :  { %5530 = vmatprep.mubr.bf16.mxu0 %v5064_v43  ;;  %v3774_v30 = vpop.f32.mrf.mxu1 }
 0x25e   :  { %5531 = vmatmul.mubr.bf16.vlgmr.msra.gmra.mxu0 %v5063_v20  ;;  %v7022_v20 = vld [vmem:[#allocation8 + $0x130] sm:$0xff]  }
 0x25f   :  { %v3776_v36 = vpop.f32.mrf.mxu1  ;;  %6258 = vmatpush3.bf16.msra.mxu1 %v7022_v20 }
 0x261   :  { %v3778_v38 = vpop.f32.mrf.mxu1 }
 0x263   :  { %v3782_v3 = vpop.f32.mrf.mxu1 }
 0x265   :  { %v3784_v53 = vpop.f32.mrf.mxu1 }
 0x267   :  { %v3786_v18 = vpop.f32.mrf.mxu1 }
 0x269   :  { %v3788_v59 = vpop.f32.mrf.mxu1 }
 0x26b   :  { %v3792_v2 = vpop.f32.mrf.mxu1 }
 0x26d   :  { %v3794_v46 = vpop.f32.mrf.mxu1 }
 0x26f   :  { %v3796_v25 = vpop.f32.mrf.mxu1 }
 0x271   :  { %v3798_v61 = vpop.f32.mrf.mxu1 }
 0x273   :  { %v3802_v15 = vpop.f32.mrf.mxu1 }
 0x27a   :  { %v3699_v23 = vpop.f32.mrf.mxu0 }
 0x27b   :  { %v3773_v54 = vadd.f32 %v3772_v63, %v3699_v23  ;;  %v7024_v23 = vld [vmem:[#allocation8 + $0x128] sm:$0xff]  }
 0x27c   :  { %v3701_v56 = vpop.f32.mrf.mxu0 }
 0x27d   :  { %v4625_v24 = vrot.slane %v3773_v54, 1  ;;  %v3775_v57 = vadd.f32 %v3774_v30, %v3701_v56 }
 0x27e   :  { %v3703_v19 = vpop.f32.mrf.mxu0 }
 0x27f   :  { %v8094_v11 = vadd.f32 %v4625_v24, %v8037_v28  ;;  %v4626_v48 = vrot.slane %v3775_v57, 1  ;;  %v3777_v58 = vadd.f32 %v3776_v36, %v3703_v19 }
 0x280   :  { %v3705_v16 = vpop.f32.mrf.mxu0 }
 0x281   :  { %v8097_v47 = vadd.f32 %v4626_v48, %v8041_v5  ;;  %v4627_v55 = vrot.slane %v3777_v58, 1  ;;  %v3779_v60 = vadd.f32 %v3778_v38, %v3705_v16  ;;  %v3804_v38 = vpop.f32.mrf.mxu1  ;;  %v7026_v58 = vld [vmem:[#allocation8 + $0x120] sm:$0xff]  }
 0x282   :  { %v3709_v40 = vpop.f32.mrf.mxu0 }
 0x283   :  { %v8100_v34 = vadd.f32 %v4627_v55, %v8048_v10  ;;  %v4628_v42 = vrot.slane %v3779_v60, 1  ;;  %v3783_v9 = vadd.f32 %v3782_v3, %v3709_v40  ;;  %v3806_v24 = vpop.f32.mrf.mxu1 }
 0x284   :  { %v3711_v32 = vpop.f32.mrf.mxu0 }
 0x285   :  { %v8103_v14 = vadd.f32 %v4628_v42, %v8052_v37  ;;  %v4629_v28 = vrot.slane %v3783_v9, 1  ;;  %v3785_v44 = vadd.f32 %v3784_v53, %v3711_v32  ;;  %v3808_v40 = vpop.f32.mrf.mxu1  ;;  %v7027_v9 = vld [vmem:[#allocation8 + $0x158] sm:$0xff]  }
 0x286   :  { %v3713_v62 = vpop.f32.mrf.mxu0 }
 0x287   :  { %v8106_v5 = vadd.f32 %v4629_v28, %v8059_v27  ;;  %v4630_v51 = vrot.slane %v3785_v44, 1  ;;  %v3787_v6 = vadd.f32 %v3786_v18, %v3713_v62  ;;  %v7023_v18 = vld [vmem:[#allocation8 + $0x168] sm:$0xff]   ;;  %v7028_v28 = vld [vmem:[#allocation8 + $0x118] sm:$0xff]   ;;  %v7029_v44 = vld [vmem:[#allocation8 + $0x150] sm:$0xff]  }
 0x288   :  { %v3715_v45 = vpop.f32.mrf.mxu0  ;;  %6259 = vmatprep.subr.bf16.mxu1 %v7023_v18 }
 0x289   :  { %v8109_v10 = vadd.f32 %v4630_v51, %v8063_v4  ;;  %v4631_v12 = vrot.slane %v3787_v6, 1  ;;  %v3789_v0 = vadd.f32 %v3788_v59, %v3715_v45  ;;  %6260 = vmatpush3.bf16.msra.mxu1 %v7024_v23  ;;  %v7034_v23 = vld [vmem:[#allocation8 + $0x100] sm:$0xff]  }
 0x28a   :  { %v3719_v37 = vpop.f32.mrf.mxu0 }
 0x28b   :  { %v8112_v31 = vadd.f32 %v4631_v12, %v8065_v13  ;;  %v4632_v41 = vrot.slane %v3789_v0, 1  ;;  %v3793_v27 = vadd.f32 %v3792_v2, %v3719_v37  ;;  %v7031_v12 = vld [vmem:[#allocation8 + $0x148] sm:$0xff]  }
 0x28c   :  { %v3721_v43 = vpop.f32.mrf.mxu0 }
 0x28d   :  { %v8115_v63 = vadd.f32 %v4632_v41, %v8069_v52  ;;  %v4633_v30 = vrot.slane %v3793_v27, 1  ;;  %v3795_v4 = vadd.f32 %v3794_v46, %v3721_v43  ;;  %v7025_v46 = vld [vmem:[#allocation8 + $0x160] sm:$0xff]   ;;  %v7032_v43 = vld [vmem:[#allocation8 + $0x108] sm:$0xff]  }
 0x28e   :  { %v3723_v36 = vpop.f32.mrf.mxu0  ;;  %6261 = vmatprep.subr.bf16.mxu1 %v7025_v46 }
 0x28f   :  { %v8118_v3 = vadd.f32 %v4633_v30, %v8071_v26  ;;  %v4634_v53 = vrot.slane %v3795_v4, 1  ;;  %v3797_v13 = vadd.f32 %v3796_v25, %v3723_v36  ;;  %6262 = vmatpush3.bf16.msra.mxu1 %v7026_v58  ;;  %v7033_v4 = vld [vmem:[#allocation8 + $0x140] sm:$0xff]  }
 0x290   :  { %v3725_v59 = vpop.f32.mrf.mxu0  ;;  %6263 = vmatprep.subr.bf16.mxu1 %v7027_v9 }
 0x291   :  { %v8121_v2 = vadd.f32 %v4634_v53, %v8073_v29  ;;  %v4635_v54 = vrot.slane %v3797_v13, 1  ;;  %v3799_v52 = vadd.f32 %v3798_v61, %v3725_v59 }
 0x292   :  { %v3729_v56 = vpop.f32.mrf.mxu0 }
 0x293   :  { %v8124_v57 = vadd.f32 %v4635_v54, %v8076_v21  ;;  %v4636_v19 = vrot.slane %v3799_v52, 1  ;;  %v3803_v26 = vadd.f32 %v3802_v15, %v3729_v56  ;;  %6264 = vmatpush3.bf16.msra.mxu1 %v7028_v28 }
 0x294   :  { %v3731_v48 = vpop.f32.mrf.mxu0  ;;  %6265 = vmatprep.subr.bf16.mxu1 %v7029_v44 }
 0x295   :  { %v8127_v16 = vadd.f32 %v4636_v19, %v8078_v35  ;;  %v4637_v55 = vrot.slane %v3803_v26, 1  ;;  %v3805_v29 = vadd.f32 %v3804_v38, %v3731_v48  ;;  %v7035_v19 = vld [vmem:[#allocation11 + $0x38] sm:$0xff]   ;;  %v7251_v48 = vmov 0.0  }
 0x296   :  { %v3733_v60 = vpop.f32.mrf.mxu0  ;;  %6286 = vmatprep.subr.bf16.mxu0 %v7251_v48  ;;  %6302 = vmatprep.mubr.msk.bf16.mxu0 %vm7252_vm10, %v7251_v48 }
 0x297   :  { %v8130_v25 = vadd.f32 %v4637_v55, %v8080_v33  ;;  %v4638_v42 = vrot.slane %v3805_v29, 1  ;;  %v3807_v21 = vadd.f32 %v3806_v24, %v3733_v60  ;;  %6266 = vmatpush3.bf16.msra.mxu1 %v7030_v8  ;;  %6287 = vmatpush3.bf16.msra.mxu0 %v7035_v19 }
 0x298   :  { %v3735_v32 = vpop.f32.mrf.mxu0  ;;  %6267 = vmatprep.subr.bf16.mxu1 %v7031_v12  ;;  %6288 = vmatprep.subr.bf16.mxu0 %v7251_v48 }
 0x299   :  { %v8133_v62 = vadd.f32 %v4638_v42, %v8085_v7  ;;  %v4639_v35 = vrot.slane %v3807_v21, 1  ;;  %v3809_v61 = vadd.f32 %v3808_v40, %v3735_v32 }
 0x29a   :  { %v3918_v6 = vpop.f32.mrf.mxu0 }
 0x29b   :  { %v3845_v51 = vpop.f32.mrf.mxu1  ;;  %v8136_v45 = vadd.f32 %v4639_v35, %v8087_v17  ;;  %v4640_v33 = vrot.slane %v3809_v61, 1  ;;  %6268 = vmatpush3.bf16.msra.mxu1 %v7032_v43  ;;  %v7037_v35 = vld [vmem:[#allocation11 + $0x28] sm:$0xff]  }
 0x29c   :  { %v3919_v49 = vadd.f32 %v3918_v6, %v3845_v51  ;;  %v3920_v37 = vpop.f32.mrf.mxu0  ;;  %6269 = vmatprep.subr.bf16.mxu1 %v7033_v4 }
 0x29d   :  { %v3847_v0 = vpop.f32.mrf.mxu1  ;;  %v8139_v15 = vadd.f32 %v4640_v33, %v8089_v50 }
 0x29e   :  { %v4689_v7 = vrot.slane %v3919_v49, 2  ;;  %v3921_v41 = vadd.f32 %v3920_v37, %v3847_v0  ;;  %v3922_v1 = vpop.f32.mrf.mxu0  ;;  %v7038_v37 = vld [vmem:[#allocation11 + $0x20] sm:$0xff]  }
 0x29f   :  { %v3849_v27 = vpop.f32.mrf.mxu1  ;;  %6270 = vmatpush3.bf16.msra.mxu1 %v7034_v23 }
 0x2a0   :  { %v8142_v20 = vadd.f32 %v4689_v7, %v8094_v11  ;;  %v4690_v17 = vrot.slane %v3921_v41, 2  ;;  %v3923_v30 = vadd.f32 %v3922_v1, %v3849_v27  ;;  %v3924_v38 = vpop.f32.mrf.mxu0 }
 0x2a1   :  { %v3851_v36 = vpop.f32.mrf.mxu1 }
 0x2a2   :  { %v8145_v53 = vadd.f32 %v4690_v17, %v8097_v47  ;;  %v4691_v50 = vrot.slane %v3923_v30, 2  ;;  %v3925_v13 = vadd.f32 %v3924_v38, %v3851_v36  ;;  %v3928_v59 = vpop.f32.mrf.mxu0  ;;  %v7039_v36 = vld [vmem:[#allocation11 + $0x18] sm:$0xff]  }
 0x2a3   :  { %v3855_v18 = vpop.f32.mrf.mxu1 }
 0x2a4   :  { %v8148_v54 = vadd.f32 %v4691_v50, %v8100_v34  ;;  %v4692_v11 = vrot.slane %v3925_v13, 2  ;;  %v3929_v52 = vadd.f32 %v3928_v59, %v3855_v18  ;;  %v3930_v24 = vpop.f32.mrf.mxu0  ;;  %v7036_v34 = vld [vmem:[#allocation11 + $0x30] sm:$0xff]  }
 0x2a5   :  { %v3857_v56 = vpop.f32.mrf.mxu1  ;;  %6289 = vmatpush3.bf16.msra.mxu0 %v7036_v34 }
 0x2a6   :  { %v8151_v26 = vadd.f32 %v4692_v11, %v8103_v14  ;;  %v4693_v47 = vrot.slane %v3929_v52, 2  ;;  %v3931_v46 = vadd.f32 %v3930_v24, %v3857_v56  ;;  %v3932_v55 = vpop.f32.mrf.mxu0  ;;  %6290 = vmatprep.subr.bf16.mxu0 %v7251_v48  ;;  %v7040_v56 = vld [vmem:[#allocation11 + $0x10] sm:$0xff]  }
 0x2a7   :  { %v3859_v58 = vpop.f32.mrf.mxu1 }
 0x2a8   :  { %v8155_v29 = vadd.f32 %v4693_v47, %v8106_v5  ;;  %v4694_v60 = vrot.slane %v3931_v46, 2  ;;  %v3933_v40 = vadd.f32 %v3932_v55, %v3859_v58  ;;  %v3934_v14 = vpop.f32.mrf.mxu0 }
 0x2a9   :  { %v3861_v42 = vpop.f32.mrf.mxu1  ;;  %6291 = vmatpush3.bf16.msra.mxu0 %v7037_v35 }
 0x2aa   :  { %v8159_v21 = vadd.f32 %v4694_v60, %v8109_v10  ;;  %v4695_v9 = vrot.slane %v3933_v40, 2  ;;  %v3935_v32 = vadd.f32 %v3934_v14, %v3861_v42  ;;  %v3938_v44 = vpop.f32.mrf.mxu0  ;;  %6292 = vmatprep.subr.bf16.mxu0 %v7251_v48 }
 0x2ab   :  { %v3865_v28 = vpop.f32.mrf.mxu1 }
 0x2ac   :  { %v8162_v61 = vadd.f32 %v4695_v9, %v8112_v31  ;;  %v4696_v5 = vrot.slane %v3935_v32, 2  ;;  %v3939_v51 = vadd.f32 %v3938_v44, %v3865_v28  ;;  %v3940_v8 = vpop.f32.mrf.mxu0 }
 0x2ad   :  { %v3867_v6 = vpop.f32.mrf.mxu1  ;;  %6293 = vmatpush3.bf16.msra.mxu0 %v7038_v37 }
 0x2ae   :  { %v8166_v33 = vadd.f32 %v4696_v5, %v8115_v63  ;;  %v4697_v10 = vrot.slane %v3939_v51, 2  ;;  %v3941_v49 = vadd.f32 %v3940_v8, %v3867_v6  ;;  %v3942_v0 = vpop.f32.mrf.mxu0  ;;  %6294 = vmatprep.subr.bf16.mxu0 %v7251_v48 }
 0x2af   :  { %v3869_v12 = vpop.f32.mrf.mxu1 }
 0x2b0   :  { %v8169_v7 = vadd.f32 %v4697_v10, %v8118_v3  ;;  %v4698_v31 = vrot.slane %v3941_v49, 2  ;;  %v3943_v41 = vadd.f32 %v3942_v0, %v3869_v12  ;;  %v3944_v1 = vpop.f32.mrf.mxu0  ;;  %v4801_v12 = vld [vmem:[#allocation7 + $0x4] sm:$0x3] }
 0x2b1   :  { %v3871_v27 = vpop.f32.mrf.mxu1  ;;  %6295 = vmatpush3.bf16.msra.mxu0 %v7039_v36 }
 0x2b2   :  { %v8173_v43 = vadd.f32 %v4698_v31, %v8121_v2  ;;  %v4699_v63 = vrot.slane %v3943_v41, 2  ;;  %v3945_v17 = vadd.f32 %v3944_v1, %v3871_v27  ;;  %v3948_v4 = vpop.f32.mrf.mxu0  ;;  %6296 = vmatprep.subr.bf16.mxu0 %v7251_v48  ;;  %v8213_v1 = vrot.slane %v4801_v12, %v7507_v22 }
 0x2b3   :  { %v3875_v30 = vpop.f32.mrf.mxu1 }
 0x2b4   :  { %v8176_v38 = vadd.f32 %v4699_v63, %v8124_v57  ;;  %v4700_v3 = vrot.slane %v3945_v17, 2  ;;  %v3949_v50 = vadd.f32 %v3948_v4, %v3875_v30  ;;  %v3950_v18 = vpop.f32.mrf.mxu0 }
 0x2b5   :  { %v3877_v13 = vpop.f32.mrf.mxu1  ;;  %6297 = vmatpush3.bf16.msra.mxu0 %v7040_v56 }
 0x2b6   :  { %v8180_v59 = vadd.f32 %v4700_v3, %v8127_v16  ;;  %v4701_v2 = vrot.slane %v3949_v50, 2  ;;  %v3951_v23 = vadd.f32 %v3950_v18, %v3877_v13  ;;  %v3952_v52 = vpop.f32.mrf.mxu0  ;;  %6298 = vmatprep.subr.bf16.mxu0 %v7251_v48  ;;  %v8219_v50 = vrot.slane %v4801_v12, %v7517_v39 }
 0x2b7   :  { %v3879_v11 = vpop.f32.mrf.mxu1 }
 0x2b8   :  { %v8183_v24 = vadd.f32 %v4701_v2, %v8130_v25  ;;  %v4702_v57 = vrot.slane %v3951_v23, 2  ;;  %v3953_v19 = vadd.f32 %v3952_v52, %v3879_v11  ;;  %v3954_v46 = vpop.f32.mrf.mxu0 }
 0x2b9   :  { %v3881_v47 = vpop.f32.mrf.mxu1 }
 0x2ba   :  { %v8187_v58 = vadd.f32 %v4702_v57, %v8133_v62  ;;  %v4703_v16 = vrot.slane %v3953_v19, 2  ;;  %v3955_v55 = vadd.f32 %v3954_v46, %v3881_v47 }
 0x2bb   :  { %v4064_v34 = vpop.f32.mrf.mxu1 }
 0x2bc   :  { %v8190_v60 = vadd.f32 %v4703_v16, %v8136_v45  ;;  %v4704_v40 = vrot.slane %v3955_v55, 2 }
 0x2bd   :  { %v4066_v25 = vpop.f32.mrf.mxu1 }
 0x2be   :  { %v8194_v42 = vadd.f32 %v4704_v40, %v8139_v15 }
 0x2bf   :  { %v4068_v14 = vpop.f32.mrf.mxu1 }
 0x2c1   :  { %v4070_v9 = vpop.f32.mrf.mxu1 }
 0x2c3   :  { %v4074_v32 = vpop.f32.mrf.mxu1 }
 0x2c5   :  { %v4076_v28 = vpop.f32.mrf.mxu1 }
 0x2c7   :  { %v4078_v62 = vpop.f32.mrf.mxu1 }
 0x2c9   :  { %v4080_v44 = vpop.f32.mrf.mxu1 }
 0x2cb   :  { %v8196_v35 = vpop.f32.mrf.mxu1 }
 0x2cd   :  { %v8198_v5 = vpop.f32.mrf.mxu1 }
 0x2cf   :  { %v8200_v51 = vpop.f32.mrf.mxu1 }
 0x2d1   :  { %v8202_v45 = vpop.f32.mrf.mxu1 }
 0x2d3   :  { %v8204_v6 = vpop.f32.mrf.mxu1 }
 0x2d5   :  { %v8206_v8 = vpop.f32.mrf.mxu1 }
 0x2d7   :  { %v8208_v15 = vpop.f32.mrf.mxu1 }
 0x2d9   :  { %v8210_v10 = vpop.f32.mrf.mxu1 }
 0x2da   :  { %v3991_v49 = vpop.f32.mrf.mxu0 }
 0x2db   :  { %v6227_v0 = vpop.f32.mrf.mxu1  ;;  %v4065_v37 = vadd.f32 %v4064_v34, %v3991_v49 }
 0x2dc   :  { %v3993_v31 = vpop.f32.mrf.mxu0 }
 0x2dd   :  { %v6228_v41 = vpop.f32.mrf.mxu1  ;;  %v4753_v27 = vrot.slane %v4065_v37, 3  ;;  %v4067_v63 = vadd.f32 %v4066_v25, %v3993_v31 }
 0x2de   :  { %v8215_v17 = vadd.f32 %v6228_v41, %v6227_v0  ;;  %v3995_v30 = vpop.f32.mrf.mxu0 }
 0x2df   :  { %v6230_v4 = vpop.f32.mrf.mxu1  ;;  %v4785_v36 = vadd.f32 %v4753_v27, %v8142_v20  ;;  %v4754_v3 = vrot.slane %v4067_v63, 3  ;;  %v4069_v13 = vadd.f32 %v4068_v14, %v3995_v30 }
 0x2e0   :  { %v3997_v18 = vpop.f32.mrf.mxu0 }
 0x2e1   :  { %v6231_v2 = vpop.f32.mrf.mxu1  ;;  %v4813_v23 = vadd.f32 %v8213_v1, %v4785_v36  ;;  %v4786_v11 = vadd.f32 %v4754_v3, %v8145_v53  ;;  %v4755_v22 = vrot.slane %v4069_v13, 3  ;;  %v4071_v52 = vadd.f32 %v4070_v9, %v3997_v18 }
 0x2e2   :  { %v4001_v56 = vpop.f32.mrf.mxu0 }
 0x2e3   :  { %v4829_v57 = vmax.f32 %v4813_v23, 0.0  ;;  %v4814_v19 = vadd.f32 %v8219_v50, %v4786_v11  ;;  %v4787_v20 = vadd.f32 %v4755_v22, %v8148_v54  ;;  %v4756_v47 = vrot.slane %v4071_v52, 3 }
 0x2e4   :  { %v4075_v46 = vadd.f32 %v4074_v32, %v4001_v56  ;;  %v4003_v39 = vpop.f32.mrf.mxu0 }
 0x2e5   :  { %v4846_v16 = vsel %vm4845_vm9, %v4829_v57, -inf  ;;  %v4830_v55 = vmax.f32 %v4814_v19, 0.0  ;;  %v4815_v34 = vadd.f32 %v8213_v1, %v4787_v20  ;;  %v4788_v40 = vadd.f32 %v4756_v47, %v8151_v26 }
 0x2e6   :  { %v4847_v53 = vrot.slane %v4846_v16, 4  ;;  %v4757_v25 = vrot.slane %v4075_v46, 3  ;;  %v4077_v14 = vadd.f32 %v4076_v28, %v4003_v39  ;;  %v4005_v9 = vpop.f32.mrf.mxu0 }
 0x2e7   :  { %v4853_v49 = vsel %vm4845_vm9, %v4830_v55, -inf  ;;  %v4831_v12 = vmax.f32 %v4815_v34, 0.0  ;;  %v4816_v0 = vadd.f32 %v8219_v50, %v4788_v40  ;;  %v4079_v54 = vadd.f32 %v4078_v62, %v4005_v9 }
 0x2e8   :  { %v4848_v37 = vmax.f32 %v4846_v16, %v4847_v53  ;;  %v4854_v32 = vrot.slane %v4853_v49, 4  ;;  %v4789_v31 = vadd.f32 %v4757_v25, %v8155_v29  ;;  %v4758_v41 = vrot.slane %v4077_v14, 3  ;;  %v4007_v27 = vpop.f32.mrf.mxu0 }
 0x2e9   :  { %v4860_v63 = vsel %vm4845_vm9, %v4831_v12, -inf  ;;  %v4832_v30 = vmax.f32 %v4816_v0, 0.0  ;;  %v4759_v26 = vrot.slane %v4079_v54, 3  ;;  %v4081_v4 = vadd.f32 %v4080_v44, %v4007_v27 }
 0x2ea   :  { %v4849_v36 = vrot.slane %v4848_v37, 2  ;;  %v4855_v28 = vmax.f32 %v4853_v49, %v4854_v32  ;;  %v4861_v3 = vrot.slane %v4860_v63, 4  ;;  %v4817_v13 = vadd.f32 %v8213_v1, %v4789_v31  ;;  %v4011_v18 = vpop.f32.mrf.mxu0 }
 0x2eb   :  { %v4867_v2 = vsel %vm4845_vm9, %v4832_v30, -inf  ;;  %v4790_v62 = vadd.f32 %v4758_v41, %v8159_v21  ;;  %v4791_v23 = vadd.f32 %v4759_v26, %v8162_v61  ;;  %v4760_v29 = vrot.slane %v4081_v4, 3 }
 0x2ec   :  { %v4850_v11 = vmax.f32 %v4848_v37, %v4849_v36  ;;  %v4856_v22 = vrot.slane %v4855_v28, 2  ;;  %v4862_v52 = vmax.f32 %v4860_v63, %v4861_v3  ;;  %v4868_v56 = vrot.slane %v4867_v2, 4  ;;  %v4013_v57 = vpop.f32.mrf.mxu0 }
 0x2ed   :  { %v4833_v19 = vmax.f32 %v4817_v13, 0.0  ;;  %v4818_v44 = vadd.f32 %v8219_v50, %v4790_v62  ;;  %v4819_v20 = vadd.f32 %v8213_v1, %v4791_v23  ;;  %v4792_v47 = vadd.f32 %v4760_v29, %v8166_v33 }
 0x2ee   :  { %v4851_v46 = vrot.slane %v4850_v11, 1  ;;  %v4857_v39 = vmax.f32 %v4855_v28, %v4856_v22  ;;  %v4863_v16 = vrot.slane %v4862_v52, 2  ;;  %v4869_v55 = vmax.f32 %v4867_v2, %v4868_v56  ;;  %v4015_v21 = vpop.f32.mrf.mxu0 }
 0x2ef   :  { %v4874_v61 = vsel %vm4845_vm9, %v4833_v19, -inf  ;;  %v4834_v34 = vmax.f32 %v4818_v44, 0.0  ;;  %v4835_v40 = vmax.f32 %v4819_v20, 0.0  ;;  %v4820_v53 = vadd.f32 %v8219_v50, %v4792_v47 }
 0x2f0   :  { %v4852_v25 = vmax.f32 %v4850_v11, %v4851_v46  ;;  %v4858_v14 = vrot.slane %v4857_v39, 1  ;;  %v4864_v9 = vmax.f32 %v4862_v52, %v4863_v16  ;;  %v4870_v49 = vrot.slane %v4869_v55, 2  ;;  %v4017_v12 = vpop.f32.mrf.mxu0 }
 0x2f1   :  { %v4875_v0 = vrot.slane %v4874_v61, 4  ;;  %v4881_v54 = vsel %vm4845_vm9, %v4834_v34, -inf  ;;  %v4888_v33 = vsel %vm4845_vm9, %v4835_v40, -inf  ;;  %v4836_v37 = vmax.f32 %v4820_v53, 0.0 }
 0x2f2   :  { %v4859_v32 = vmax.f32 %v4857_v39, %v4858_v14  ;;  %v4865_v31 = vrot.slane %v4864_v9, 1  ;;  %v4871_v41 = vmax.f32 %v4869_v55, %v4870_v49  ;;  %v4882_v27 = vrot.slane %v4881_v54, 4  ;;  %v4021_v63 = vpop.f32.mrf.mxu0 }
 0x2f3   :  { %v4876_v30 = vmax.f32 %v4874_v61, %v4875_v0  ;;  %v4889_v26 = vrot.slane %v4888_v33, 4  ;;  %v4895_v4 = vsel %vm4845_vm9, %v4836_v37, -inf  ;;  %v4085_v36 = vadd.f32 %v8196_v35, %v4011_v18 }
 0x2f4   :  { %v4866_v28 = vmax.f32 %v4864_v9, %v4865_v31  ;;  %v4872_v3 = vrot.slane %v4871_v41, 1  ;;  %v4883_v13 = vmax.f32 %v4881_v54, %v4882_v27  ;;  %v4896_v2 = vrot.slane %v4895_v4, 4  ;;  %v4023_v44 = vpop.f32.mrf.mxu0 }
 0x2f5   :  { %v4877_v62 = vrot.slane %v4876_v30, 2  ;;  %v4890_v23 = vmax.f32 %v4888_v33, %v4889_v26  ;;  %v4761_v29 = vrot.slane %v4085_v36, 3  ;;  %v4087_v11 = vadd.f32 %v8198_v5, %v4013_v57 }
 0x2f6   :  { %v5045_v22 = vsel %vm4974_vm1, %v4866_v28, %v4852_v25  ;;  %v4873_v52 = vmax.f32 %v4871_v41, %v4872_v3  ;;  %v4884_v56 = vrot.slane %v4883_v13, 2  ;;  %v4897_v19 = vmax.f32 %v4895_v4, %v4896_v2  ;;  %v4025_v14 = vpop.f32.mrf.mxu0 }
 0x2f7   :  { %v4878_v20 = vmax.f32 %v4876_v30, %v4877_v62  ;;  %v4891_v47 = vrot.slane %v4890_v23, 2  ;;  %v4793_v46 = vadd.f32 %v4761_v29, %v8169_v7  ;;  %v4762_v35 = vrot.slane %v4087_v11, 3 }
 0x2f8   :  { %v8249_v18 = vsel %vm4974_vm1, %v4873_v52, %v4859_v32  ;;  %v4885_v39 = vmax.f32 %v4883_v13, %v4884_v56  ;;  %v4898_v16 = vrot.slane %v4897_v19, 2  ;;  %v4089_v55 = vadd.f32 %v8200_v51, %v4015_v21  ;;  %v4027_v30 = vpop.f32.mrf.mxu0 }
 0x2f9   :  { %v4879_v61 = vrot.slane %v4878_v20, 1  ;;  %v4892_v5 = vmax.f32 %v4890_v23, %v4891_v47  ;;  %v4821_v57 = vadd.f32 %v8213_v1, %v4793_v46  ;;  %v4794_v34 = vadd.f32 %v4762_v35, %v8173_v43 }
 0x2fa   :  { %v4886_v40 = vrot.slane %v4885_v39, 1  ;;  %v8254_v53 = vmax.f32 %v4897_v19, %v4898_v16  ;;  %v4763_v25 = vrot.slane %v4089_v55, 3  ;;  %v4091_v7 = vadd.f32 %v8202_v45, %v4017_v12 }
 0x2fb   :  { %v4880_v9 = vmax.f32 %v4878_v20, %v4879_v61  ;;  %v4893_v49 = vrot.slane %v4892_v5, 1  ;;  %v4837_v0 = vmax.f32 %v4821_v57, 0.0  ;;  %v4822_v54 = vadd.f32 %v8219_v50, %v4794_v34 }
 0x2fc   :  { %v8258_v33 = vmax.f32 %v4885_v39, %v4886_v40  ;;  %v4795_v51 = vadd.f32 %v4763_v25, %v8176_v38  ;;  %v4764_v21 = vrot.slane %v4091_v7, 3  ;;  %v4900_v41 = vrot.slane %v8254_v53, 1 }
 0x2fd   :  { %v5046_v37 = vsel %vm4976_vm2, %v4880_v9, %v5045_v22  ;;  %v4894_v43 = vmax.f32 %v4892_v5, %v4893_v49  ;;  %v4902_v32 = vsel %vm4845_vm9, %v4837_v0, -inf  ;;  %v4838_v31 = vmax.f32 %v4822_v54, 0.0 }
 0x2fe   :  { %v4903_v45 = vrot.slane %v4902_v32, 4  ;;  %v4823_v12 = vadd.f32 %v8213_v1, %v4795_v51  ;;  %v4796_v27 = vadd.f32 %v4764_v21, %v8180_v59  ;;  %v4095_v38 = vadd.f32 %v8204_v6, %v4021_v63 }
 0x2ff   :  { %v5047_v26 = vsel %vm4978_vm3, %v4894_v43, %v5046_v37  ;;  %v4909_v4 = vsel %vm4845_vm9, %v4838_v31, -inf  ;;  %v4097_v36 = vadd.f32 %v8206_v8, %v4023_v44  ;;  %v4099_v29 = vadd.f32 %v8208_v15, %v4025_v14 }
 0x300   :  { %v4904_v28 = vmax.f32 %v4902_v32, %v4903_v45  ;;  %v4910_v3 = vrot.slane %v4909_v4, 4  ;;  %v4839_v13 = vmax.f32 %v4823_v12, 0.0  ;;  %v4824_v2 = vadd.f32 %v8219_v50, %v4796_v27 }
 0x301   :  { %v4765_v62 = vrot.slane %v4095_v38, 3  ;;  %v4766_v23 = vrot.slane %v4097_v36, 3  ;;  %v4101_v59 = vadd.f32 %v8210_v10, %v4027_v30  ;;  %v4767_v63 = vrot.slane %v4099_v29, 3 }
 0x302   :  { %v4905_v11 = vrot.slane %v4904_v28, 2  ;;  %v4911_v22 = vmax.f32 %v4909_v4, %v4910_v3  ;;  %v4916_v52 = vsel %vm4845_vm9, %v4839_v13, -inf  ;;  %v4840_v56 = vmax.f32 %v4824_v2, 0.0 }
 0x303   :  { %v4917_v19 = vrot.slane %v4916_v52, 4  ;;  %v4797_v6 = vadd.f32 %v4765_v62, %v8183_v24  ;;  %v4798_v8 = vadd.f32 %v4766_v23, %v8187_v58  ;;  %v4768_v46 = vrot.slane %v4101_v59, 3 }
 0x304   :  { %v4906_v44 = vmax.f32 %v4904_v28, %v4905_v11  ;;  %v4912_v20 = vrot.slane %v4911_v22, 2  ;;  %v4923_v47 = vsel %vm4845_vm9, %v4840_v56, -inf  ;;  %v4799_v61 = vadd.f32 %v4767_v63, %v8190_v60 }
 0x305   :  { %v4918_v35 = vmax.f32 %v4916_v52, %v4917_v19  ;;  %v4924_v15 = vrot.slane %v4923_v47, 4  ;;  %v4825_v10 = vadd.f32 %v8213_v1, %v4797_v6  ;;  %v4826_v39 = vadd.f32 %v8219_v50, %v4798_v8 }
 0x306   :  { %v4907_v16 = vrot.slane %v4906_v44, 1  ;;  %v4913_v55 = vmax.f32 %v4911_v22, %v4912_v20  ;;  %v4800_v24 = vadd.f32 %v4768_v46, %v8194_v42  ;;  %v4827_v7 = vadd.f32 %v8213_v1, %v4799_v61 }
 0x307   :  { %v4919_v5 = vrot.slane %v4918_v35, 2  ;;  %v4925_v58 = vmax.f32 %v4923_v47, %v4924_v15  ;;  %v4841_v57 = vmax.f32 %v4825_v10, 0.0  ;;  %v4842_v34 = vmax.f32 %v4826_v39, 0.0 }
 0x308   :  { %v4908_v40 = vmax.f32 %v4906_v44, %v4907_v16  ;;  %v4914_v25 = vrot.slane %v4913_v55, 1  ;;  %v4828_v14 = vadd.f32 %v8219_v50, %v4800_v24  ;;  %v4901_v60 = vmax.f32 %v8254_v53, %v4900_v41 }
 0x309   :  { %v4920_v9 = vmax.f32 %v4918_v35, %v4919_v5  ;;  %v4926_v49 = vrot.slane %v4925_v58, 2  ;;  %v4930_v0 = vsel %vm4845_vm9, %v4841_v57, -inf  ;;  %v4937_v54 = vsel %vm4845_vm9, %v4842_v34, -inf }
 0x30a   :  { %v5048_v42 = vsel %vm4980_vm4, %v4908_v40, %v5047_v26  ;;  %v4931_v51 = vrot.slane %v4930_v0, 4  ;;  %v4938_v21 = vrot.slane %v4937_v54, 4  ;;  %v4843_v32 = vmax.f32 %v4827_v7, 0.0  ;;  %v7042_v7 = vld [vmem:[#allocation11] sm:$0xff]  }
 0x30b   :  { %v4921_v37 = vrot.slane %v4920_v9, 1  ;;  %v4927_v43 = vmax.f32 %v4925_v58, %v4926_v49  ;;  %v4844_v31 = vmax.f32 %v4828_v14, 0.0  ;;  %v4915_v45 = vmax.f32 %v4913_v55, %v4914_v25  ;;  %v6153_v55 = vld [vmem:[#allocation10] ss:$0 sm:$0xff]  ;;  %v7041_v25 = vld [vmem:[#allocation11 + $0x8] sm:$0xff]  }
 0x30c   :  { %v4932_v1 = vmax.f32 %v4930_v0, %v4931_v51  ;;  %v4939_v12 = vmax.f32 %v4937_v54, %v4938_v21  ;;  %v5053_v50 = vsel %vm4976_vm2, %v8258_v33, %v8249_v18  ;;  %v4944_v4 = vsel %vm4845_vm9, %v4843_v32, -inf  ;;  %6299 = vmatpush3.bf16.msra.mxu0 %v7041_v25 }
 0x30d   :  { %v4922_v27 = vmax.f32 %v4920_v9, %v4921_v37  ;;  %v4928_v30 = vrot.slane %v4927_v43, 1  ;;  %v4951_v53 = vsel %vm4845_vm9, %v4844_v31, -inf  ;;  %v4945_v38 = vrot.slane %v4944_v4, 4  ;;  %6300 = vmatprep.subr.bf16.mxu0 %v7251_v48 }
 0x30e   :  { %v4933_v41 = vrot.slane %v4932_v1, 2  ;;  %v4940_v26 = vrot.slane %v4939_v12, 2  ;;  %v4952_v36 = vrot.slane %v4951_v53, 4  ;;  %v5054_v3 = vsel %vm4978_vm3, %v4901_v60, %v5053_v50 }
 0x30f   :  { %v4929_v28 = vmax.f32 %v4927_v43, %v4928_v30  ;;  %v5049_v13 = vsel %vm4982_vm5, %v4922_v27, %v5048_v42  ;;  %v4946_v23 = vmax.f32 %v4944_v4, %v4945_v38  ;;  %v5055_v18 = vsel %vm4980_vm4, %v4915_v45, %v5054_v3  ;;  %v6202_v42 = vld [vmem:[#allocation13] ss:$0 sm:$0xff] }
 0x310   :  { %v4934_v2 = vmax.f32 %v4932_v1, %v4933_v41  ;;  %v4941_v62 = vmax.f32 %v4939_v12, %v4940_v26  ;;  %v4953_v29 = vmax.f32 %v4951_v53, %v4952_v36  ;;  %v5493_v5 = vadd.f32 %v8215_v17, %v6153_v55  ;;  %6301 = vmatpush3.bf16.msra.mxu0 %v7042_v7 }
 0x311   :  { %v4947_v11 = vrot.slane %v4946_v23, 2  ;;  %v5056_v52 = vsel %vm4982_vm5, %v4929_v28, %v5055_v18 }
 0x312   :  { %v4935_v33 = vrot.slane %v4934_v2, 1  ;;  %v4942_v59 = vrot.slane %v4941_v62, 1  ;;  %v4954_v22 = vrot.slane %v4953_v29, 2 }
 0x313   :  { %v4948_v19 = vmax.f32 %v4946_v23, %v4947_v11 }
 0x314   :  { %v4936_v56 = vmax.f32 %v4934_v2, %v4935_v33  ;;  %v4955_v6 = vmax.f32 %v4953_v29, %v4954_v22  ;;  %v4943_v8 = vmax.f32 %v4941_v62, %v4942_v59 }
 0x315   :  { %v4949_v63 = vrot.slane %v4948_v19, 1 }
 0x316   :  { %v4956_v44 = vrot.slane %v4955_v6, 1  ;;  %v5057_v20 = vsel %vm4984_vm6, %v4943_v8, %v5056_v52  ;;  %v5050_v47 = vsel %vm4984_vm6, %v4936_v56, %v5049_v13 }
 0x317   :  { %v4950_v46 = vmax.f32 %v4948_v19, %v4949_v63 }
 0x318   :  { %v4957_v35 = vmax.f32 %v4955_v6, %v4956_v44 }
 0x319   :  { %v5051_v10 = vsel %vm4986_vm7, %v4950_v46, %v5050_v47 }
 0x31a   :  { %v5058_v15 = vsel %vm4986_vm7, %v4957_v35, %v5057_v20  ;;  %v5065_v16 = vpack.c.bf16 %v5051_v10, %v5051_v10 }
 0x31b   :  { %v5066_v39 = vpack.c.bf16 %v5058_v15, %v5058_v15 }
 0x31d   :  { %5570 = vmatprep.mubr.bf16.mxu1 %v5066_v39 }
 0x31e   :  { %v6249_v61 = vpop.f32.mrf.mxu0  ;;  %5571 = vmatmul.mubr.bf16.vlgmr.msra.gmra.mxu1 %v5065_v16 }
 0x320   :  { %v6250_v24 = vpop.f32.mrf.mxu0 }
 0x321   :  { %v6251_v58 = vadd.f32 %v6250_v24, %v6249_v61 }
 0x322   :  { %v6252_v57 = vpop.f32.mrf.mxu0 }
 0x323   :  { %v5533_v34 = vadd.f32 %v6251_v58, %v5493_v5 }
 0x324   :  { %v6253_v40 = vpop.f32.mrf.mxu0 }
 0x3de   :  { %v6271_v14 = vpop.f32.mrf.mxu1 }
 0x3e0   :  { %v6272_v9 = vpop.f32.mrf.mxu1 }
 0x3e1   :  { %v6273_v49 = vadd.f32 %v6272_v9, %v6271_v14 }
 0x3e2   :  { %v6274_v0 = vpop.f32.mrf.mxu1 }
 0x3e3   :  { %v5573_v54 = vadd.f32 %v6273_v49, %v5533_v34 }
 0x3e4   :  { %v6275_v60 = vpop.f32.mrf.mxu1 }
 0x3e5   :  { %v5578_v17 = vpack.c.bf16 %v5573_v54, %v5573_v54 }
 0x3e7   :  { %6303 = vmatmul.mubr.bf16.vlgmr.msra.gmra.mxu0 %v5578_v17 }
 0x4a7   :  { %v5684_v51 = vpop.f32.mrf.mxu0 }
 0x4a8   :  { %v5685_v21 = vadd.f32 %v6202_v42, %v5684_v51 }
 0x4a9   :  { %v6304_v37 = vpop.f32.mrf.mxu0 }
 0x4aa   :  { %5690 = vst [vmem:[#allocation14] sm:$0xff] %v5685_v21 }
 0x4ab   :  { %v5687_v43 = vpop.f32.mrf.mxu0 }
 0x4ac   :  { %7218 = shalt.err (!%p7215_p11)
}
 0x4ad   :  { %5700 = dma.vmem_to_hbm [thread:$0]  %s5698_s6, 128, %s8313_s7, [#allocation4]   ;;  %v6305_v48 = vpop.f32.mrf.mxu0 }
 0x4ae   :  { %7235 = dma.done.wait [#allocation4], 128  }
 0x4af   :  { %7236 = vsyncadd [#allocation4], 4294967168 }
 0x4b0   :  { %5704 = vsyncpa [#allocation3], 1 }
 0x4b1   :  { %5705 = vsyncpa [#allocation6], 1 }
 0x4b2   :  { %5706 = vsyncpa [#allocation9], 1 }
 0x4b3   :  { %5707 = vsyncpa [#allocation12], 1 }
 0x4b4   :  { %5708 = vsyncpa [#allocation4], 1 }

</bundles_post_ra>
